<compile_context>
chip_gen: v7x
topology: tpu7x:2x2x1
jax: 0.10.0
libtpu: 0.0.40
codegen_flags: <defaults>
</compile_context>

<pallas_src>
import jax
import jax.numpy as jnp
import numpy as np
from jax import lax
from jax.experimental import pallas as pl
from jax.experimental.pallas import tpu as pltpu


# ----------------------------------------------------------------------------
# VMEM budget helpers (per-generation tiling, per performance review)
# ----------------------------------------------------------------------------
_MAX_UNROLL = 32     # cap on the fully-unrolled in-block time loop (compile time)
_F32 = 4             # bytes per element


def _tpu_vmem_capacity_bytes():
    try:
        return int(pltpu.get_tpu_info().vmem_capacity_bytes)
    except Exception:
        # Conservative fallback: v7x physical VMEM per TensorCore.
        return 64 * 1024 * 1024


def _vmem_limit_bytes():
    cap = _tpu_vmem_capacity_bytes()
    return int(max(16 << 20, min(cap * 3 // 4, cap - (8 << 20))))


def _choose_t_blk(T, B, d_in, H, C, first, last, vmem_limit):
    """Largest divisor of T whose per-block working set fits the VMEM budget and
    whose flattened row-block (t_blk*B) respects the (8,128) tiling rule."""
    budget = vmem_limit // 2                      # headroom for compiler temps
    G4, G8 = 4 * H, 8 * H
    # time-independent residents (weights/biases; count x2 for pipelining slack)
    w_in = (2 * d_in * G4) if first else (4 * H * G4)
    fixed = (w_in + 2 * H * G8 + 2 * G4) * _F32 * 2
    if last:
        fixed += (2 * H * C + C + B * C) * _F32 * 2
    # per-timestep streamed bytes: two input views (+ two output views), 2 buffers,
    # plus the in-kernel pre-gate values held in VMEM/vregs.
    per_t = 2 * B * d_in * _F32 * 2
    if not last:
        per_t += 2 * B * H * _F32 * 2
    per_t += 2 * B * G4 * _F32
    t_cap = max(1, (budget - fixed) // max(per_t, 1))
    t_cap = int(min(t_cap, _MAX_UNROLL, T))

    def ok(t):
        # block row-count must be a multiple of 8 or the full extent (T*B)
        return (t * B) % 8 == 0 or t == T

    for t in range(t_cap, 0, -1):
        if T % t == 0 and ok(t):
            return t
    # fallback: smallest valid divisor (t == T always qualifies)
    for t in range(1, T + 1):
        if T % t == 0 and ok(t):
            return t
    return T


def _block_diag(whh_f, whh_b):
    """(2H, 8H) block-diagonal recurrent weight: [whh_f 0; 0 whh_b]."""
    H, G = whh_f.shape
    z = jnp.zeros((H, G), whh_f.dtype)
    top = jnp.concatenate([whh_f, z], axis=1)
    bot = jnp.concatenate([z, whh_b], axis=1)
    return jnp.concatenate([top, bot], axis=0)


# ----------------------------------------------------------------------------
# Fused bidirectional LSTM layer kernel (projection + recurrence [+ FC] in one)
# ----------------------------------------------------------------------------
def _lstm_gates(gates, c_prev, H):
    """Apply LSTM nonlinearities to pre-activation gates (B, 4H)."""
    i_g = jax.nn.sigmoid(gates[:, 0 * H:1 * H])
    f_g = jax.nn.sigmoid(gates[:, 1 * H:2 * H])
    g_g = jnp.tanh(gates[:, 2 * H:3 * H])
    o_g = jax.nn.sigmoid(gates[:, 3 * H:4 * H])
    c_new = f_g * c_prev + i_g * g_g
    h_new = o_g * jnp.tanh(c_new)
    return h_new, c_new


def _make_layer_kernel(t_blk, B, H, first, last):
    G4 = 4 * H

    def kernel(*refs):
        pos = 0
        if first:
            xf_ref, xb_ref = refs[pos:pos + 2]; pos += 2
            wif_ref, wib_ref = refs[pos:pos + 2]; pos += 2
        else:
            pff_ref, pbf_ref, pfr_ref, pbr_ref = refs[pos:pos + 4]; pos += 4
            wif_f_ref, wif_b_ref, wib_f_ref, wib_b_ref = refs[pos:pos + 4]; pos += 4
        bf_ref, bb_ref = refs[pos:pos + 2]; pos += 2
        whh_ref = refs[pos]; pos += 1
        if last:
            fwf_ref, fwb_ref, fcb_ref = refs[pos:pos + 3]; pos += 3
            o_ref = refs[pos]; pos += 1
            hcat_sc, cf_sc, cb_sc, acc_sc = refs[pos:pos + 4]
        else:
            of_ref, ob_ref = refs[pos:pos + 2]; pos += 2
            hcat_sc, cf_sc, cb_sc = refs[pos:pos + 3]

        i = pl.program_id(0)
        nb = pl.num_programs(0)

        @pl.when(i == 0)
        def _():
            hcat_sc[...] = jnp.zeros_like(hcat_sc)
            cf_sc[...] = jnp.zeros_like(cf_sc)
            cb_sc[...] = jnp.zeros_like(cb_sc)

        # --- block input projection: one batched GEMM per direction (M = t_blk*B) ---
        if first:
            gf = (jnp.dot(xf_ref[...], wif_ref[...],
                          preferred_element_type=jnp.float32) + bf_ref[...])
            gb = (jnp.dot(xb_ref[...], wib_ref[...],
                          preferred_element_type=jnp.float32) + bb_ref[...])
        else:
            gf = (jnp.dot(pff_ref[...], wif_f_ref[...],
                          preferred_element_type=jnp.float32)
                  + jnp.dot(pbf_ref[...], wif_b_ref[...],
                            preferred_element_type=jnp.float32)
                  + bf_ref[...])
            gb = (jnp.dot(pfr_ref[...], wib_f_ref[...],
                          preferred_element_type=jnp.float32)
                  + jnp.dot(pbr_ref[...], wib_b_ref[...],
                            preferred_element_type=jnp.float32)
                  + bb_ref[...])

        whh_cat = whh_ref[...]       # (2H, 8H) block-diagonal [whh_f 0; 0 whh_b]

        # register-carried state across the fully-unrolled block loop
        h_cat = hcat_sc[...]         # (B, 2H) = [h_f | h_b]
        c_f = cf_sc[...]
        c_b = cb_sc[...]

        for s in range(t_blk):
            sb = t_blk - 1 - s       # backward direction's local step

            # one MXU push per timestep for both directions' recurrent matmul
            hmat = jnp.dot(h_cat, whh_cat, preferred_element_type=jnp.float32)
            gates_f = gf[s * B:(s + 1) * B] + hmat[:, :G4]
            gates_b = gb[sb * B:(sb + 1) * B] + hmat[:, G4:]

            h_f, c_f = _lstm_gates(gates_f, c_f, H)
            h_b, c_b = _lstm_gates(gates_b, c_b, H)

            if not last:
                of_ref[pl.ds(s * B, B), :] = h_f.astype(of_ref.dtype)
                ob_ref[pl.ds(sb * B, B), :] = h_b.astype(ob_ref.dtype)
            else:
                if s == 0:
                    @pl.when(i == 0)
                    def _(h_b=h_b):
                        # backward direction's first step == out[:, -1, H:]
                        acc_sc[...] = jnp.dot(h_b, fwb_ref[...],
                                              preferred_element_type=jnp.float32)
                if s == t_blk - 1:
                    @pl.when(i == nb - 1)
                    def _(h_f=h_f):
                        # forward direction's last step == out[:, -1, :H] -> logits
                        o_ref[...] = (acc_sc[...]
                                      + jnp.dot(h_f, fwf_ref[...],
                                                preferred_element_type=jnp.float32)
                                      + fcb_ref[...]).astype(o_ref.dtype)

            h_cat = jnp.concatenate([h_f, h_b], axis=-1)

        # write the carry back once per block
        hcat_sc[...] = h_cat
        cf_sc[...] = c_f
        cb_sc[...] = c_b

    return kernel


# ----------------------------------------------------------------------------
# pallas_call wrapper: one fused call per layer
# ----------------------------------------------------------------------------
def birnn_forward(x_btd, lstm_params, fc_w, fc_b):
    """Bidirectional multi-layer LSTM + FC(out[:, -1, :]).  x_btd: (B, T, D)."""
    B, T, D = x_btd.shape
    H = lstm_params[0]["whh_f"].shape[0]
    C = fc_w.shape[1]
    L = len(lstm_params)
    vmem_limit = _vmem_limit_bytes()

    # single layout change: (B,T,D) -> time-major, flattened to (T*B, D)
    x2d = jnp.transpose(x_btd, (1, 0, 2)).astype(jnp.float32).reshape(T * B, D)

    out_f = out_b = None
    logits = None
    for l, p in enumerate(lstm_params):
        first = (l == 0)
        last = (l == L - 1)
        d_in = D if first else 2 * H
        t_blk = _choose_t_blk(T, B, d_in, H, C, first, last, vmem_limit)
        nb = T // t_blk
        row_blk = t_blk * B

        whh_cat = _block_diag(p["whh_f"], p["whh_b"])

        fwd_map = lambda i: (i, 0)
        bwd_map = lambda i, nb=nb: (nb - 1 - i, 0)
        full2d = lambda a: pl.BlockSpec(a.shape, lambda i: (0, 0))

        if first:
            inputs = [x2d, x2d, p["wih_f"], p["wih_b"]]
            in_specs = [
                pl.BlockSpec((row_blk, D), fwd_map),
                pl.BlockSpec((row_blk, D), bwd_map),
                full2d(p["wih_f"]), full2d(p["wih_b"]),
            ]
        else:
            wif_f, wif_b = p["wih_f"][:H], p["wih_f"][H:]
            wib_f, wib_b = p["wih_b"][:H], p["wih_b"][H:]
            inputs = [out_f, out_b, out_f, out_b, wif_f, wif_b, wib_f, wib_b]
            in_specs = [
                pl.BlockSpec((row_blk, H), fwd_map),   # prev fwd feats, fwd block
                pl.BlockSpec((row_blk, H), fwd_map),   # prev bwd feats, fwd block
                pl.BlockSpec((row_blk, H), bwd_map),   # prev fwd feats, bwd block
                pl.BlockSpec((row_blk, H), bwd_map),   # prev bwd feats, bwd block
                full2d(wif_f), full2d(wif_b), full2d(wib_f), full2d(wib_b),
            ]
        inputs += [p["b_f"], p["b_b"], whh_cat]
        in_specs += [full2d(p["b_f"]), full2d(p["b_b"]), full2d(whh_cat)]

        scratch = [pltpu.VMEM((B, 2 * H), jnp.float32),
                   pltpu.VMEM((B, H), jnp.float32),
                   pltpu.VMEM((B, H), jnp.float32)]

        if last:
            fc_w_f, fc_w_b = fc_w[:H], fc_w[H:]
            inputs += [fc_w_f, fc_w_b, fc_b]
            in_specs += [full2d(fc_w_f), full2d(fc_w_b), full2d(fc_b)]
            out_shape = jax.ShapeDtypeStruct((B, C), jnp.float32)
            out_specs = pl.BlockSpec((B, C), lambda i: (0, 0))
            scratch += [pltpu.VMEM((B, C), jnp.float32)]
        else:
            seq_sds = jax.ShapeDtypeStruct((T * B, H), jnp.float32)
            out_shape = (seq_sds, seq_sds)
            out_specs = [pl.BlockSpec((row_blk, H), fwd_map),
                         pl.BlockSpec((row_blk, H), bwd_map)]

        kernel = _make_layer_kernel(t_blk, B, H, first, last)
        res = pl.pallas_call(
            kernel,
            out_shape=out_shape,
            grid_spec=pltpu.PrefetchScalarGridSpec(
                num_scalar_prefetch=0,
                grid=(nb,),
                in_specs=in_specs,
                out_specs=out_specs,
                scratch_shapes=scratch),
            compiler_params=pltpu.CompilerParams(
                dimension_semantics=("arbitrary",),
                vmem_limit_bytes=vmem_limit),
        )(*inputs)

        if last:
            logits = res
        else:
            out_f, out_b = res
    return logits


# ----------------------------------------------------------------------------
# Pure-JAX reference (correctness check only)
# ----------------------------------------------------------------------------
def _lstm_dir_ref(x_tbd, wih, whh, b):
    T, B, D = x_tbd.shape
    H = whh.shape[0]

    def step(carry, x_t):
        h, c = carry
        gates = x_t @ wih + h @ whh + b[0]
        i = jax.nn.sigmoid(gates[:, 0 * H:1 * H])
        f = jax.nn.sigmoid(gates[:, 1 * H:2 * H])
        g = jnp.tanh(gates[:, 2 * H:3 * H])
        o = jax.nn.sigmoid(gates[:, 3 * H:4 * H])
        c = f * c + i * g
        h = o * jnp.tanh(c)
        return (h, c), h

    init = (jnp.zeros((B, H), jnp.float32), jnp.zeros((B, H), jnp.float32))
    _, hs = lax.scan(step, init, x_tbd)
    return hs


def birnn_ref(x_btd, lstm_params, fc_w, fc_b):
    x = jnp.transpose(x_btd, (1, 0, 2)).astype(jnp.float32)
    for p in lstm_params:
        out_f = _lstm_dir_ref(x, p["wih_f"], p["whh_f"], p["b_f"])
        out_b = _lstm_dir_ref(x[::-1], p["wih_b"], p["whh_b"], p["b_b"])[::-1]
        x = jnp.concatenate([out_f, out_b], axis=-1)
    return x[-1] @ fc_w + fc_b[0]


# ----------------------------------------------------------------------------
# Deterministic parameter init (PyTorch-style uniform(-1/sqrt(H), 1/sqrt(H)))
# ----------------------------------------------------------------------------
def init_params(key, input_size, hidden_size, num_layers, num_classes):
    k = 1.0 / np.sqrt(hidden_size)
    params = []
    for layer in range(num_layers):
        d_in = input_size if layer == 0 else 2 * hidden_size
        layer_p = {}
        for tag in ("f", "b"):
            key, k1, k2, k3, k4 = jax.random.split(key, 5)
            layer_p[f"wih_{tag}"] = jax.random.uniform(
                k1, (d_in, 4 * hidden_size), jnp.float32, -k, k)
            layer_p[f"whh_{tag}"] = jax.random.uniform(
                k2, (hidden_size, 4 * hidden_size), jnp.float32, -k, k)
            b_ih = jax.random.uniform(k3, (4 * hidden_size,), jnp.float32, -k, k)
            b_hh = jax.random.uniform(k4, (4 * hidden_size,), jnp.float32, -k, k)
            layer_p[f"b_{tag}"] = (b_ih + b_hh)[None, :]  # combined (1, 4H)
        params.append(layer_p)

    key, kw, kb = jax.random.split(key, 3)
    kf = 1.0 / np.sqrt(2 * hidden_size)
    fc_w = jax.random.uniform(kw, (2 * hidden_size, num_classes),
                              jnp.float32, -kf, kf)
    fc_b = jax.random.uniform(kb, (num_classes,), jnp.float32, -kf, kf)[None, :]
    return params, fc_w, fc_b


# ----------------------------------------------------------------------------
if __name__ == "__main__":
    B, T = 2, 8
    input_size, hidden_size, num_layers, num_classes = 16, 32, 2, 10

    key = jax.random.PRNGKey(0)
    key, kx = jax.random.split(key)
    x = jax.random.normal(kx, (B, T, input_size), jnp.float32)

    lstm_params, fc_w, fc_b = init_params(
        key, input_size, hidden_size, num_layers, num_classes)

    fwd = jax.jit(birnn_forward)
    out = jax.block_until_ready(fwd(x, lstm_params, fc_w, fc_b))

    ref = birnn_ref(x, lstm_params, fc_w, fc_b)
    # Tolerance accounts for MXU multi-pass f32 matmuls in the kernel vs. XLA's
    # default-precision dots in the reference; real semantic bugs are O(0.1+).
    np.testing.assert_allclose(np.asarray(out), np.asarray(ref),
                               rtol=1e-2, atol=1e-2)
    assert out.shape == (B, num_classes)
    print("KERNEL_OK")
</pallas_src>

<mosaic_0001>
module attributes {stable_mosaic.version = 11 : i64} {
  func.func @kernel(%arg0: i32, %arg1: memref<16x32xf32, #tpu.memory_space<vmem>>, %arg2: memref<16x32xf32, #tpu.memory_space<vmem>>, %arg3: memref<16x32xf32, #tpu.memory_space<vmem>>, %arg4: memref<16x32xf32, #tpu.memory_space<vmem>>, %arg5: memref<32x128xf32, #tpu.memory_space<vmem>>, %arg6: memref<32x128xf32, #tpu.memory_space<vmem>>, %arg7: memref<32x128xf32, #tpu.memory_space<vmem>>, %arg8: memref<32x128xf32, #tpu.memory_space<vmem>>, %arg9: memref<1x128xf32, #tpu.memory_space<vmem>>, %arg10: memref<1x128xf32, #tpu.memory_space<vmem>>, %arg11: memref<64x256xf32, #tpu.memory_space<vmem>>, %arg12: memref<32x10xf32, #tpu.memory_space<vmem>>, %arg13: memref<32x10xf32, #tpu.memory_space<vmem>>, %arg14: memref<1x10xf32, #tpu.memory_space<vmem>>, %arg15: memref<2x10xf32, #tpu.memory_space<vmem>>, %arg16: memref<2x64xf32, #tpu.memory_space<vmem>>, %arg17: memref<2x32xf32, #tpu.memory_space<vmem>>, %arg18: memref<2x32xf32, #tpu.memory_space<vmem>>, %arg19: memref<2x10xf32, #tpu.memory_space<vmem>>) attributes {dimension_semantics = [#tpu.dimension_semantics<arbitrary>], iteration_bounds = array<i64: 1>, scalar_prefetch = 0 : i64, scratch_operands = 4 : i64, tpu.core_type = #tpu.core_type<tc>, window_params = [{transform_indices = @transform_0, window_bounds = array<i64: 16, 32>}, {transform_indices = @transform_1, window_bounds = array<i64: 16, 32>}, {transform_indices = @transform_2, window_bounds = array<i64: 16, 32>}, {transform_indices = @transform_3, window_bounds = array<i64: 16, 32>}, {pipeline_mode = #tpu.pipeline_mode<synchronous>, transform_indices = @transform_4, window_bounds = array<i64: 32, 128>}, {pipeline_mode = #tpu.pipeline_mode<synchronous>, transform_indices = @transform_5, window_bounds = array<i64: 32, 128>}, {pipeline_mode = #tpu.pipeline_mode<synchronous>, transform_indices = @transform_6, window_bounds = array<i64: 32, 128>}, {pipeline_mode = #tpu.pipeline_mode<synchronous>, transform_indices = @transform_7, window_bounds = array<i64: 32, 128>}, {pipeline_mode = #tpu.pipeline_mode<synchronous>, transform_indices = @transform_8, window_bounds = array<i64: 1, 128>}, {pipeline_mode = #tpu.pipeline_mode<synchronous>, transform_indices = @transform_9, window_bounds = array<i64: 1, 128>}, {pipeline_mode = #tpu.pipeline_mode<synchronous>, transform_indices = @transform_10, window_bounds = array<i64: 64, 256>}, {pipeline_mode = #tpu.pipeline_mode<synchronous>, transform_indices = @transform_11, window_bounds = array<i64: 32, 10>}, {pipeline_mode = #tpu.pipeline_mode<synchronous>, transform_indices = @transform_12, window_bounds = array<i64: 32, 10>}, {pipeline_mode = #tpu.pipeline_mode<synchronous>, transform_indices = @transform_13, window_bounds = array<i64: 1, 10>}, {pipeline_mode = #tpu.pipeline_mode<synchronous>, transform_indices = @transform_14, window_bounds = array<i64: 2, 10>}]} {
    %c0_i32 = arith.constant 0 : i32
    %0 = arith.cmpi eq, %arg0, %c0_i32 : i32
    %1 = arith.extui %0 : i1 to i32
    %c0_i32_0 = arith.constant 0 : i32
    %2 = arith.cmpi ne, %1, %c0_i32_0 : i32
    scf.if %2 {
      %cst_97 = arith.constant 0.000000e+00 : f32
      %500 = vector.broadcast %cst_97 : f32 to vector<2x64xf32>
      %c0_98 = arith.constant 0 : index
      %c0_99 = arith.constant 0 : index
      %501 = vector.load %arg16[%c0_98, %c0_99] : memref<2x64xf32, #tpu.memory_space<vmem>>, vector<2x64xf32>
      tpu.vector_store %arg16[%c0_98, %c0_99], %500 {strides = array<i32>} : memref<2x64xf32, #tpu.memory_space<vmem>>, vector<2x64xf32>,
      %cst_100 = arith.constant 0.000000e+00 : f32
      %502 = vector.broadcast %cst_100 : f32 to vector<2x32xf32>
      %c0_101 = arith.constant 0 : index
      %c0_102 = arith.constant 0 : index
      %503 = vector.load %arg17[%c0_101, %c0_102] : memref<2x32xf32, #tpu.memory_space<vmem>>, vector<2x32xf32>
      tpu.vector_store %arg17[%c0_101, %c0_102], %502 {strides = array<i32>} : memref<2x32xf32, #tpu.memory_space<vmem>>, vector<2x32xf32>,
      %cst_103 = arith.constant 0.000000e+00 : f32
      %504 = vector.broadcast %cst_103 : f32 to vector<2x32xf32>
      %c0_104 = arith.constant 0 : index
      %c0_105 = arith.constant 0 : index
      %505 = vector.load %arg18[%c0_104, %c0_105] : memref<2x32xf32, #tpu.memory_space<vmem>>, vector<2x32xf32>
      tpu.vector_store %arg18[%c0_104, %c0_105], %504 {strides = array<i32>} : memref<2x32xf32, #tpu.memory_space<vmem>>, vector<2x32xf32>,
    } else {
    }
    %c0 = arith.constant 0 : index
    %c0_1 = arith.constant 0 : index
    %3 = vector.load %arg1[%c0, %c0_1] : memref<16x32xf32, #tpu.memory_space<vmem>>, vector<16x32xf32>
    %c0_2 = arith.constant 0 : index
    %c0_3 = arith.constant 0 : index
    %4 = vector.load %arg5[%c0_2, %c0_3] : memref<32x128xf32, #tpu.memory_space<vmem>>, vector<32x128xf32>
    %cst = arith.constant dense<0.000000e+00> : vector<16x128xf32>
    %5 = tpu.matmul %3, %4, %cst {dimension_numbers = #tpu.dot_dimension_numbers<[1], [0], [0], [1], [0, 0, 1, 1], [], []>} : vector<16x32xf32>, vector<32x128xf32>, vector<16x128xf32> -> vector<16x128xf32>
    %c0_4 = arith.constant 0 : index
    %c0_5 = arith.constant 0 : index
    %6 = vector.load %arg2[%c0_4, %c0_5] : memref<16x32xf32, #tpu.memory_space<vmem>>, vector<16x32xf32>
    %c0_6 = arith.constant 0 : index
    %c0_7 = arith.constant 0 : index
    %7 = vector.load %arg6[%c0_6, %c0_7] : memref<32x128xf32, #tpu.memory_space<vmem>>, vector<32x128xf32>
    %cst_8 = arith.constant dense<0.000000e+00> : vector<16x128xf32>
    %8 = tpu.matmul %6, %7, %cst_8 {dimension_numbers = #tpu.dot_dimension_numbers<[1], [0], [0], [1], [0, 0, 1, 1], [], []>} : vector<16x32xf32>, vector<32x128xf32>, vector<16x128xf32> -> vector<16x128xf32>
    %9 = arith.addf %5, %8 : vector<16x128xf32>
    %c0_9 = arith.constant 0 : index
    %c0_10 = arith.constant 0 : index
    %10 = vector.load %arg9[%c0_9, %c0_10] : memref<1x128xf32, #tpu.memory_space<vmem>>, vector<1x128xf32>
    %11 = vector.broadcast %10 : vector<1x128xf32> to vector<16x128xf32>
    %12 = arith.addf %9, %11 : vector<16x128xf32>
    %c0_11 = arith.constant 0 : index
    %c0_12 = arith.constant 0 : index
    %13 = vector.load %arg3[%c0_11, %c0_12] : memref<16x32xf32, #tpu.memory_space<vmem>>, vector<16x32xf32>
    %c0_13 = arith.constant 0 : index
    %c0_14 = arith.constant 0 : index
    %14 = vector.load %arg7[%c0_13, %c0_14] : memref<32x128xf32, #tpu.memory_space<vmem>>, vector<32x128xf32>
    %cst_15 = arith.constant dense<0.000000e+00> : vector<16x128xf32>
    %15 = tpu.matmul %13, %14, %cst_15 {dimension_numbers = #tpu.dot_dimension_numbers<[1], [0], [0], [1], [0, 0, 1, 1], [], []>} : vector<16x32xf32>, vector<32x128xf32>, vector<16x128xf32> -> vector<16x128xf32>
    %c0_16 = arith.constant 0 : index
    %c0_17 = arith.constant 0 : index
    %16 = vector.load %arg4[%c0_16, %c0_17] : memref<16x32xf32, #tpu.memory_space<vmem>>, vector<16x32xf32>
    %c0_18 = arith.constant 0 : index
    %c0_19 = arith.constant 0 : index
    %17 = vector.load %arg8[%c0_18, %c0_19] : memref<32x128xf32, #tpu.memory_space<vmem>>, vector<32x128xf32>
    %cst_20 = arith.constant dense<0.000000e+00> : vector<16x128xf32>
    %18 = tpu.matmul %16, %17, %cst_20 {dimension_numbers = #tpu.dot_dimension_numbers<[1], [0], [0], [1], [0, 0, 1, 1], [], []>} : vector<16x32xf32>, vector<32x128xf32>, vector<16x128xf32> -> vector<16x128xf32>
    %19 = arith.addf %15, %18 : vector<16x128xf32>
    %c0_21 = arith.constant 0 : index
    %c0_22 = arith.constant 0 : index
    %20 = vector.load %arg10[%c0_21, %c0_22] : memref<1x128xf32, #tpu.memory_space<vmem>>, vector<1x128xf32>
    %21 = vector.broadcast %20 : vector<1x128xf32> to vector<16x128xf32>
    %22 = arith.addf %19, %21 : vector<16x128xf32>
    %c0_23 = arith.constant 0 : index
    %c0_24 = arith.constant 0 : index
    %23 = vector.load %arg11[%c0_23, %c0_24] : memref<64x256xf32, #tpu.memory_space<vmem>>, vector<64x256xf32>
    %c0_25 = arith.constant 0 : index
    %c0_26 = arith.constant 0 : index
    %24 = vector.load %arg16[%c0_25, %c0_26] : memref<2x64xf32, #tpu.memory_space<vmem>>, vector<2x64xf32>
    %c0_27 = arith.constant 0 : index
    %c0_28 = arith.constant 0 : index
    %25 = vector.load %arg17[%c0_27, %c0_28] : memref<2x32xf32, #tpu.memory_space<vmem>>, vector<2x32xf32>
    %c0_29 = arith.constant 0 : index
    %c0_30 = arith.constant 0 : index
    %26 = vector.load %arg18[%c0_29, %c0_30] : memref<2x32xf32, #tpu.memory_space<vmem>>, vector<2x32xf32>
    %cst_31 = arith.constant dense<0.000000e+00> : vector<2x256xf32>
    %27 = tpu.matmul %24, %23, %cst_31 {dimension_numbers = #tpu.dot_dimension_numbers<[1], [0], [0], [1], [0, 0, 1, 1], [], []>} : vector<2x64xf32>, vector<64x256xf32>, vector<2x256xf32> -> vector<2x256xf32>
    %28 = vector.extract_strided_slice %12 {offsets = [0, 0], sizes = [2, 128], strides = [1, 1]} : vector<16x128xf32> to vector<2x128xf32>
    %29 = vector.extract_strided_slice %27 {offsets = [0, 0], sizes = [2, 128], strides = [1, 1]} : vector<2x256xf32> to vector<2x128xf32>
    %30 = arith.addf %28, %29 : vector<2x128xf32>
    %31 = vector.extract_strided_slice %22 {offsets = [14, 0], sizes = [2, 128], strides = [1, 1]} : vector<16x128xf32> to vector<2x128xf32>
    %32 = vector.extract_strided_slice %27 {offsets = [0, 128], sizes = [2, 128], strides = [1, 1]} : vector<2x256xf32> to vector<2x128xf32>
    %33 = arith.addf %31, %32 : vector<2x128xf32>
    %34 = vector.extract_strided_slice %30 {offsets = [0, 0], sizes = [2, 32], strides = [1, 1]} : vector<2x128xf32> to vector<2x32xf32>
    %35 = arith.negf %34 : vector<2x32xf32>
    %36 = math.exp %35 : vector<2x32xf32>
    %cst_32 = arith.constant 1.000000e+00 : f32
    %37 = vector.broadcast %cst_32 : f32 to vector<2x32xf32>
    %38 = arith.addf %37, %36 : vector<2x32xf32>
    %39 = arith.divf %37, %38 : vector<2x32xf32>
    %40 = vector.extract_strided_slice %30 {offsets = [0, 32], sizes = [2, 32], strides = [1, 1]} : vector<2x128xf32> to vector<2x32xf32>
    %41 = arith.negf %40 : vector<2x32xf32>
    %42 = math.exp %41 : vector<2x32xf32>
    %cst_33 = arith.constant 1.000000e+00 : f32
    %43 = vector.broadcast %cst_33 : f32 to vector<2x32xf32>
    %44 = arith.addf %43, %42 : vector<2x32xf32>
    %45 = arith.divf %43, %44 : vector<2x32xf32>
    %46 = vector.extract_strided_slice %30 {offsets = [0, 64], sizes = [2, 32], strides = [1, 1]} : vector<2x128xf32> to vector<2x32xf32>
    %47 = math.tanh %46 : vector<2x32xf32>
    %48 = vector.extract_strided_slice %30 {offsets = [0, 96], sizes = [2, 32], strides = [1, 1]} : vector<2x128xf32> to vector<2x32xf32>
    %49 = arith.negf %48 : vector<2x32xf32>
    %50 = math.exp %49 : vector<2x32xf32>
    %cst_34 = arith.constant 1.000000e+00 : f32
    %51 = vector.broadcast %cst_34 : f32 to vector<2x32xf32>
    %52 = arith.addf %51, %50 : vector<2x32xf32>
    %53 = arith.divf %51, %52 : vector<2x32xf32>
    %54 = arith.mulf %45, %25 : vector<2x32xf32>
    %55 = arith.mulf %39, %47 : vector<2x32xf32>
    %56 = arith.addf %54, %55 : vector<2x32xf32>
    %57 = math.tanh %56 : vector<2x32xf32>
    %58 = arith.mulf %53, %57 : vector<2x32xf32>
    %59 = vector.extract_strided_slice %33 {offsets = [0, 0], sizes = [2, 32], strides = [1, 1]} : vector<2x128xf32> to vector<2x32xf32>
    %60 = arith.negf %59 : vector<2x32xf32>
    %61 = math.exp %60 : vector<2x32xf32>
    %cst_35 = arith.constant 1.000000e+00 : f32
    %62 = vector.broadcast %cst_35 : f32 to vector<2x32xf32>
    %63 = arith.addf %62, %61 : vector<2x32xf32>
    %64 = arith.divf %62, %63 : vector<2x32xf32>
    %65 = vector.extract_strided_slice %33 {offsets = [0, 32], sizes = [2, 32], strides = [1, 1]} : vector<2x128xf32> to vector<2x32xf32>
    %66 = arith.negf %65 : vector<2x32xf32>
    %67 = math.exp %66 : vector<2x32xf32>
    %cst_36 = arith.constant 1.000000e+00 : f32
    %68 = vector.broadcast %cst_36 : f32 to vector<2x32xf32>
    %69 = arith.addf %68, %67 : vector<2x32xf32>
    %70 = arith.divf %68, %69 : vector<2x32xf32>
    %71 = vector.extract_strided_slice %33 {offsets = [0, 64], sizes = [2, 32], strides = [1, 1]} : vector<2x128xf32> to vector<2x32xf32>
    %72 = math.tanh %71 : vector<2x32xf32>
    %73 = vector.extract_strided_slice %33 {offsets = [0, 96], sizes = [2, 32], strides = [1, 1]} : vector<2x128xf32> to vector<2x32xf32>
    %74 = arith.negf %73 : vector<2x32xf32>
    %75 = math.exp %74 : vector<2x32xf32>
    %cst_37 = arith.constant 1.000000e+00 : f32
    %76 = vector.broadcast %cst_37 : f32 to vector<2x32xf32>
    %77 = arith.addf %76, %75 : vector<2x32xf32>
    %78 = arith.divf %76, %77 : vector<2x32xf32>
    %79 = arith.mulf %70, %26 : vector<2x32xf32>
    %80 = arith.mulf %64, %72 : vector<2x32xf32>
    %81 = arith.addf %79, %80 : vector<2x32xf32>
    %82 = math.tanh %81 : vector<2x32xf32>
    %83 = arith.mulf %78, %82 : vector<2x32xf32>
    %c0_i32_38 = arith.constant 0 : i32
    %84 = arith.cmpi eq, %arg0, %c0_i32_38 : i32
    %85 = arith.extui %84 : i1 to i32
    %c0_i32_39 = arith.constant 0 : i32
    %86 = arith.cmpi ne, %85, %c0_i32_39 : i32
    scf.if %86 {
      %c0_97 = arith.constant 0 : index
      %c0_98 = arith.constant 0 : index
      %500 = vector.load %arg13[%c0_97, %c0_98] : memref<32x10xf32, #tpu.memory_space<vmem>>, vector<32x10xf32>
      %cst_99 = arith.constant dense<0.000000e+00> : vector<2x10xf32>
      %501 = tpu.matmul %83, %500, %cst_99 {dimension_numbers = #tpu.dot_dimension_numbers<[1], [0], [0], [1], [0, 0, 1, 1], [], []>} : vector<2x32xf32>, vector<32x10xf32>, vector<2x10xf32> -> vector<2x10xf32>
      %c0_100 = arith.constant 0 : index
      %c0_101 = arith.constant 0 : index
      %502 = vector.load %arg19[%c0_100, %c0_101] : memref<2x10xf32, #tpu.memory_space<vmem>>, vector<2x10xf32>
      tpu.vector_store %arg19[%c0_100, %c0_101], %501 {strides = array<i32>} : memref<2x10xf32, #tpu.memory_space<vmem>>, vector<2x10xf32>,
    } else {
    }
    %87 = tpu.concatenate %58, %83 in 1 : vector<2x32xf32>, vector<2x32xf32> -> vector<2x64xf32>
    %cst_40 = arith.constant dense<0.000000e+00> : vector<2x256xf32>
    %88 = tpu.matmul %87, %23, %cst_40 {dimension_numbers = #tpu.dot_dimension_numbers<[1], [0], [0], [1], [0, 0, 1, 1], [], []>} : vector<2x64xf32>, vector<64x256xf32>, vector<2x256xf32> -> vector<2x256xf32>
    %89 = vector.extract_strided_slice %12 {offsets = [2, 0], sizes = [2, 128], strides = [1, 1]} : vector<16x128xf32> to vector<2x128xf32>
    %90 = vector.extract_strided_slice %88 {offsets = [0, 0], sizes = [2, 128], strides = [1, 1]} : vector<2x256xf32> to vector<2x128xf32>
    %91 = arith.addf %89, %90 : vector<2x128xf32>
    %92 = vector.extract_strided_slice %22 {offsets = [12, 0], sizes = [2, 128], strides = [1, 1]} : vector<16x128xf32> to vector<2x128xf32>
    %93 = vector.extract_strided_slice %88 {offsets = [0, 128], sizes = [2, 128], strides = [1, 1]} : vector<2x256xf32> to vector<2x128xf32>
    %94 = arith.addf %92, %93 : vector<2x128xf32>
    %95 = vector.extract_strided_slice %91 {offsets = [0, 0], sizes = [2, 32], strides = [1, 1]} : vector<2x128xf32> to vector<2x32xf32>
    %96 = arith.negf %95 : vector<2x32xf32>
    %97 = math.exp %96 : vector<2x32xf32>
    %cst_41 = arith.constant 1.000000e+00 : f32
    %98 = vector.broadcast %cst_41 : f32 to vector<2x32xf32>
    %99 = arith.addf %98, %97 : vector<2x32xf32>
    %100 = arith.divf %98, %99 : vector<2x32xf32>
    %101 = vector.extract_strided_slice %91 {offsets = [0, 32], sizes = [2, 32], strides = [1, 1]} : vector<2x128xf32> to vector<2x32xf32>
    %102 = arith.negf %101 : vector<2x32xf32>
    %103 = math.exp %102 : vector<2x32xf32>
    %cst_42 = arith.constant 1.000000e+00 : f32
    %104 = vector.broadcast %cst_42 : f32 to vector<2x32xf32>
    %105 = arith.addf %104, %103 : vector<2x32xf32>
    %106 = arith.divf %104, %105 : vector<2x32xf32>
    %107 = vector.extract_strided_slice %91 {offsets = [0, 64], sizes = [2, 32], strides = [1, 1]} : vector<2x128xf32> to vector<2x32xf32>
    %108 = math.tanh %107 : vector<2x32xf32>
    %109 = vector.extract_strided_slice %91 {offsets = [0, 96], sizes = [2, 32], strides = [1, 1]} : vector<2x128xf32> to vector<2x32xf32>
    %110 = arith.negf %109 : vector<2x32xf32>
    %111 = math.exp %110 : vector<2x32xf32>
    %cst_43 = arith.constant 1.000000e+00 : f32
    %112 = vector.broadcast %cst_43 : f32 to vector<2x32xf32>
    %113 = arith.addf %112, %111 : vector<2x32xf32>
    %114 = arith.divf %112, %113 : vector<2x32xf32>
    %115 = arith.mulf %106, %56 : vector<2x32xf32>
    %116 = arith.mulf %100, %108 : vector<2x32xf32>
    %117 = arith.addf %115, %116 : vector<2x32xf32>
    %118 = math.tanh %117 : vector<2x32xf32>
    %119 = arith.mulf %114, %118 : vector<2x32xf32>
    %120 = vector.extract_strided_slice %94 {offsets = [0, 0], sizes = [2, 32], strides = [1, 1]} : vector<2x128xf32> to vector<2x32xf32>
    %121 = arith.negf %120 : vector<2x32xf32>
    %122 = math.exp %121 : vector<2x32xf32>
    %cst_44 = arith.constant 1.000000e+00 : f32
    %123 = vector.broadcast %cst_44 : f32 to vector<2x32xf32>
    %124 = arith.addf %123, %122 : vector<2x32xf32>
    %125 = arith.divf %123, %124 : vector<2x32xf32>
    %126 = vector.extract_strided_slice %94 {offsets = [0, 32], sizes = [2, 32], strides = [1, 1]} : vector<2x128xf32> to vector<2x32xf32>
    %127 = arith.negf %126 : vector<2x32xf32>
    %128 = math.exp %127 : vector<2x32xf32>
    %cst_45 = arith.constant 1.000000e+00 : f32
    %129 = vector.broadcast %cst_45 : f32 to vector<2x32xf32>
    %130 = arith.addf %129, %128 : vector<2x32xf32>
    %131 = arith.divf %129, %130 : vector<2x32xf32>
    %132 = vector.extract_strided_slice %94 {offsets = [0, 64], sizes = [2, 32], strides = [1, 1]} : vector<2x128xf32> to vector<2x32xf32>
    %133 = math.tanh %132 : vector<2x32xf32>
    %134 = vector.extract_strided_slice %94 {offsets = [0, 96], sizes = [2, 32], strides = [1, 1]} : vector<2x128xf32> to vector<2x32xf32>
    %135 = arith.negf %134 : vector<2x32xf32>
    %136 = math.exp %135 : vector<2x32xf32>
    %cst_46 = arith.constant 1.000000e+00 : f32
    %137 = vector.broadcast %cst_46 : f32 to vector<2x32xf32>
    %138 = arith.addf %137, %136 : vector<2x32xf32>
    %139 = arith.divf %137, %138 : vector<2x32xf32>
    %140 = arith.mulf %131, %81 : vector<2x32xf32>
    %141 = arith.mulf %125, %133 : vector<2x32xf32>
    %142 = arith.addf %140, %141 : vector<2x32xf32>
    %143 = math.tanh %142 : vector<2x32xf32>
    %144 = arith.mulf %139, %143 : vector<2x32xf32>
    %145 = tpu.concatenate %119, %144 in 1 : vector<2x32xf32>, vector<2x32xf32> -> vector<2x64xf32>
    %cst_47 = arith.constant dense<0.000000e+00> : vector<2x256xf32>
    %146 = tpu.matmul %145, %23, %cst_47 {dimension_numbers = #tpu.dot_dimension_numbers<[1], [0], [0], [1], [0, 0, 1, 1], [], []>} : vector<2x64xf32>, vector<64x256xf32>, vector<2x256xf32> -> vector<2x256xf32>
    %147 = vector.extract_strided_slice %12 {offsets = [4, 0], sizes = [2, 128], strides = [1, 1]} : vector<16x128xf32> to vector<2x128xf32>
    %148 = vector.extract_strided_slice %146 {offsets = [0, 0], sizes = [2, 128], strides = [1, 1]} : vector<2x256xf32> to vector<2x128xf32>
    %149 = arith.addf %147, %148 : vector<2x128xf32>
    %150 = vector.extract_strided_slice %22 {offsets = [10, 0], sizes = [2, 128], strides = [1, 1]} : vector<16x128xf32> to vector<2x128xf32>
    %151 = vector.extract_strided_slice %146 {offsets = [0, 128], sizes = [2, 128], strides = [1, 1]} : vector<2x256xf32> to vector<2x128xf32>
    %152 = arith.addf %150, %151 : vector<2x128xf32>
    %153 = vector.extract_strided_slice %149 {offsets = [0, 0], sizes = [2, 32], strides = [1, 1]} : vector<2x128xf32> to vector<2x32xf32>
    %154 = arith.negf %153 : vector<2x32xf32>
    %155 = math.exp %154 : vector<2x32xf32>
    %cst_48 = arith.constant 1.000000e+00 : f32
    %156 = vector.broadcast %cst_48 : f32 to vector<2x32xf32>
    %157 = arith.addf %156, %155 : vector<2x32xf32>
    %158 = arith.divf %156, %157 : vector<2x32xf32>
    %159 = vector.extract_strided_slice %149 {offsets = [0, 32], sizes = [2, 32], strides = [1, 1]} : vector<2x128xf32> to vector<2x32xf32>
    %160 = arith.negf %159 : vector<2x32xf32>
    %161 = math.exp %160 : vector<2x32xf32>
    %cst_49 = arith.constant 1.000000e+00 : f32
    %162 = vector.broadcast %cst_49 : f32 to vector<2x32xf32>
    %163 = arith.addf %162, %161 : vector<2x32xf32>
    %164 = arith.divf %162, %163 : vector<2x32xf32>
    %165 = vector.extract_strided_slice %149 {offsets = [0, 64], sizes = [2, 32], strides = [1, 1]} : vector<2x128xf32> to vector<2x32xf32>
    %166 = math.tanh %165 : vector<2x32xf32>
    %167 = vector.extract_strided_slice %149 {offsets = [0, 96], sizes = [2, 32], strides = [1, 1]} : vector<2x128xf32> to vector<2x32xf32>
    %168 = arith.negf %167 : vector<2x32xf32>
    %169 = math.exp %168 : vector<2x32xf32>
    %cst_50 = arith.constant 1.000000e+00 : f32
    %170 = vector.broadcast %cst_50 : f32 to vector<2x32xf32>
    %171 = arith.addf %170, %169 : vector<2x32xf32>
    %172 = arith.divf %170, %171 : vector<2x32xf32>
    %173 = arith.mulf %164, %117 : vector<2x32xf32>
    %174 = arith.mulf %158, %166 : vector<2x32xf32>
    %175 = arith.addf %173, %174 : vector<2x32xf32>
    %176 = math.tanh %175 : vector<2x32xf32>
    %177 = arith.mulf %172, %176 : vector<2x32xf32>
    %178 = vector.extract_strided_slice %152 {offsets = [0, 0], sizes = [2, 32], strides = [1, 1]} : vector<2x128xf32> to vector<2x32xf32>
    %179 = arith.negf %178 : vector<2x32xf32>
    %180 = math.exp %179 : vector<2x32xf32>
    %cst_51 = arith.constant 1.000000e+00 : f32
    %181 = vector.broadcast %cst_51 : f32 to vector<2x32xf32>
    %182 = arith.addf %181, %180 : vector<2x32xf32>
    %183 = arith.divf %181, %182 : vector<2x32xf32>
    %184 = vector.extract_strided_slice %152 {offsets = [0, 32], sizes = [2, 32], strides = [1, 1]} : vector<2x128xf32> to vector<2x32xf32>
    %185 = arith.negf %184 : vector<2x32xf32>
    %186 = math.exp %185 : vector<2x32xf32>
    %cst_52 = arith.constant 1.000000e+00 : f32
    %187 = vector.broadcast %cst_52 : f32 to vector<2x32xf32>
    %188 = arith.addf %187, %186 : vector<2x32xf32>
    %189 = arith.divf %187, %188 : vector<2x32xf32>
    %190 = vector.extract_strided_slice %152 {offsets = [0, 64], sizes = [2, 32], strides = [1, 1]} : vector<2x128xf32> to vector<2x32xf32>
    %191 = math.tanh %190 : vector<2x32xf32>
    %192 = vector.extract_strided_slice %152 {offsets = [0, 96], sizes = [2, 32], strides = [1, 1]} : vector<2x128xf32> to vector<2x32xf32>
    %193 = arith.negf %192 : vector<2x32xf32>
    %194 = math.exp %193 : vector<2x32xf32>
    %cst_53 = arith.constant 1.000000e+00 : f32
    %195 = vector.broadcast %cst_53 : f32 to vector<2x32xf32>
    %196 = arith.addf %195, %194 : vector<2x32xf32>
    %197 = arith.divf %195, %196 : vector<2x32xf32>
    %198 = arith.mulf %189, %142 : vector<2x32xf32>
    %199 = arith.mulf %183, %191 : vector<2x32xf32>
    %200 = arith.addf %198, %199 : vector<2x32xf32>
    %201 = math.tanh %200 : vector<2x32xf32>
    %202 = arith.mulf %197, %201 : vector<2x32xf32>
    %203 = tpu.concatenate %177, %202 in 1 : vector<2x32xf32>, vector<2x32xf32> -> vector<2x64xf32>
    %cst_54 = arith.constant dense<0.000000e+00> : vector<2x256xf32>
    %204 = tpu.matmul %203, %23, %cst_54 {dimension_numbers = #tpu.dot_dimension_numbers<[1], [0], [0], [1], [0, 0, 1, 1], [], []>} : vector<2x64xf32>, vector<64x256xf32>, vector<2x256xf32> -> vector<2x256xf32>
    %205 = vector.extract_strided_slice %12 {offsets = [6, 0], sizes = [2, 128], strides = [1, 1]} : vector<16x128xf32> to vector<2x128xf32>
    %206 = vector.extract_strided_slice %204 {offsets = [0, 0], sizes = [2, 128], strides = [1, 1]} : vector<2x256xf32> to vector<2x128xf32>
    %207 = arith.addf %205, %206 : vector<2x128xf32>
    %208 = vector.extract_strided_slice %22 {offsets = [8, 0], sizes = [2, 128], strides = [1, 1]} : vector<16x128xf32> to vector<2x128xf32>
    %209 = vector.extract_strided_slice %204 {offsets = [0, 128], sizes = [2, 128], strides = [1, 1]} : vector<2x256xf32> to vector<2x128xf32>
    %210 = arith.addf %208, %209 : vector<2x128xf32>
    %211 = vector.extract_strided_slice %207 {offsets = [0, 0], sizes = [2, 32], strides = [1, 1]} : vector<2x128xf32> to vector<2x32xf32>
    %212 = arith.negf %211 : vector<2x32xf32>
    %213 = math.exp %212 : vector<2x32xf32>
    %cst_55 = arith.constant 1.000000e+00 : f32
    %214 = vector.broadcast %cst_55 : f32 to vector<2x32xf32>
    %215 = arith.addf %214, %213 : vector<2x32xf32>
    %216 = arith.divf %214, %215 : vector<2x32xf32>
    %217 = vector.extract_strided_slice %207 {offsets = [0, 32], sizes = [2, 32], strides = [1, 1]} : vector<2x128xf32> to vector<2x32xf32>
    %218 = arith.negf %217 : vector<2x32xf32>
    %219 = math.exp %218 : vector<2x32xf32>
    %cst_56 = arith.constant 1.000000e+00 : f32
    %220 = vector.broadcast %cst_56 : f32 to vector<2x32xf32>
    %221 = arith.addf %220, %219 : vector<2x32xf32>
    %222 = arith.divf %220, %221 : vector<2x32xf32>
    %223 = vector.extract_strided_slice %207 {offsets = [0, 64], sizes = [2, 32], strides = [1, 1]} : vector<2x128xf32> to vector<2x32xf32>
    %224 = math.tanh %223 : vector<2x32xf32>
    %225 = vector.extract_strided_slice %207 {offsets = [0, 96], sizes = [2, 32], strides = [1, 1]} : vector<2x128xf32> to vector<2x32xf32>
    %226 = arith.negf %225 : vector<2x32xf32>
    %227 = math.exp %226 : vector<2x32xf32>
    %cst_57 = arith.constant 1.000000e+00 : f32
    %228 = vector.broadcast %cst_57 : f32 to vector<2x32xf32>
    %229 = arith.addf %228, %227 : vector<2x32xf32>
    %230 = arith.divf %228, %229 : vector<2x32xf32>
    %231 = arith.mulf %222, %175 : vector<2x32xf32>
    %232 = arith.mulf %216, %224 : vector<2x32xf32>
    %233 = arith.addf %231, %232 : vector<2x32xf32>
    %234 = math.tanh %233 : vector<2x32xf32>
    %235 = arith.mulf %230, %234 : vector<2x32xf32>
    %236 = vector.extract_strided_slice %210 {offsets = [0, 0], sizes = [2, 32], strides = [1, 1]} : vector<2x128xf32> to vector<2x32xf32>
    %237 = arith.negf %236 : vector<2x32xf32>
    %238 = math.exp %237 : vector<2x32xf32>
    %cst_58 = arith.constant 1.000000e+00 : f32
    %239 = vector.broadcast %cst_58 : f32 to vector<2x32xf32>
    %240 = arith.addf %239, %238 : vector<2x32xf32>
    %241 = arith.divf %239, %240 : vector<2x32xf32>
    %242 = vector.extract_strided_slice %210 {offsets = [0, 32], sizes = [2, 32], strides = [1, 1]} : vector<2x128xf32> to vector<2x32xf32>
    %243 = arith.negf %242 : vector<2x32xf32>
    %244 = math.exp %243 : vector<2x32xf32>
    %cst_59 = arith.constant 1.000000e+00 : f32
    %245 = vector.broadcast %cst_59 : f32 to vector<2x32xf32>
    %246 = arith.addf %245, %244 : vector<2x32xf32>
    %247 = arith.divf %245, %246 : vector<2x32xf32>
    %248 = vector.extract_strided_slice %210 {offsets = [0, 64], sizes = [2, 32], strides = [1, 1]} : vector<2x128xf32> to vector<2x32xf32>
    %249 = math.tanh %248 : vector<2x32xf32>
    %250 = vector.extract_strided_slice %210 {offsets = [0, 96], sizes = [2, 32], strides = [1, 1]} : vector<2x128xf32> to vector<2x32xf32>
    %251 = arith.negf %250 : vector<2x32xf32>
    %252 = math.exp %251 : vector<2x32xf32>
    %cst_60 = arith.constant 1.000000e+00 : f32
    %253 = vector.broadcast %cst_60 : f32 to vector<2x32xf32>
    %254 = arith.addf %253, %252 : vector<2x32xf32>
    %255 = arith.divf %253, %254 : vector<2x32xf32>
    %256 = arith.mulf %247, %200 : vector<2x32xf32>
    %257 = arith.mulf %241, %249 : vector<2x32xf32>
    %258 = arith.addf %256, %257 : vector<2x32xf32>
    %259 = math.tanh %258 : vector<2x32xf32>
    %260 = arith.mulf %255, %259 : vector<2x32xf32>
    %261 = tpu.concatenate %235, %260 in 1 : vector<2x32xf32>, vector<2x32xf32> -> vector<2x64xf32>
    %cst_61 = arith.constant dense<0.000000e+00> : vector<2x256xf32>
    %262 = tpu.matmul %261, %23, %cst_61 {dimension_numbers = #tpu.dot_dimension_numbers<[1], [0], [0], [1], [0, 0, 1, 1], [], []>} : vector<2x64xf32>, vector<64x256xf32>, vector<2x256xf32> -> vector<2x256xf32>
    %263 = vector.extract_strided_slice %12 {offsets = [8, 0], sizes = [2, 128], strides = [1, 1]} : vector<16x128xf32> to vector<2x128xf32>
    %264 = vector.extract_strided_slice %262 {offsets = [0, 0], sizes = [2, 128], strides = [1, 1]} : vector<2x256xf32> to vector<2x128xf32>
    %265 = arith.addf %263, %264 : vector<2x128xf32>
    %266 = vector.extract_strided_slice %22 {offsets = [6, 0], sizes = [2, 128], strides = [1, 1]} : vector<16x128xf32> to vector<2x128xf32>
    %267 = vector.extract_strided_slice %262 {offsets = [0, 128], sizes = [2, 128], strides = [1, 1]} : vector<2x256xf32> to vector<2x128xf32>
    %268 = arith.addf %266, %267 : vector<2x128xf32>
    %269 = vector.extract_strided_slice %265 {offsets = [0, 0], sizes = [2, 32], strides = [1, 1]} : vector<2x128xf32> to vector<2x32xf32>
    %270 = arith.negf %269 : vector<2x32xf32>
    %271 = math.exp %270 : vector<2x32xf32>
    %cst_62 = arith.constant 1.000000e+00 : f32
    %272 = vector.broadcast %cst_62 : f32 to vector<2x32xf32>
    %273 = arith.addf %272, %271 : vector<2x32xf32>
    %274 = arith.divf %272, %273 : vector<2x32xf32>
    %275 = vector.extract_strided_slice %265 {offsets = [0, 32], sizes = [2, 32], strides = [1, 1]} : vector<2x128xf32> to vector<2x32xf32>
    %276 = arith.negf %275 : vector<2x32xf32>
    %277 = math.exp %276 : vector<2x32xf32>
    %cst_63 = arith.constant 1.000000e+00 : f32
    %278 = vector.broadcast %cst_63 : f32 to vector<2x32xf32>
    %279 = arith.addf %278, %277 : vector<2x32xf32>
    %280 = arith.divf %278, %279 : vector<2x32xf32>
    %281 = vector.extract_strided_slice %265 {offsets = [0, 64], sizes = [2, 32], strides = [1, 1]} : vector<2x128xf32> to vector<2x32xf32>
    %282 = math.tanh %281 : vector<2x32xf32>
    %283 = vector.extract_strided_slice %265 {offsets = [0, 96], sizes = [2, 32], strides = [1, 1]} : vector<2x128xf32> to vector<2x32xf32>
    %284 = arith.negf %283 : vector<2x32xf32>
    %285 = math.exp %284 : vector<2x32xf32>
    %cst_64 = arith.constant 1.000000e+00 : f32
    %286 = vector.broadcast %cst_64 : f32 to vector<2x32xf32>
    %287 = arith.addf %286, %285 : vector<2x32xf32>
    %288 = arith.divf %286, %287 : vector<2x32xf32>
    %289 = arith.mulf %280, %233 : vector<2x32xf32>
    %290 = arith.mulf %274, %282 : vector<2x32xf32>
    %291 = arith.addf %289, %290 : vector<2x32xf32>
    %292 = math.tanh %291 : vector<2x32xf32>
    %293 = arith.mulf %288, %292 : vector<2x32xf32>
    %294 = vector.extract_strided_slice %268 {offsets = [0, 0], sizes = [2, 32], strides = [1, 1]} : vector<2x128xf32> to vector<2x32xf32>
    %295 = arith.negf %294 : vector<2x32xf32>
    %296 = math.exp %295 : vector<2x32xf32>
    %cst_65 = arith.constant 1.000000e+00 : f32
    %297 = vector.broadcast %cst_65 : f32 to vector<2x32xf32>
    %298 = arith.addf %297, %296 : vector<2x32xf32>
    %299 = arith.divf %297, %298 : vector<2x32xf32>
    %300 = vector.extract_strided_slice %268 {offsets = [0, 32], sizes = [2, 32], strides = [1, 1]} : vector<2x128xf32> to vector<2x32xf32>
    %301 = arith.negf %300 : vector<2x32xf32>
    %302 = math.exp %301 : vector<2x32xf32>
    %cst_66 = arith.constant 1.000000e+00 : f32
    %303 = vector.broadcast %cst_66 : f32 to vector<2x32xf32>
    %304 = arith.addf %303, %302 : vector<2x32xf32>
    %305 = arith.divf %303, %304 : vector<2x32xf32>
    %306 = vector.extract_strided_slice %268 {offsets = [0, 64], sizes = [2, 32], strides = [1, 1]} : vector<2x128xf32> to vector<2x32xf32>
    %307 = math.tanh %306 : vector<2x32xf32>
    %308 = vector.extract_strided_slice %268 {offsets = [0, 96], sizes = [2, 32], strides = [1, 1]} : vector<2x128xf32> to vector<2x32xf32>
    %309 = arith.negf %308 : vector<2x32xf32>
    %310 = math.exp %309 : vector<2x32xf32>
    %cst_67 = arith.constant 1.000000e+00 : f32
    %311 = vector.broadcast %cst_67 : f32 to vector<2x32xf32>
    %312 = arith.addf %311, %310 : vector<2x32xf32>
    %313 = arith.divf %311, %312 : vector<2x32xf32>
    %314 = arith.mulf %305, %258 : vector<2x32xf32>
    %315 = arith.mulf %299, %307 : vector<2x32xf32>
    %316 = arith.addf %314, %315 : vector<2x32xf32>
    %317 = math.tanh %316 : vector<2x32xf32>
    %318 = arith.mulf %313, %317 : vector<2x32xf32>
    %319 = tpu.concatenate %293, %318 in 1 : vector<2x32xf32>, vector<2x32xf32> -> vector<2x64xf32>
    %cst_68 = arith.constant dense<0.000000e+00> : vector<2x256xf32>
    %320 = tpu.matmul %319, %23, %cst_68 {dimension_numbers = #tpu.dot_dimension_numbers<[1], [0], [0], [1], [0, 0, 1, 1], [], []>} : vector<2x64xf32>, vector<64x256xf32>, vector<2x256xf32> -> vector<2x256xf32>
    %321 = vector.extract_strided_slice %12 {offsets = [10, 0], sizes = [2, 128], strides = [1, 1]} : vector<16x128xf32> to vector<2x128xf32>
    %322 = vector.extract_strided_slice %320 {offsets = [0, 0], sizes = [2, 128], strides = [1, 1]} : vector<2x256xf32> to vector<2x128xf32>
    %323 = arith.addf %321, %322 : vector<2x128xf32>
    %324 = vector.extract_strided_slice %22 {offsets = [4, 0], sizes = [2, 128], strides = [1, 1]} : vector<16x128xf32> to vector<2x128xf32>
    %325 = vector.extract_strided_slice %320 {offsets = [0, 128], sizes = [2, 128], strides = [1, 1]} : vector<2x256xf32> to vector<2x128xf32>
    %326 = arith.addf %324, %325 : vector<2x128xf32>
    %327 = vector.extract_strided_slice %323 {offsets = [0, 0], sizes = [2, 32], strides = [1, 1]} : vector<2x128xf32> to vector<2x32xf32>
    %328 = arith.negf %327 : vector<2x32xf32>
    %329 = math.exp %328 : vector<2x32xf32>
    %cst_69 = arith.constant 1.000000e+00 : f32
    %330 = vector.broadcast %cst_69 : f32 to vector<2x32xf32>
    %331 = arith.addf %330, %329 : vector<2x32xf32>
    %332 = arith.divf %330, %331 : vector<2x32xf32>
    %333 = vector.extract_strided_slice %323 {offsets = [0, 32], sizes = [2, 32], strides = [1, 1]} : vector<2x128xf32> to vector<2x32xf32>
    %334 = arith.negf %333 : vector<2x32xf32>
    %335 = math.exp %334 : vector<2x32xf32>
    %cst_70 = arith.constant 1.000000e+00 : f32
    %336 = vector.broadcast %cst_70 : f32 to vector<2x32xf32>
    %337 = arith.addf %336, %335 : vector<2x32xf32>
    %338 = arith.divf %336, %337 : vector<2x32xf32>
    %339 = vector.extract_strided_slice %323 {offsets = [0, 64], sizes = [2, 32], strides = [1, 1]} : vector<2x128xf32> to vector<2x32xf32>
    %340 = math.tanh %339 : vector<2x32xf32>
    %341 = vector.extract_strided_slice %323 {offsets = [0, 96], sizes = [2, 32], strides = [1, 1]} : vector<2x128xf32> to vector<2x32xf32>
    %342 = arith.negf %341 : vector<2x32xf32>
    %343 = math.exp %342 : vector<2x32xf32>
    %cst_71 = arith.constant 1.000000e+00 : f32
    %344 = vector.broadcast %cst_71 : f32 to vector<2x32xf32>
    %345 = arith.addf %344, %343 : vector<2x32xf32>
    %346 = arith.divf %344, %345 : vector<2x32xf32>
    %347 = arith.mulf %338, %291 : vector<2x32xf32>
    %348 = arith.mulf %332, %340 : vector<2x32xf32>
    %349 = arith.addf %347, %348 : vector<2x32xf32>
    %350 = math.tanh %349 : vector<2x32xf32>
    %351 = arith.mulf %346, %350 : vector<2x32xf32>
    %352 = vector.extract_strided_slice %326 {offsets = [0, 0], sizes = [2, 32], strides = [1, 1]} : vector<2x128xf32> to vector<2x32xf32>
    %353 = arith.negf %352 : vector<2x32xf32>
    %354 = math.exp %353 : vector<2x32xf32>
    %cst_72 = arith.constant 1.000000e+00 : f32
    %355 = vector.broadcast %cst_72 : f32 to vector<2x32xf32>
    %356 = arith.addf %355, %354 : vector<2x32xf32>
    %357 = arith.divf %355, %356 : vector<2x32xf32>
    %358 = vector.extract_strided_slice %326 {offsets = [0, 32], sizes = [2, 32], strides = [1, 1]} : vector<2x128xf32> to vector<2x32xf32>
    %359 = arith.negf %358 : vector<2x32xf32>
    %360 = math.exp %359 : vector<2x32xf32>
    %cst_73 = arith.constant 1.000000e+00 : f32
    %361 = vector.broadcast %cst_73 : f32 to vector<2x32xf32>
    %362 = arith.addf %361, %360 : vector<2x32xf32>
    %363 = arith.divf %361, %362 : vector<2x32xf32>
    %364 = vector.extract_strided_slice %326 {offsets = [0, 64], sizes = [2, 32], strides = [1, 1]} : vector<2x128xf32> to vector<2x32xf32>
    %365 = math.tanh %364 : vector<2x32xf32>
    %366 = vector.extract_strided_slice %326 {offsets = [0, 96], sizes = [2, 32], strides = [1, 1]} : vector<2x128xf32> to vector<2x32xf32>
    %367 = arith.negf %366 : vector<2x32xf32>
    %368 = math.exp %367 : vector<2x32xf32>
    %cst_74 = arith.constant 1.000000e+00 : f32
    %369 = vector.broadcast %cst_74 : f32 to vector<2x32xf32>
    %370 = arith.addf %369, %368 : vector<2x32xf32>
    %371 = arith.divf %369, %370 : vector<2x32xf32>
    %372 = arith.mulf %363, %316 : vector<2x32xf32>
    %373 = arith.mulf %357, %365 : vector<2x32xf32>
    %374 = arith.addf %372, %373 : vector<2x32xf32>
    %375 = math.tanh %374 : vector<2x32xf32>
    %376 = arith.mulf %371, %375 : vector<2x32xf32>
    %377 = tpu.concatenate %351, %376 in 1 : vector<2x32xf32>, vector<2x32xf32> -> vector<2x64xf32>
    %cst_75 = arith.constant dense<0.000000e+00> : vector<2x256xf32>
    %378 = tpu.matmul %377, %23, %cst_75 {dimension_numbers = #tpu.dot_dimension_numbers<[1], [0], [0], [1], [0, 0, 1, 1], [], []>} : vector<2x64xf32>, vector<64x256xf32>, vector<2x256xf32> -> vector<2x256xf32>
    %379 = vector.extract_strided_slice %12 {offsets = [12, 0], sizes = [2, 128], strides = [1, 1]} : vector<16x128xf32> to vector<2x128xf32>
    %380 = vector.extract_strided_slice %378 {offsets = [0, 0], sizes = [2, 128], strides = [1, 1]} : vector<2x256xf32> to vector<2x128xf32>
    %381 = arith.addf %379, %380 : vector<2x128xf32>
    %382 = vector.extract_strided_slice %22 {offsets = [2, 0], sizes = [2, 128], strides = [1, 1]} : vector<16x128xf32> to vector<2x128xf32>
    %383 = vector.extract_strided_slice %378 {offsets = [0, 128], sizes = [2, 128], strides = [1, 1]} : vector<2x256xf32> to vector<2x128xf32>
    %384 = arith.addf %382, %383 : vector<2x128xf32>
    %385 = vector.extract_strided_slice %381 {offsets = [0, 0], sizes = [2, 32], strides = [1, 1]} : vector<2x128xf32> to vector<2x32xf32>
    %386 = arith.negf %385 : vector<2x32xf32>
    %387 = math.exp %386 : vector<2x32xf32>
    %cst_76 = arith.constant 1.000000e+00 : f32
    %388 = vector.broadcast %cst_76 : f32 to vector<2x32xf32>
    %389 = arith.addf %388, %387 : vector<2x32xf32>
    %390 = arith.divf %388, %389 : vector<2x32xf32>
    %391 = vector.extract_strided_slice %381 {offsets = [0, 32], sizes = [2, 32], strides = [1, 1]} : vector<2x128xf32> to vector<2x32xf32>
    %392 = arith.negf %391 : vector<2x32xf32>
    %393 = math.exp %392 : vector<2x32xf32>
    %cst_77 = arith.constant 1.000000e+00 : f32
    %394 = vector.broadcast %cst_77 : f32 to vector<2x32xf32>
    %395 = arith.addf %394, %393 : vector<2x32xf32>
    %396 = arith.divf %394, %395 : vector<2x32xf32>
    %397 = vector.extract_strided_slice %381 {offsets = [0, 64], sizes = [2, 32], strides = [1, 1]} : vector<2x128xf32> to vector<2x32xf32>
    %398 = math.tanh %397 : vector<2x32xf32>
    %399 = vector.extract_strided_slice %381 {offsets = [0, 96], sizes = [2, 32], strides = [1, 1]} : vector<2x128xf32> to vector<2x32xf32>
    %400 = arith.negf %399 : vector<2x32xf32>
    %401 = math.exp %400 : vector<2x32xf32>
    %cst_78 = arith.constant 1.000000e+00 : f32
    %402 = vector.broadcast %cst_78 : f32 to vector<2x32xf32>
    %403 = arith.addf %402, %401 : vector<2x32xf32>
    %404 = arith.divf %402, %403 : vector<2x32xf32>
    %405 = arith.mulf %396, %349 : vector<2x32xf32>
    %406 = arith.mulf %390, %398 : vector<2x32xf32>
    %407 = arith.addf %405, %406 : vector<2x32xf32>
    %408 = math.tanh %407 : vector<2x32xf32>
    %409 = arith.mulf %404, %408 : vector<2x32xf32>
    %410 = vector.extract_strided_slice %384 {offsets = [0, 0], sizes = [2, 32], strides = [1, 1]} : vector<2x128xf32> to vector<2x32xf32>
    %411 = arith.negf %410 : vector<2x32xf32>
    %412 = math.exp %411 : vector<2x32xf32>
    %cst_79 = arith.constant 1.000000e+00 : f32
    %413 = vector.broadcast %cst_79 : f32 to vector<2x32xf32>
    %414 = arith.addf %413, %412 : vector<2x32xf32>
    %415 = arith.divf %413, %414 : vector<2x32xf32>
    %416 = vector.extract_strided_slice %384 {offsets = [0, 32], sizes = [2, 32], strides = [1, 1]} : vector<2x128xf32> to vector<2x32xf32>
    %417 = arith.negf %416 : vector<2x32xf32>
    %418 = math.exp %417 : vector<2x32xf32>
    %cst_80 = arith.constant 1.000000e+00 : f32
    %419 = vector.broadcast %cst_80 : f32 to vector<2x32xf32>
    %420 = arith.addf %419, %418 : vector<2x32xf32>
    %421 = arith.divf %419, %420 : vector<2x32xf32>
    %422 = vector.extract_strided_slice %384 {offsets = [0, 64], sizes = [2, 32], strides = [1, 1]} : vector<2x128xf32> to vector<2x32xf32>
    %423 = math.tanh %422 : vector<2x32xf32>
    %424 = vector.extract_strided_slice %384 {offsets = [0, 96], sizes = [2, 32], strides = [1, 1]} : vector<2x128xf32> to vector<2x32xf32>
    %425 = arith.negf %424 : vector<2x32xf32>
    %426 = math.exp %425 : vector<2x32xf32>
    %cst_81 = arith.constant 1.000000e+00 : f32
    %427 = vector.broadcast %cst_81 : f32 to vector<2x32xf32>
    %428 = arith.addf %427, %426 : vector<2x32xf32>
    %429 = arith.divf %427, %428 : vector<2x32xf32>
    %430 = arith.mulf %421, %374 : vector<2x32xf32>
    %431 = arith.mulf %415, %423 : vector<2x32xf32>
    %432 = arith.addf %430, %431 : vector<2x32xf32>
    %433 = math.tanh %432 : vector<2x32xf32>
    %434 = arith.mulf %429, %433 : vector<2x32xf32>
    %435 = tpu.concatenate %409, %434 in 1 : vector<2x32xf32>, vector<2x32xf32> -> vector<2x64xf32>
    %cst_82 = arith.constant dense<0.000000e+00> : vector<2x256xf32>
    %436 = tpu.matmul %435, %23, %cst_82 {dimension_numbers = #tpu.dot_dimension_numbers<[1], [0], [0], [1], [0, 0, 1, 1], [], []>} : vector<2x64xf32>, vector<64x256xf32>, vector<2x256xf32> -> vector<2x256xf32>
    %437 = vector.extract_strided_slice %12 {offsets = [14, 0], sizes = [2, 128], strides = [1, 1]} : vector<16x128xf32> to vector<2x128xf32>
    %438 = vector.extract_strided_slice %436 {offsets = [0, 0], sizes = [2, 128], strides = [1, 1]} : vector<2x256xf32> to vector<2x128xf32>
    %439 = arith.addf %437, %438 : vector<2x128xf32>
    %440 = vector.extract_strided_slice %22 {offsets = [0, 0], sizes = [2, 128], strides = [1, 1]} : vector<16x128xf32> to vector<2x128xf32>
    %441 = vector.extract_strided_slice %436 {offsets = [0, 128], sizes = [2, 128], strides = [1, 1]} : vector<2x256xf32> to vector<2x128xf32>
    %442 = arith.addf %440, %441 : vector<2x128xf32>
    %443 = vector.extract_strided_slice %439 {offsets = [0, 0], sizes = [2, 32], strides = [1, 1]} : vector<2x128xf32> to vector<2x32xf32>
    %444 = arith.negf %443 : vector<2x32xf32>
    %445 = math.exp %444 : vector<2x32xf32>
    %cst_83 = arith.constant 1.000000e+00 : f32
    %446 = vector.broadcast %cst_83 : f32 to vector<2x32xf32>
    %447 = arith.addf %446, %445 : vector<2x32xf32>
    %448 = arith.divf %446, %447 : vector<2x32xf32>
    %449 = vector.extract_strided_slice %439 {offsets = [0, 32], sizes = [2, 32], strides = [1, 1]} : vector<2x128xf32> to vector<2x32xf32>
    %450 = arith.negf %449 : vector<2x32xf32>
    %451 = math.exp %450 : vector<2x32xf32>
    %cst_84 = arith.constant 1.000000e+00 : f32
    %452 = vector.broadcast %cst_84 : f32 to vector<2x32xf32>
    %453 = arith.addf %452, %451 : vector<2x32xf32>
    %454 = arith.divf %452, %453 : vector<2x32xf32>
    %455 = vector.extract_strided_slice %439 {offsets = [0, 64], sizes = [2, 32], strides = [1, 1]} : vector<2x128xf32> to vector<2x32xf32>
    %456 = math.tanh %455 : vector<2x32xf32>
    %457 = vector.extract_strided_slice %439 {offsets = [0, 96], sizes = [2, 32], strides = [1, 1]} : vector<2x128xf32> to vector<2x32xf32>
    %458 = arith.negf %457 : vector<2x32xf32>
    %459 = math.exp %458 : vector<2x32xf32>
    %cst_85 = arith.constant 1.000000e+00 : f32
    %460 = vector.broadcast %cst_85 : f32 to vector<2x32xf32>
    %461 = arith.addf %460, %459 : vector<2x32xf32>
    %462 = arith.divf %460, %461 : vector<2x32xf32>
    %463 = arith.mulf %454, %407 : vector<2x32xf32>
    %464 = arith.mulf %448, %456 : vector<2x32xf32>
    %465 = arith.addf %463, %464 : vector<2x32xf32>
    %466 = math.tanh %465 : vector<2x32xf32>
    %467 = arith.mulf %462, %466 : vector<2x32xf32>
    %468 = vector.extract_strided_slice %442 {offsets = [0, 0], sizes = [2, 32], strides = [1, 1]} : vector<2x128xf32> to vector<2x32xf32>
    %469 = arith.negf %468 : vector<2x32xf32>
    %470 = math.exp %469 : vector<2x32xf32>
    %cst_86 = arith.constant 1.000000e+00 : f32
    %471 = vector.broadcast %cst_86 : f32 to vector<2x32xf32>
    %472 = arith.addf %471, %470 : vector<2x32xf32>
    %473 = arith.divf %471, %472 : vector<2x32xf32>
    %474 = vector.extract_strided_slice %442 {offsets = [0, 32], sizes = [2, 32], strides = [1, 1]} : vector<2x128xf32> to vector<2x32xf32>
    %475 = arith.negf %474 : vector<2x32xf32>
    %476 = math.exp %475 : vector<2x32xf32>
    %cst_87 = arith.constant 1.000000e+00 : f32
    %477 = vector.broadcast %cst_87 : f32 to vector<2x32xf32>
    %478 = arith.addf %477, %476 : vector<2x32xf32>
    %479 = arith.divf %477, %478 : vector<2x32xf32>
    %480 = vector.extract_strided_slice %442 {offsets = [0, 64], sizes = [2, 32], strides = [1, 1]} : vector<2x128xf32> to vector<2x32xf32>
    %481 = math.tanh %480 : vector<2x32xf32>
    %482 = vector.extract_strided_slice %442 {offsets = [0, 96], sizes = [2, 32], strides = [1, 1]} : vector<2x128xf32> to vector<2x32xf32>
    %483 = arith.negf %482 : vector<2x32xf32>
    %484 = math.exp %483 : vector<2x32xf32>
    %cst_88 = arith.constant 1.000000e+00 : f32
    %485 = vector.broadcast %cst_88 : f32 to vector<2x32xf32>
    %486 = arith.addf %485, %484 : vector<2x32xf32>
    %487 = arith.divf %485, %486 : vector<2x32xf32>
    %488 = arith.mulf %479, %432 : vector<2x32xf32>
    %489 = arith.mulf %473, %481 : vector<2x32xf32>
    %490 = arith.addf %488, %489 : vector<2x32xf32>
    %491 = math.tanh %490 : vector<2x32xf32>
    %492 = arith.mulf %487, %491 : vector<2x32xf32>
    %c0_i32_89 = arith.constant 0 : i32
    %493 = arith.cmpi eq, %arg0, %c0_i32_89 : i32
    %494 = arith.extui %493 : i1 to i32
    %c0_i32_90 = arith.constant 0 : i32
    %495 = arith.cmpi ne, %494, %c0_i32_90 : i32
    scf.if %495 {
      %c0_97 = arith.constant 0 : index
      %c0_98 = arith.constant 0 : index
      %500 = vector.load %arg19[%c0_97, %c0_98] : memref<2x10xf32, #tpu.memory_space<vmem>>, vector<2x10xf32>
      %c0_99 = arith.constant 0 : index
      %c0_100 = arith.constant 0 : index
      %501 = vector.load %arg12[%c0_99, %c0_100] : memref<32x10xf32, #tpu.memory_space<vmem>>, vector<32x10xf32>
      %cst_101 = arith.constant dense<0.000000e+00> : vector<2x10xf32>
      %502 = tpu.matmul %467, %501, %cst_101 {dimension_numbers = #tpu.dot_dimension_numbers<[1], [0], [0], [1], [0, 0, 1, 1], [], []>} : vector<2x32xf32>, vector<32x10xf32>, vector<2x10xf32> -> vector<2x10xf32>
      %503 = arith.addf %500, %502 : vector<2x10xf32>
      %c0_102 = arith.constant 0 : index
      %c0_103 = arith.constant 0 : index
      %504 = vector.load %arg14[%c0_102, %c0_103] : memref<1x10xf32, #tpu.memory_space<vmem>>, vector<1x10xf32>
      %505 = vector.broadcast %504 : vector<1x10xf32> to vector<2x10xf32>
      %506 = arith.addf %503, %505 : vector<2x10xf32>
      %c0_104 = arith.constant 0 : index
      %c0_105 = arith.constant 0 : index
      %507 = vector.load %arg15[%c0_104, %c0_105] : memref<2x10xf32, #tpu.memory_space<vmem>>, vector<2x10xf32>
      tpu.vector_store %arg15[%c0_104, %c0_105], %506 {strides = array<i32>} : memref<2x10xf32, #tpu.memory_space<vmem>>, vector<2x10xf32>,
    } else {
    }
    %496 = tpu.concatenate %467, %492 in 1 : vector<2x32xf32>, vector<2x32xf32> -> vector<2x64xf32>
    %c0_91 = arith.constant 0 : index
    %c0_92 = arith.constant 0 : index
    %497 = vector.load %arg16[%c0_91, %c0_92] : memref<2x64xf32, #tpu.memory_space<vmem>>, vector<2x64xf32>
    tpu.vector_store %arg16[%c0_91, %c0_92], %496 {strides = array<i32>} : memref<2x64xf32, #tpu.memory_space<vmem>>, vector<2x64xf32>,
    %c0_93 = arith.constant 0 : index
    %c0_94 = arith.constant 0 : index
    %498 = vector.load %arg17[%c0_93, %c0_94] : memref<2x32xf32, #tpu.memory_space<vmem>>, vector<2x32xf32>
    tpu.vector_store %arg17[%c0_93, %c0_94], %465 {strides = array<i32>} : memref<2x32xf32, #tpu.memory_space<vmem>>, vector<2x32xf32>,
    %c0_95 = arith.constant 0 : index
    %c0_96 = arith.constant 0 : index
    %499 = vector.load %arg18[%c0_95, %c0_96] : memref<2x32xf32, #tpu.memory_space<vmem>>, vector<2x32xf32>
    tpu.vector_store %arg18[%c0_95, %c0_96], %490 {strides = array<i32>} : memref<2x32xf32, #tpu.memory_space<vmem>>, vector<2x32xf32>,
    return
  }
  func.func @transform_0(%arg0: i32) -> (i32, i32) {
    %c0_i32 = arith.constant 0 : i32
    %c0_i32_0 = arith.constant 0 : i32
    return %arg0, %c0_i32 : i32, i32
  }
  func.func @transform_1(%arg0: i32) -> (i32, i32) {
    %c0_i32 = arith.constant 0 : i32
    %c0_i32_0 = arith.constant 0 : i32
    return %arg0, %c0_i32 : i32, i32
  }
  func.func @transform_2(%arg0: i32) -> (i32, i32) {
    %c0_i32 = arith.constant 0 : i32
    %0 = arith.subi %c0_i32, %arg0 : i32
    %c0_i32_0 = arith.constant 0 : i32
    %c0_i32_1 = arith.constant 0 : i32
    return %0, %c0_i32_0 : i32, i32
  }
  func.func @transform_3(%arg0: i32) -> (i32, i32) {
    %c0_i32 = arith.constant 0 : i32
    %0 = arith.subi %c0_i32, %arg0 : i32
    %c0_i32_0 = arith.constant 0 : i32
    %c0_i32_1 = arith.constant 0 : i32
    return %0, %c0_i32_0 : i32, i32
  }
  func.func @transform_4(%arg0: i32) -> (i32, i32) {
    %c0_i32 = arith.constant 0 : i32
    %c0_i32_0 = arith.constant 0 : i32
    %c0_i32_1 = arith.constant 0 : i32
    return %c0_i32, %c0_i32_0 : i32, i32
  }
  func.func @transform_5(%arg0: i32) -> (i32, i32) {
    %c0_i32 = arith.constant 0 : i32
    %c0_i32_0 = arith.constant 0 : i32
    %c0_i32_1 = arith.constant 0 : i32
    return %c0_i32, %c0_i32_0 : i32, i32
  }
  func.func @transform_6(%arg0: i32) -> (i32, i32) {
    %c0_i32 = arith.constant 0 : i32
    %c0_i32_0 = arith.constant 0 : i32
    %c0_i32_1 = arith.constant 0 : i32
    return %c0_i32, %c0_i32_0 : i32, i32
  }
  func.func @transform_7(%arg0: i32) -> (i32, i32) {
    %c0_i32 = arith.constant 0 : i32
    %c0_i32_0 = arith.constant 0 : i32
    %c0_i32_1 = arith.constant 0 : i32
    return %c0_i32, %c0_i32_0 : i32, i32
  }
  func.func @transform_8(%arg0: i32) -> (i32, i32) {
    %c0_i32 = arith.constant 0 : i32
    %c0_i32_0 = arith.constant 0 : i32
    %c0_i32_1 = arith.constant 0 : i32
    return %c0_i32, %c0_i32_0 : i32, i32
  }
  func.func @transform_9(%arg0: i32) -> (i32, i32) {
    %c0_i32 = arith.constant 0 : i32
    %c0_i32_0 = arith.constant 0 : i32
    %c0_i32_1 = arith.constant 0 : i32
    return %c0_i32, %c0_i32_0 : i32, i32
  }
  func.func @transform_10(%arg0: i32) -> (i32, i32) {
    %c0_i32 = arith.constant 0 : i32
    %c0_i32_0 = arith.constant 0 : i32
    %c0_i32_1 = arith.constant 0 : i32
    return %c0_i32, %c0_i32_0 : i32, i32
  }
  func.func @transform_11(%arg0: i32) -> (i32, i32) {
    %c0_i32 = arith.constant 0 : i32
    %c0_i32_0 = arith.constant 0 : i32
    %c0_i32_1 = arith.constant 0 : i32
    return %c0_i32, %c0_i32_0 : i32, i32
  }
  func.func @transform_12(%arg0: i32) -> (i32, i32) {
    %c0_i32 = arith.constant 0 : i32
    %c0_i32_0 = arith.constant 0 : i32
    %c0_i32_1 = arith.constant 0 : i32
    return %c0_i32, %c0_i32_0 : i32, i32
  }
  func.func @transform_13(%arg0: i32) -> (i32, i32) {
    %c0_i32 = arith.constant 0 : i32
    %c0_i32_0 = arith.constant 0 : i32
    %c0_i32_1 = arith.constant 0 : i32
    return %c0_i32, %c0_i32_0 : i32, i32
  }
  func.func @transform_14(%arg0: i32) -> (i32, i32) {
    %c0_i32 = arith.constant 0 : i32
    %c0_i32_0 = arith.constant 0 : i32
    %c0_i32_1 = arith.constant 0 : i32
    return %c0_i32, %c0_i32_0 : i32, i32
  }
}

module attributes {stable_mosaic.version = 11 : i64} {
  func.func @kernel(%arg0: i32, %arg1: memref<16x16xf32, #tpu.memory_space<vmem>>, %arg2: memref<16x16xf32, #tpu.memory_space<vmem>>, %arg3: memref<16x128xf32, #tpu.memory_space<vmem>>, %arg4: memref<16x128xf32, #tpu.memory_space<vmem>>, %arg5: memref<1x128xf32, #tpu.memory_space<vmem>>, %arg6: memref<1x128xf32, #tpu.memory_space<vmem>>, %arg7: memref<64x256xf32, #tpu.memory_space<vmem>>, %arg8: memref<16x32xf32, #tpu.memory_space<vmem>>, %arg9: memref<16x32xf32, #tpu.memory_space<vmem>>, %arg10: memref<2x64xf32, #tpu.memory_space<vmem>>, %arg11: memref<2x32xf32, #tpu.memory_space<vmem>>, %arg12: memref<2x32xf32, #tpu.memory_space<vmem>>) attributes {dimension_semantics = [#tpu.dimension_semantics<arbitrary>], iteration_bounds = array<i64: 1>, scalar_prefetch = 0 : i64, scratch_operands = 3 : i64, tpu.core_type = #tpu.core_type<tc>, window_params = [{transform_indices = @transform_0, window_bounds = array<i64: 16, 16>}, {transform_indices = @transform_1, window_bounds = array<i64: 16, 16>}, {pipeline_mode = #tpu.pipeline_mode<synchronous>, transform_indices = @transform_2, window_bounds = array<i64: 16, 128>}, {pipeline_mode = #tpu.pipeline_mode<synchronous>, transform_indices = @transform_3, window_bounds = array<i64: 16, 128>}, {pipeline_mode = #tpu.pipeline_mode<synchronous>, transform_indices = @transform_4, window_bounds = array<i64: 1, 128>}, {pipeline_mode = #tpu.pipeline_mode<synchronous>, transform_indices = @transform_5, window_bounds = array<i64: 1, 128>}, {pipeline_mode = #tpu.pipeline_mode<synchronous>, transform_indices = @transform_6, window_bounds = array<i64: 64, 256>}, {transform_indices = @transform_7, window_bounds = array<i64: 16, 32>}, {transform_indices = @transform_8, window_bounds = array<i64: 16, 32>}]} {
    %c0_i32 = arith.constant 0 : i32
    %0 = arith.cmpi eq, %arg0, %c0_i32 : i32
    %1 = arith.extui %0 : i1 to i32
    %c0_i32_0 = arith.constant 0 : i32
    %2 = arith.cmpi ne, %1, %c0_i32_0 : i32
    scf.if %2 {
      %cst_108 = arith.constant 0.000000e+00 : f32
      %502 = vector.broadcast %cst_108 : f32 to vector<2x64xf32>
      %c0_109 = arith.constant 0 : index
      %c0_110 = arith.constant 0 : index
      %503 = vector.load %arg10[%c0_109, %c0_110] : memref<2x64xf32, #tpu.memory_space<vmem>>, vector<2x64xf32>
      tpu.vector_store %arg10[%c0_109, %c0_110], %502 {strides = array<i32>} : memref<2x64xf32, #tpu.memory_space<vmem>>, vector<2x64xf32>,
      %cst_111 = arith.constant 0.000000e+00 : f32
      %504 = vector.broadcast %cst_111 : f32 to vector<2x32xf32>
      %c0_112 = arith.constant 0 : index
      %c0_113 = arith.constant 0 : index
      %505 = vector.load %arg11[%c0_112, %c0_113] : memref<2x32xf32, #tpu.memory_space<vmem>>, vector<2x32xf32>
      tpu.vector_store %arg11[%c0_112, %c0_113], %504 {strides = array<i32>} : memref<2x32xf32, #tpu.memory_space<vmem>>, vector<2x32xf32>,
      %cst_114 = arith.constant 0.000000e+00 : f32
      %506 = vector.broadcast %cst_114 : f32 to vector<2x32xf32>
      %c0_115 = arith.constant 0 : index
      %c0_116 = arith.constant 0 : index
      %507 = vector.load %arg12[%c0_115, %c0_116] : memref<2x32xf32, #tpu.memory_space<vmem>>, vector<2x32xf32>
      tpu.vector_store %arg12[%c0_115, %c0_116], %506 {strides = array<i32>} : memref<2x32xf32, #tpu.memory_space<vmem>>, vector<2x32xf32>,
    } else {
    }
    %c0 = arith.constant 0 : index
    %c0_1 = arith.constant 0 : index
    %3 = vector.load %arg1[%c0, %c0_1] : memref<16x16xf32, #tpu.memory_space<vmem>>, vector<16x16xf32>
    %c0_2 = arith.constant 0 : index
    %c0_3 = arith.constant 0 : index
    %4 = vector.load %arg3[%c0_2, %c0_3] : memref<16x128xf32, #tpu.memory_space<vmem>>, vector<16x128xf32>
    %cst = arith.constant dense<0.000000e+00> : vector<16x128xf32>
    %5 = tpu.matmul %3, %4, %cst {dimension_numbers = #tpu.dot_dimension_numbers<[1], [0], [0], [1], [0, 0, 1, 1], [], []>} : vector<16x16xf32>, vector<16x128xf32>, vector<16x128xf32> -> vector<16x128xf32>
    %c0_4 = arith.constant 0 : index
    %c0_5 = arith.constant 0 : index
    %6 = vector.load %arg5[%c0_4, %c0_5] : memref<1x128xf32, #tpu.memory_space<vmem>>, vector<1x128xf32>
    %7 = vector.broadcast %6 : vector<1x128xf32> to vector<16x128xf32>
    %8 = arith.addf %5, %7 : vector<16x128xf32>
    %c0_6 = arith.constant 0 : index
    %c0_7 = arith.constant 0 : index
    %9 = vector.load %arg2[%c0_6, %c0_7] : memref<16x16xf32, #tpu.memory_space<vmem>>, vector<16x16xf32>
    %c0_8 = arith.constant 0 : index
    %c0_9 = arith.constant 0 : index
    %10 = vector.load %arg4[%c0_8, %c0_9] : memref<16x128xf32, #tpu.memory_space<vmem>>, vector<16x128xf32>
    %cst_10 = arith.constant dense<0.000000e+00> : vector<16x128xf32>
    %11 = tpu.matmul %9, %10, %cst_10 {dimension_numbers = #tpu.dot_dimension_numbers<[1], [0], [0], [1], [0, 0, 1, 1], [], []>} : vector<16x16xf32>, vector<16x128xf32>, vector<16x128xf32> -> vector<16x128xf32>
    %c0_11 = arith.constant 0 : index
    %c0_12 = arith.constant 0 : index
    %12 = vector.load %arg6[%c0_11, %c0_12] : memref<1x128xf32, #tpu.memory_space<vmem>>, vector<1x128xf32>
    %13 = vector.broadcast %12 : vector<1x128xf32> to vector<16x128xf32>
    %14 = arith.addf %11, %13 : vector<16x128xf32>
    %c0_13 = arith.constant 0 : index
    %c0_14 = arith.constant 0 : index
    %15 = vector.load %arg7[%c0_13, %c0_14] : memref<64x256xf32, #tpu.memory_space<vmem>>, vector<64x256xf32>
    %c0_15 = arith.constant 0 : index
    %c0_16 = arith.constant 0 : index
    %16 = vector.load %arg10[%c0_15, %c0_16] : memref<2x64xf32, #tpu.memory_space<vmem>>, vector<2x64xf32>
    %c0_17 = arith.constant 0 : index
    %c0_18 = arith.constant 0 : index
    %17 = vector.load %arg11[%c0_17, %c0_18] : memref<2x32xf32, #tpu.memory_space<vmem>>, vector<2x32xf32>
    %c0_19 = arith.constant 0 : index
    %c0_20 = arith.constant 0 : index
    %18 = vector.load %arg12[%c0_19, %c0_20] : memref<2x32xf32, #tpu.memory_space<vmem>>, vector<2x32xf32>
    %cst_21 = arith.constant dense<0.000000e+00> : vector<2x256xf32>
    %19 = tpu.matmul %16, %15, %cst_21 {dimension_numbers = #tpu.dot_dimension_numbers<[1], [0], [0], [1], [0, 0, 1, 1], [], []>} : vector<2x64xf32>, vector<64x256xf32>, vector<2x256xf32> -> vector<2x256xf32>
    %20 = vector.extract_strided_slice %8 {offsets = [0, 0], sizes = [2, 128], strides = [1, 1]} : vector<16x128xf32> to vector<2x128xf32>
    %21 = vector.extract_strided_slice %19 {offsets = [0, 0], sizes = [2, 128], strides = [1, 1]} : vector<2x256xf32> to vector<2x128xf32>
    %22 = arith.addf %20, %21 : vector<2x128xf32>
    %23 = vector.extract_strided_slice %14 {offsets = [14, 0], sizes = [2, 128], strides = [1, 1]} : vector<16x128xf32> to vector<2x128xf32>
    %24 = vector.extract_strided_slice %19 {offsets = [0, 128], sizes = [2, 128], strides = [1, 1]} : vector<2x256xf32> to vector<2x128xf32>
    %25 = arith.addf %23, %24 : vector<2x128xf32>
    %26 = vector.extract_strided_slice %22 {offsets = [0, 0], sizes = [2, 32], strides = [1, 1]} : vector<2x128xf32> to vector<2x32xf32>
    %27 = arith.negf %26 : vector<2x32xf32>
    %28 = math.exp %27 : vector<2x32xf32>
    %cst_22 = arith.constant 1.000000e+00 : f32
    %29 = vector.broadcast %cst_22 : f32 to vector<2x32xf32>
    %30 = arith.addf %29, %28 : vector<2x32xf32>
    %31 = arith.divf %29, %30 : vector<2x32xf32>
    %32 = vector.extract_strided_slice %22 {offsets = [0, 32], sizes = [2, 32], strides = [1, 1]} : vector<2x128xf32> to vector<2x32xf32>
    %33 = arith.negf %32 : vector<2x32xf32>
    %34 = math.exp %33 : vector<2x32xf32>
    %cst_23 = arith.constant 1.000000e+00 : f32
    %35 = vector.broadcast %cst_23 : f32 to vector<2x32xf32>
    %36 = arith.addf %35, %34 : vector<2x32xf32>
    %37 = arith.divf %35, %36 : vector<2x32xf32>
    %38 = vector.extract_strided_slice %22 {offsets = [0, 64], sizes = [2, 32], strides = [1, 1]} : vector<2x128xf32> to vector<2x32xf32>
    %39 = math.tanh %38 : vector<2x32xf32>
    %40 = vector.extract_strided_slice %22 {offsets = [0, 96], sizes = [2, 32], strides = [1, 1]} : vector<2x128xf32> to vector<2x32xf32>
    %41 = arith.negf %40 : vector<2x32xf32>
    %42 = math.exp %41 : vector<2x32xf32>
    %cst_24 = arith.constant 1.000000e+00 : f32
    %43 = vector.broadcast %cst_24 : f32 to vector<2x32xf32>
    %44 = arith.addf %43, %42 : vector<2x32xf32>
    %45 = arith.divf %43, %44 : vector<2x32xf32>
    %46 = arith.mulf %37, %17 : vector<2x32xf32>
    %47 = arith.mulf %31, %39 : vector<2x32xf32>
    %48 = arith.addf %46, %47 : vector<2x32xf32>
    %49 = math.tanh %48 : vector<2x32xf32>
    %50 = arith.mulf %45, %49 : vector<2x32xf32>
    %51 = vector.extract_strided_slice %25 {offsets = [0, 0], sizes = [2, 32], strides = [1, 1]} : vector<2x128xf32> to vector<2x32xf32>
    %52 = arith.negf %51 : vector<2x32xf32>
    %53 = math.exp %52 : vector<2x32xf32>
    %cst_25 = arith.constant 1.000000e+00 : f32
    %54 = vector.broadcast %cst_25 : f32 to vector<2x32xf32>
    %55 = arith.addf %54, %53 : vector<2x32xf32>
    %56 = arith.divf %54, %55 : vector<2x32xf32>
    %57 = vector.extract_strided_slice %25 {offsets = [0, 32], sizes = [2, 32], strides = [1, 1]} : vector<2x128xf32> to vector<2x32xf32>
    %58 = arith.negf %57 : vector<2x32xf32>
    %59 = math.exp %58 : vector<2x32xf32>
    %cst_26 = arith.constant 1.000000e+00 : f32
    %60 = vector.broadcast %cst_26 : f32 to vector<2x32xf32>
    %61 = arith.addf %60, %59 : vector<2x32xf32>
    %62 = arith.divf %60, %61 : vector<2x32xf32>
    %63 = vector.extract_strided_slice %25 {offsets = [0, 64], sizes = [2, 32], strides = [1, 1]} : vector<2x128xf32> to vector<2x32xf32>
    %64 = math.tanh %63 : vector<2x32xf32>
    %65 = vector.extract_strided_slice %25 {offsets = [0, 96], sizes = [2, 32], strides = [1, 1]} : vector<2x128xf32> to vector<2x32xf32>
    %66 = arith.negf %65 : vector<2x32xf32>
    %67 = math.exp %66 : vector<2x32xf32>
    %cst_27 = arith.constant 1.000000e+00 : f32
    %68 = vector.broadcast %cst_27 : f32 to vector<2x32xf32>
    %69 = arith.addf %68, %67 : vector<2x32xf32>
    %70 = arith.divf %68, %69 : vector<2x32xf32>
    %71 = arith.mulf %62, %18 : vector<2x32xf32>
    %72 = arith.mulf %56, %64 : vector<2x32xf32>
    %73 = arith.addf %71, %72 : vector<2x32xf32>
    %74 = math.tanh %73 : vector<2x32xf32>
    %75 = arith.mulf %70, %74 : vector<2x32xf32>
    %c0_28 = arith.constant 0 : index
    %c0_29 = arith.constant 0 : index
    %76 = vector.load %arg8[%c0_28, %c0_29] : memref<16x32xf32, #tpu.memory_space<vmem>>, vector<2x32xf32>
    tpu.vector_store %arg8[%c0_28, %c0_29], %50 {strides = array<i32>} : memref<16x32xf32, #tpu.memory_space<vmem>>, vector<2x32xf32>,
    %c14 = arith.constant 14 : index
    %c0_30 = arith.constant 0 : index
    %77 = vector.load %arg9[%c14, %c0_30] : memref<16x32xf32, #tpu.memory_space<vmem>>, vector<2x32xf32>
    tpu.vector_store %arg9[%c14, %c0_30], %75 {strides = array<i32>} : memref<16x32xf32, #tpu.memory_space<vmem>>, vector<2x32xf32>,
    %78 = tpu.concatenate %50, %75 in 1 : vector<2x32xf32>, vector<2x32xf32> -> vector<2x64xf32>
    %cst_31 = arith.constant dense<0.000000e+00> : vector<2x256xf32>
    %79 = tpu.matmul %78, %15, %cst_31 {dimension_numbers = #tpu.dot_dimension_numbers<[1], [0], [0], [1], [0, 0, 1, 1], [], []>} : vector<2x64xf32>, vector<64x256xf32>, vector<2x256xf32> -> vector<2x256xf32>
    %80 = vector.extract_strided_slice %8 {offsets = [2, 0], sizes = [2, 128], strides = [1, 1]} : vector<16x128xf32> to vector<2x128xf32>
    %81 = vector.extract_strided_slice %79 {offsets = [0, 0], sizes = [2, 128], strides = [1, 1]} : vector<2x256xf32> to vector<2x128xf32>
    %82 = arith.addf %80, %81 : vector<2x128xf32>
    %83 = vector.extract_strided_slice %14 {offsets = [12, 0], sizes = [2, 128], strides = [1, 1]} : vector<16x128xf32> to vector<2x128xf32>
    %84 = vector.extract_strided_slice %79 {offsets = [0, 128], sizes = [2, 128], strides = [1, 1]} : vector<2x256xf32> to vector<2x128xf32>
    %85 = arith.addf %83, %84 : vector<2x128xf32>
    %86 = vector.extract_strided_slice %82 {offsets = [0, 0], sizes = [2, 32], strides = [1, 1]} : vector<2x128xf32> to vector<2x32xf32>
    %87 = arith.negf %86 : vector<2x32xf32>
    %88 = math.exp %87 : vector<2x32xf32>
    %cst_32 = arith.constant 1.000000e+00 : f32
    %89 = vector.broadcast %cst_32 : f32 to vector<2x32xf32>
    %90 = arith.addf %89, %88 : vector<2x32xf32>
    %91 = arith.divf %89, %90 : vector<2x32xf32>
    %92 = vector.extract_strided_slice %82 {offsets = [0, 32], sizes = [2, 32], strides = [1, 1]} : vector<2x128xf32> to vector<2x32xf32>
    %93 = arith.negf %92 : vector<2x32xf32>
    %94 = math.exp %93 : vector<2x32xf32>
    %cst_33 = arith.constant 1.000000e+00 : f32
    %95 = vector.broadcast %cst_33 : f32 to vector<2x32xf32>
    %96 = arith.addf %95, %94 : vector<2x32xf32>
    %97 = arith.divf %95, %96 : vector<2x32xf32>
    %98 = vector.extract_strided_slice %82 {offsets = [0, 64], sizes = [2, 32], strides = [1, 1]} : vector<2x128xf32> to vector<2x32xf32>
    %99 = math.tanh %98 : vector<2x32xf32>
    %100 = vector.extract_strided_slice %82 {offsets = [0, 96], sizes = [2, 32], strides = [1, 1]} : vector<2x128xf32> to vector<2x32xf32>
    %101 = arith.negf %100 : vector<2x32xf32>
    %102 = math.exp %101 : vector<2x32xf32>
    %cst_34 = arith.constant 1.000000e+00 : f32
    %103 = vector.broadcast %cst_34 : f32 to vector<2x32xf32>
    %104 = arith.addf %103, %102 : vector<2x32xf32>
    %105 = arith.divf %103, %104 : vector<2x32xf32>
    %106 = arith.mulf %97, %48 : vector<2x32xf32>
    %107 = arith.mulf %91, %99 : vector<2x32xf32>
    %108 = arith.addf %106, %107 : vector<2x32xf32>
    %109 = math.tanh %108 : vector<2x32xf32>
    %110 = arith.mulf %105, %109 : vector<2x32xf32>
    %111 = vector.extract_strided_slice %85 {offsets = [0, 0], sizes = [2, 32], strides = [1, 1]} : vector<2x128xf32> to vector<2x32xf32>
    %112 = arith.negf %111 : vector<2x32xf32>
    %113 = math.exp %112 : vector<2x32xf32>
    %cst_35 = arith.constant 1.000000e+00 : f32
    %114 = vector.broadcast %cst_35 : f32 to vector<2x32xf32>
    %115 = arith.addf %114, %113 : vector<2x32xf32>
    %116 = arith.divf %114, %115 : vector<2x32xf32>
    %117 = vector.extract_strided_slice %85 {offsets = [0, 32], sizes = [2, 32], strides = [1, 1]} : vector<2x128xf32> to vector<2x32xf32>
    %118 = arith.negf %117 : vector<2x32xf32>
    %119 = math.exp %118 : vector<2x32xf32>
    %cst_36 = arith.constant 1.000000e+00 : f32
    %120 = vector.broadcast %cst_36 : f32 to vector<2x32xf32>
    %121 = arith.addf %120, %119 : vector<2x32xf32>
    %122 = arith.divf %120, %121 : vector<2x32xf32>
    %123 = vector.extract_strided_slice %85 {offsets = [0, 64], sizes = [2, 32], strides = [1, 1]} : vector<2x128xf32> to vector<2x32xf32>
    %124 = math.tanh %123 : vector<2x32xf32>
    %125 = vector.extract_strided_slice %85 {offsets = [0, 96], sizes = [2, 32], strides = [1, 1]} : vector<2x128xf32> to vector<2x32xf32>
    %126 = arith.negf %125 : vector<2x32xf32>
    %127 = math.exp %126 : vector<2x32xf32>
    %cst_37 = arith.constant 1.000000e+00 : f32
    %128 = vector.broadcast %cst_37 : f32 to vector<2x32xf32>
    %129 = arith.addf %128, %127 : vector<2x32xf32>
    %130 = arith.divf %128, %129 : vector<2x32xf32>
    %131 = arith.mulf %122, %73 : vector<2x32xf32>
    %132 = arith.mulf %116, %124 : vector<2x32xf32>
    %133 = arith.addf %131, %132 : vector<2x32xf32>
    %134 = math.tanh %133 : vector<2x32xf32>
    %135 = arith.mulf %130, %134 : vector<2x32xf32>
    %c2 = arith.constant 2 : index
    %c0_38 = arith.constant 0 : index
    %136 = vector.load %arg8[%c2, %c0_38] : memref<16x32xf32, #tpu.memory_space<vmem>>, vector<2x32xf32>
    tpu.vector_store %arg8[%c2, %c0_38], %110 {strides = array<i32>} : memref<16x32xf32, #tpu.memory_space<vmem>>, vector<2x32xf32>,
    %c12 = arith.constant 12 : index
    %c0_39 = arith.constant 0 : index
    %137 = vector.load %arg9[%c12, %c0_39] : memref<16x32xf32, #tpu.memory_space<vmem>>, vector<2x32xf32>
    tpu.vector_store %arg9[%c12, %c0_39], %135 {strides = array<i32>} : memref<16x32xf32, #tpu.memory_space<vmem>>, vector<2x32xf32>,
    %138 = tpu.concatenate %110, %135 in 1 : vector<2x32xf32>, vector<2x32xf32> -> vector<2x64xf32>
    %cst_40 = arith.constant dense<0.000000e+00> : vector<2x256xf32>
    %139 = tpu.matmul %138, %15, %cst_40 {dimension_numbers = #tpu.dot_dimension_numbers<[1], [0], [0], [1], [0, 0, 1, 1], [], []>} : vector<2x64xf32>, vector<64x256xf32>, vector<2x256xf32> -> vector<2x256xf32>
    %140 = vector.extract_strided_slice %8 {offsets = [4, 0], sizes = [2, 128], strides = [1, 1]} : vector<16x128xf32> to vector<2x128xf32>
    %141 = vector.extract_strided_slice %139 {offsets = [0, 0], sizes = [2, 128], strides = [1, 1]} : vector<2x256xf32> to vector<2x128xf32>
    %142 = arith.addf %140, %141 : vector<2x128xf32>
    %143 = vector.extract_strided_slice %14 {offsets = [10, 0], sizes = [2, 128], strides = [1, 1]} : vector<16x128xf32> to vector<2x128xf32>
    %144 = vector.extract_strided_slice %139 {offsets = [0, 128], sizes = [2, 128], strides = [1, 1]} : vector<2x256xf32> to vector<2x128xf32>
    %145 = arith.addf %143, %144 : vector<2x128xf32>
    %146 = vector.extract_strided_slice %142 {offsets = [0, 0], sizes = [2, 32], strides = [1, 1]} : vector<2x128xf32> to vector<2x32xf32>
    %147 = arith.negf %146 : vector<2x32xf32>
    %148 = math.exp %147 : vector<2x32xf32>
    %cst_41 = arith.constant 1.000000e+00 : f32
    %149 = vector.broadcast %cst_41 : f32 to vector<2x32xf32>
    %150 = arith.addf %149, %148 : vector<2x32xf32>
    %151 = arith.divf %149, %150 : vector<2x32xf32>
    %152 = vector.extract_strided_slice %142 {offsets = [0, 32], sizes = [2, 32], strides = [1, 1]} : vector<2x128xf32> to vector<2x32xf32>
    %153 = arith.negf %152 : vector<2x32xf32>
    %154 = math.exp %153 : vector<2x32xf32>
    %cst_42 = arith.constant 1.000000e+00 : f32
    %155 = vector.broadcast %cst_42 : f32 to vector<2x32xf32>
    %156 = arith.addf %155, %154 : vector<2x32xf32>
    %157 = arith.divf %155, %156 : vector<2x32xf32>
    %158 = vector.extract_strided_slice %142 {offsets = [0, 64], sizes = [2, 32], strides = [1, 1]} : vector<2x128xf32> to vector<2x32xf32>
    %159 = math.tanh %158 : vector<2x32xf32>
    %160 = vector.extract_strided_slice %142 {offsets = [0, 96], sizes = [2, 32], strides = [1, 1]} : vector<2x128xf32> to vector<2x32xf32>
    %161 = arith.negf %160 : vector<2x32xf32>
    %162 = math.exp %161 : vector<2x32xf32>
    %cst_43 = arith.constant 1.000000e+00 : f32
    %163 = vector.broadcast %cst_43 : f32 to vector<2x32xf32>
    %164 = arith.addf %163, %162 : vector<2x32xf32>
    %165 = arith.divf %163, %164 : vector<2x32xf32>
    %166 = arith.mulf %157, %108 : vector<2x32xf32>
    %167 = arith.mulf %151, %159 : vector<2x32xf32>
    %168 = arith.addf %166, %167 : vector<2x32xf32>
    %169 = math.tanh %168 : vector<2x32xf32>
    %170 = arith.mulf %165, %169 : vector<2x32xf32>
    %171 = vector.extract_strided_slice %145 {offsets = [0, 0], sizes = [2, 32], strides = [1, 1]} : vector<2x128xf32> to vector<2x32xf32>
    %172 = arith.negf %171 : vector<2x32xf32>
    %173 = math.exp %172 : vector<2x32xf32>
    %cst_44 = arith.constant 1.000000e+00 : f32
    %174 = vector.broadcast %cst_44 : f32 to vector<2x32xf32>
    %175 = arith.addf %174, %173 : vector<2x32xf32>
    %176 = arith.divf %174, %175 : vector<2x32xf32>
    %177 = vector.extract_strided_slice %145 {offsets = [0, 32], sizes = [2, 32], strides = [1, 1]} : vector<2x128xf32> to vector<2x32xf32>
    %178 = arith.negf %177 : vector<2x32xf32>
    %179 = math.exp %178 : vector<2x32xf32>
    %cst_45 = arith.constant 1.000000e+00 : f32
    %180 = vector.broadcast %cst_45 : f32 to vector<2x32xf32>
    %181 = arith.addf %180, %179 : vector<2x32xf32>
    %182 = arith.divf %180, %181 : vector<2x32xf32>
    %183 = vector.extract_strided_slice %145 {offsets = [0, 64], sizes = [2, 32], strides = [1, 1]} : vector<2x128xf32> to vector<2x32xf32>
    %184 = math.tanh %183 : vector<2x32xf32>
    %185 = vector.extract_strided_slice %145 {offsets = [0, 96], sizes = [2, 32], strides = [1, 1]} : vector<2x128xf32> to vector<2x32xf32>
    %186 = arith.negf %185 : vector<2x32xf32>
    %187 = math.exp %186 : vector<2x32xf32>
    %cst_46 = arith.constant 1.000000e+00 : f32
    %188 = vector.broadcast %cst_46 : f32 to vector<2x32xf32>
    %189 = arith.addf %188, %187 : vector<2x32xf32>
    %190 = arith.divf %188, %189 : vector<2x32xf32>
    %191 = arith.mulf %182, %133 : vector<2x32xf32>
    %192 = arith.mulf %176, %184 : vector<2x32xf32>
    %193 = arith.addf %191, %192 : vector<2x32xf32>
    %194 = math.tanh %193 : vector<2x32xf32>
    %195 = arith.mulf %190, %194 : vector<2x32xf32>
    %c4 = arith.constant 4 : index
    %c0_47 = arith.constant 0 : index
    %196 = vector.load %arg8[%c4, %c0_47] : memref<16x32xf32, #tpu.memory_space<vmem>>, vector<2x32xf32>
    tpu.vector_store %arg8[%c4, %c0_47], %170 {strides = array<i32>} : memref<16x32xf32, #tpu.memory_space<vmem>>, vector<2x32xf32>,
    %c10 = arith.constant 10 : index
    %c0_48 = arith.constant 0 : index
    %197 = vector.load %arg9[%c10, %c0_48] : memref<16x32xf32, #tpu.memory_space<vmem>>, vector<2x32xf32>
    tpu.vector_store %arg9[%c10, %c0_48], %195 {strides = array<i32>} : memref<16x32xf32, #tpu.memory_space<vmem>>, vector<2x32xf32>,
    %198 = tpu.concatenate %170, %195 in 1 : vector<2x32xf32>, vector<2x32xf32> -> vector<2x64xf32>
    %cst_49 = arith.constant dense<0.000000e+00> : vector<2x256xf32>
    %199 = tpu.matmul %198, %15, %cst_49 {dimension_numbers = #tpu.dot_dimension_numbers<[1], [0], [0], [1], [0, 0, 1, 1], [], []>} : vector<2x64xf32>, vector<64x256xf32>, vector<2x256xf32> -> vector<2x256xf32>
    %200 = vector.extract_strided_slice %8 {offsets = [6, 0], sizes = [2, 128], strides = [1, 1]} : vector<16x128xf32> to vector<2x128xf32>
    %201 = vector.extract_strided_slice %199 {offsets = [0, 0], sizes = [2, 128], strides = [1, 1]} : vector<2x256xf32> to vector<2x128xf32>
    %202 = arith.addf %200, %201 : vector<2x128xf32>
    %203 = vector.extract_strided_slice %14 {offsets = [8, 0], sizes = [2, 128], strides = [1, 1]} : vector<16x128xf32> to vector<2x128xf32>
    %204 = vector.extract_strided_slice %199 {offsets = [0, 128], sizes = [2, 128], strides = [1, 1]} : vector<2x256xf32> to vector<2x128xf32>
    %205 = arith.addf %203, %204 : vector<2x128xf32>
    %206 = vector.extract_strided_slice %202 {offsets = [0, 0], sizes = [2, 32], strides = [1, 1]} : vector<2x128xf32> to vector<2x32xf32>
    %207 = arith.negf %206 : vector<2x32xf32>
    %208 = math.exp %207 : vector<2x32xf32>
    %cst_50 = arith.constant 1.000000e+00 : f32
    %209 = vector.broadcast %cst_50 : f32 to vector<2x32xf32>
    %210 = arith.addf %209, %208 : vector<2x32xf32>
    %211 = arith.divf %209, %210 : vector<2x32xf32>
    %212 = vector.extract_strided_slice %202 {offsets = [0, 32], sizes = [2, 32], strides = [1, 1]} : vector<2x128xf32> to vector<2x32xf32>
    %213 = arith.negf %212 : vector<2x32xf32>
    %214 = math.exp %213 : vector<2x32xf32>
    %cst_51 = arith.constant 1.000000e+00 : f32
    %215 = vector.broadcast %cst_51 : f32 to vector<2x32xf32>
    %216 = arith.addf %215, %214 : vector<2x32xf32>
    %217 = arith.divf %215, %216 : vector<2x32xf32>
    %218 = vector.extract_strided_slice %202 {offsets = [0, 64], sizes = [2, 32], strides = [1, 1]} : vector<2x128xf32> to vector<2x32xf32>
    %219 = math.tanh %218 : vector<2x32xf32>
    %220 = vector.extract_strided_slice %202 {offsets = [0, 96], sizes = [2, 32], strides = [1, 1]} : vector<2x128xf32> to vector<2x32xf32>
    %221 = arith.negf %220 : vector<2x32xf32>
    %222 = math.exp %221 : vector<2x32xf32>
    %cst_52 = arith.constant 1.000000e+00 : f32
    %223 = vector.broadcast %cst_52 : f32 to vector<2x32xf32>
    %224 = arith.addf %223, %222 : vector<2x32xf32>
    %225 = arith.divf %223, %224 : vector<2x32xf32>
    %226 = arith.mulf %217, %168 : vector<2x32xf32>
    %227 = arith.mulf %211, %219 : vector<2x32xf32>
    %228 = arith.addf %226, %227 : vector<2x32xf32>
    %229 = math.tanh %228 : vector<2x32xf32>
    %230 = arith.mulf %225, %229 : vector<2x32xf32>
    %231 = vector.extract_strided_slice %205 {offsets = [0, 0], sizes = [2, 32], strides = [1, 1]} : vector<2x128xf32> to vector<2x32xf32>
    %232 = arith.negf %231 : vector<2x32xf32>
    %233 = math.exp %232 : vector<2x32xf32>
    %cst_53 = arith.constant 1.000000e+00 : f32
    %234 = vector.broadcast %cst_53 : f32 to vector<2x32xf32>
    %235 = arith.addf %234, %233 : vector<2x32xf32>
    %236 = arith.divf %234, %235 : vector<2x32xf32>
    %237 = vector.extract_strided_slice %205 {offsets = [0, 32], sizes = [2, 32], strides = [1, 1]} : vector<2x128xf32> to vector<2x32xf32>
    %238 = arith.negf %237 : vector<2x32xf32>
    %239 = math.exp %238 : vector<2x32xf32>
    %cst_54 = arith.constant 1.000000e+00 : f32
    %240 = vector.broadcast %cst_54 : f32 to vector<2x32xf32>
    %241 = arith.addf %240, %239 : vector<2x32xf32>
    %242 = arith.divf %240, %241 : vector<2x32xf32>
    %243 = vector.extract_strided_slice %205 {offsets = [0, 64], sizes = [2, 32], strides = [1, 1]} : vector<2x128xf32> to vector<2x32xf32>
    %244 = math.tanh %243 : vector<2x32xf32>
    %245 = vector.extract_strided_slice %205 {offsets = [0, 96], sizes = [2, 32], strides = [1, 1]} : vector<2x128xf32> to vector<2x32xf32>
    %246 = arith.negf %245 : vector<2x32xf32>
    %247 = math.exp %246 : vector<2x32xf32>
    %cst_55 = arith.constant 1.000000e+00 : f32
    %248 = vector.broadcast %cst_55 : f32 to vector<2x32xf32>
    %249 = arith.addf %248, %247 : vector<2x32xf32>
    %250 = arith.divf %248, %249 : vector<2x32xf32>
    %251 = arith.mulf %242, %193 : vector<2x32xf32>
    %252 = arith.mulf %236, %244 : vector<2x32xf32>
    %253 = arith.addf %251, %252 : vector<2x32xf32>
    %254 = math.tanh %253 : vector<2x32xf32>
    %255 = arith.mulf %250, %254 : vector<2x32xf32>
    %c6 = arith.constant 6 : index
    %c0_56 = arith.constant 0 : index
    %256 = vector.load %arg8[%c6, %c0_56] : memref<16x32xf32, #tpu.memory_space<vmem>>, vector<2x32xf32>
    tpu.vector_store %arg8[%c6, %c0_56], %230 {strides = array<i32>} : memref<16x32xf32, #tpu.memory_space<vmem>>, vector<2x32xf32>,
    %c8 = arith.constant 8 : index
    %c0_57 = arith.constant 0 : index
    %257 = vector.load %arg9[%c8, %c0_57] : memref<16x32xf32, #tpu.memory_space<vmem>>, vector<2x32xf32>
    tpu.vector_store %arg9[%c8, %c0_57], %255 {strides = array<i32>} : memref<16x32xf32, #tpu.memory_space<vmem>>, vector<2x32xf32>,
    %258 = tpu.concatenate %230, %255 in 1 : vector<2x32xf32>, vector<2x32xf32> -> vector<2x64xf32>
    %cst_58 = arith.constant dense<0.000000e+00> : vector<2x256xf32>
    %259 = tpu.matmul %258, %15, %cst_58 {dimension_numbers = #tpu.dot_dimension_numbers<[1], [0], [0], [1], [0, 0, 1, 1], [], []>} : vector<2x64xf32>, vector<64x256xf32>, vector<2x256xf32> -> vector<2x256xf32>
    %260 = vector.extract_strided_slice %8 {offsets = [8, 0], sizes = [2, 128], strides = [1, 1]} : vector<16x128xf32> to vector<2x128xf32>
    %261 = vector.extract_strided_slice %259 {offsets = [0, 0], sizes = [2, 128], strides = [1, 1]} : vector<2x256xf32> to vector<2x128xf32>
    %262 = arith.addf %260, %261 : vector<2x128xf32>
    %263 = vector.extract_strided_slice %14 {offsets = [6, 0], sizes = [2, 128], strides = [1, 1]} : vector<16x128xf32> to vector<2x128xf32>
    %264 = vector.extract_strided_slice %259 {offsets = [0, 128], sizes = [2, 128], strides = [1, 1]} : vector<2x256xf32> to vector<2x128xf32>
    %265 = arith.addf %263, %264 : vector<2x128xf32>
    %266 = vector.extract_strided_slice %262 {offsets = [0, 0], sizes = [2, 32], strides = [1, 1]} : vector<2x128xf32> to vector<2x32xf32>
    %267 = arith.negf %266 : vector<2x32xf32>
    %268 = math.exp %267 : vector<2x32xf32>
    %cst_59 = arith.constant 1.000000e+00 : f32
    %269 = vector.broadcast %cst_59 : f32 to vector<2x32xf32>
    %270 = arith.addf %269, %268 : vector<2x32xf32>
    %271 = arith.divf %269, %270 : vector<2x32xf32>
    %272 = vector.extract_strided_slice %262 {offsets = [0, 32], sizes = [2, 32], strides = [1, 1]} : vector<2x128xf32> to vector<2x32xf32>
    %273 = arith.negf %272 : vector<2x32xf32>
    %274 = math.exp %273 : vector<2x32xf32>
    %cst_60 = arith.constant 1.000000e+00 : f32
    %275 = vector.broadcast %cst_60 : f32 to vector<2x32xf32>
    %276 = arith.addf %275, %274 : vector<2x32xf32>
    %277 = arith.divf %275, %276 : vector<2x32xf32>
    %278 = vector.extract_strided_slice %262 {offsets = [0, 64], sizes = [2, 32], strides = [1, 1]} : vector<2x128xf32> to vector<2x32xf32>
    %279 = math.tanh %278 : vector<2x32xf32>
    %280 = vector.extract_strided_slice %262 {offsets = [0, 96], sizes = [2, 32], strides = [1, 1]} : vector<2x128xf32> to vector<2x32xf32>
    %281 = arith.negf %280 : vector<2x32xf32>
    %282 = math.exp %281 : vector<2x32xf32>
    %cst_61 = arith.constant 1.000000e+00 : f32
    %283 = vector.broadcast %cst_61 : f32 to vector<2x32xf32>
    %284 = arith.addf %283, %282 : vector<2x32xf32>
    %285 = arith.divf %283, %284 : vector<2x32xf32>
    %286 = arith.mulf %277, %228 : vector<2x32xf32>
    %287 = arith.mulf %271, %279 : vector<2x32xf32>
    %288 = arith.addf %286, %287 : vector<2x32xf32>
    %289 = math.tanh %288 : vector<2x32xf32>
    %290 = arith.mulf %285, %289 : vector<2x32xf32>
    %291 = vector.extract_strided_slice %265 {offsets = [0, 0], sizes = [2, 32], strides = [1, 1]} : vector<2x128xf32> to vector<2x32xf32>
    %292 = arith.negf %291 : vector<2x32xf32>
    %293 = math.exp %292 : vector<2x32xf32>
    %cst_62 = arith.constant 1.000000e+00 : f32
    %294 = vector.broadcast %cst_62 : f32 to vector<2x32xf32>
    %295 = arith.addf %294, %293 : vector<2x32xf32>
    %296 = arith.divf %294, %295 : vector<2x32xf32>
    %297 = vector.extract_strided_slice %265 {offsets = [0, 32], sizes = [2, 32], strides = [1, 1]} : vector<2x128xf32> to vector<2x32xf32>
    %298 = arith.negf %297 : vector<2x32xf32>
    %299 = math.exp %298 : vector<2x32xf32>
    %cst_63 = arith.constant 1.000000e+00 : f32
    %300 = vector.broadcast %cst_63 : f32 to vector<2x32xf32>
    %301 = arith.addf %300, %299 : vector<2x32xf32>
    %302 = arith.divf %300, %301 : vector<2x32xf32>
    %303 = vector.extract_strided_slice %265 {offsets = [0, 64], sizes = [2, 32], strides = [1, 1]} : vector<2x128xf32> to vector<2x32xf32>
    %304 = math.tanh %303 : vector<2x32xf32>
    %305 = vector.extract_strided_slice %265 {offsets = [0, 96], sizes = [2, 32], strides = [1, 1]} : vector<2x128xf32> to vector<2x32xf32>
    %306 = arith.negf %305 : vector<2x32xf32>
    %307 = math.exp %306 : vector<2x32xf32>
    %cst_64 = arith.constant 1.000000e+00 : f32
    %308 = vector.broadcast %cst_64 : f32 to vector<2x32xf32>
    %309 = arith.addf %308, %307 : vector<2x32xf32>
    %310 = arith.divf %308, %309 : vector<2x32xf32>
    %311 = arith.mulf %302, %253 : vector<2x32xf32>
    %312 = arith.mulf %296, %304 : vector<2x32xf32>
    %313 = arith.addf %311, %312 : vector<2x32xf32>
    %314 = math.tanh %313 : vector<2x32xf32>
    %315 = arith.mulf %310, %314 : vector<2x32xf32>
    %c8_65 = arith.constant 8 : index
    %c0_66 = arith.constant 0 : index
    %316 = vector.load %arg8[%c8_65, %c0_66] : memref<16x32xf32, #tpu.memory_space<vmem>>, vector<2x32xf32>
    tpu.vector_store %arg8[%c8_65, %c0_66], %290 {strides = array<i32>} : memref<16x32xf32, #tpu.memory_space<vmem>>, vector<2x32xf32>,
    %c6_67 = arith.constant 6 : index
    %c0_68 = arith.constant 0 : index
    %317 = vector.load %arg9[%c6_67, %c0_68] : memref<16x32xf32, #tpu.memory_space<vmem>>, vector<2x32xf32>
    tpu.vector_store %arg9[%c6_67, %c0_68], %315 {strides = array<i32>} : memref<16x32xf32, #tpu.memory_space<vmem>>, vector<2x32xf32>,
    %318 = tpu.concatenate %290, %315 in 1 : vector<2x32xf32>, vector<2x32xf32> -> vector<2x64xf32>
    %cst_69 = arith.constant dense<0.000000e+00> : vector<2x256xf32>
    %319 = tpu.matmul %318, %15, %cst_69 {dimension_numbers = #tpu.dot_dimension_numbers<[1], [0], [0], [1], [0, 0, 1, 1], [], []>} : vector<2x64xf32>, vector<64x256xf32>, vector<2x256xf32> -> vector<2x256xf32>
    %320 = vector.extract_strided_slice %8 {offsets = [10, 0], sizes = [2, 128], strides = [1, 1]} : vector<16x128xf32> to vector<2x128xf32>
    %321 = vector.extract_strided_slice %319 {offsets = [0, 0], sizes = [2, 128], strides = [1, 1]} : vector<2x256xf32> to vector<2x128xf32>
    %322 = arith.addf %320, %321 : vector<2x128xf32>
    %323 = vector.extract_strided_slice %14 {offsets = [4, 0], sizes = [2, 128], strides = [1, 1]} : vector<16x128xf32> to vector<2x128xf32>
    %324 = vector.extract_strided_slice %319 {offsets = [0, 128], sizes = [2, 128], strides = [1, 1]} : vector<2x256xf32> to vector<2x128xf32>
    %325 = arith.addf %323, %324 : vector<2x128xf32>
    %326 = vector.extract_strided_slice %322 {offsets = [0, 0], sizes = [2, 32], strides = [1, 1]} : vector<2x128xf32> to vector<2x32xf32>
    %327 = arith.negf %326 : vector<2x32xf32>
    %328 = math.exp %327 : vector<2x32xf32>
    %cst_70 = arith.constant 1.000000e+00 : f32
    %329 = vector.broadcast %cst_70 : f32 to vector<2x32xf32>
    %330 = arith.addf %329, %328 : vector<2x32xf32>
    %331 = arith.divf %329, %330 : vector<2x32xf32>
    %332 = vector.extract_strided_slice %322 {offsets = [0, 32], sizes = [2, 32], strides = [1, 1]} : vector<2x128xf32> to vector<2x32xf32>
    %333 = arith.negf %332 : vector<2x32xf32>
    %334 = math.exp %333 : vector<2x32xf32>
    %cst_71 = arith.constant 1.000000e+00 : f32
    %335 = vector.broadcast %cst_71 : f32 to vector<2x32xf32>
    %336 = arith.addf %335, %334 : vector<2x32xf32>
    %337 = arith.divf %335, %336 : vector<2x32xf32>
    %338 = vector.extract_strided_slice %322 {offsets = [0, 64], sizes = [2, 32], strides = [1, 1]} : vector<2x128xf32> to vector<2x32xf32>
    %339 = math.tanh %338 : vector<2x32xf32>
    %340 = vector.extract_strided_slice %322 {offsets = [0, 96], sizes = [2, 32], strides = [1, 1]} : vector<2x128xf32> to vector<2x32xf32>
    %341 = arith.negf %340 : vector<2x32xf32>
    %342 = math.exp %341 : vector<2x32xf32>
    %cst_72 = arith.constant 1.000000e+00 : f32
    %343 = vector.broadcast %cst_72 : f32 to vector<2x32xf32>
    %344 = arith.addf %343, %342 : vector<2x32xf32>
    %345 = arith.divf %343, %344 : vector<2x32xf32>
    %346 = arith.mulf %337, %288 : vector<2x32xf32>
    %347 = arith.mulf %331, %339 : vector<2x32xf32>
    %348 = arith.addf %346, %347 : vector<2x32xf32>
    %349 = math.tanh %348 : vector<2x32xf32>
    %350 = arith.mulf %345, %349 : vector<2x32xf32>
    %351 = vector.extract_strided_slice %325 {offsets = [0, 0], sizes = [2, 32], strides = [1, 1]} : vector<2x128xf32> to vector<2x32xf32>
    %352 = arith.negf %351 : vector<2x32xf32>
    %353 = math.exp %352 : vector<2x32xf32>
    %cst_73 = arith.constant 1.000000e+00 : f32
    %354 = vector.broadcast %cst_73 : f32 to vector<2x32xf32>
    %355 = arith.addf %354, %353 : vector<2x32xf32>
    %356 = arith.divf %354, %355 : vector<2x32xf32>
    %357 = vector.extract_strided_slice %325 {offsets = [0, 32], sizes = [2, 32], strides = [1, 1]} : vector<2x128xf32> to vector<2x32xf32>
    %358 = arith.negf %357 : vector<2x32xf32>
    %359 = math.exp %358 : vector<2x32xf32>
    %cst_74 = arith.constant 1.000000e+00 : f32
    %360 = vector.broadcast %cst_74 : f32 to vector<2x32xf32>
    %361 = arith.addf %360, %359 : vector<2x32xf32>
    %362 = arith.divf %360, %361 : vector<2x32xf32>
    %363 = vector.extract_strided_slice %325 {offsets = [0, 64], sizes = [2, 32], strides = [1, 1]} : vector<2x128xf32> to vector<2x32xf32>
    %364 = math.tanh %363 : vector<2x32xf32>
    %365 = vector.extract_strided_slice %325 {offsets = [0, 96], sizes = [2, 32], strides = [1, 1]} : vector<2x128xf32> to vector<2x32xf32>
    %366 = arith.negf %365 : vector<2x32xf32>
    %367 = math.exp %366 : vector<2x32xf32>
    %cst_75 = arith.constant 1.000000e+00 : f32
    %368 = vector.broadcast %cst_75 : f32 to vector<2x32xf32>
    %369 = arith.addf %368, %367 : vector<2x32xf32>
    %370 = arith.divf %368, %369 : vector<2x32xf32>
    %371 = arith.mulf %362, %313 : vector<2x32xf32>
    %372 = arith.mulf %356, %364 : vector<2x32xf32>
    %373 = arith.addf %371, %372 : vector<2x32xf32>
    %374 = math.tanh %373 : vector<2x32xf32>
    %375 = arith.mulf %370, %374 : vector<2x32xf32>
    %c10_76 = arith.constant 10 : index
    %c0_77 = arith.constant 0 : index
    %376 = vector.load %arg8[%c10_76, %c0_77] : memref<16x32xf32, #tpu.memory_space<vmem>>, vector<2x32xf32>
    tpu.vector_store %arg8[%c10_76, %c0_77], %350 {strides = array<i32>} : memref<16x32xf32, #tpu.memory_space<vmem>>, vector<2x32xf32>,
    %c4_78 = arith.constant 4 : index
    %c0_79 = arith.constant 0 : index
    %377 = vector.load %arg9[%c4_78, %c0_79] : memref<16x32xf32, #tpu.memory_space<vmem>>, vector<2x32xf32>
    tpu.vector_store %arg9[%c4_78, %c0_79], %375 {strides = array<i32>} : memref<16x32xf32, #tpu.memory_space<vmem>>, vector<2x32xf32>,
    %378 = tpu.concatenate %350, %375 in 1 : vector<2x32xf32>, vector<2x32xf32> -> vector<2x64xf32>
    %cst_80 = arith.constant dense<0.000000e+00> : vector<2x256xf32>
    %379 = tpu.matmul %378, %15, %cst_80 {dimension_numbers = #tpu.dot_dimension_numbers<[1], [0], [0], [1], [0, 0, 1, 1], [], []>} : vector<2x64xf32>, vector<64x256xf32>, vector<2x256xf32> -> vector<2x256xf32>
    %380 = vector.extract_strided_slice %8 {offsets = [12, 0], sizes = [2, 128], strides = [1, 1]} : vector<16x128xf32> to vector<2x128xf32>
    %381 = vector.extract_strided_slice %379 {offsets = [0, 0], sizes = [2, 128], strides = [1, 1]} : vector<2x256xf32> to vector<2x128xf32>
    %382 = arith.addf %380, %381 : vector<2x128xf32>
    %383 = vector.extract_strided_slice %14 {offsets = [2, 0], sizes = [2, 128], strides = [1, 1]} : vector<16x128xf32> to vector<2x128xf32>
    %384 = vector.extract_strided_slice %379 {offsets = [0, 128], sizes = [2, 128], strides = [1, 1]} : vector<2x256xf32> to vector<2x128xf32>
    %385 = arith.addf %383, %384 : vector<2x128xf32>
    %386 = vector.extract_strided_slice %382 {offsets = [0, 0], sizes = [2, 32], strides = [1, 1]} : vector<2x128xf32> to vector<2x32xf32>
    %387 = arith.negf %386 : vector<2x32xf32>
    %388 = math.exp %387 : vector<2x32xf32>
    %cst_81 = arith.constant 1.000000e+00 : f32
    %389 = vector.broadcast %cst_81 : f32 to vector<2x32xf32>
    %390 = arith.addf %389, %388 : vector<2x32xf32>
    %391 = arith.divf %389, %390 : vector<2x32xf32>
    %392 = vector.extract_strided_slice %382 {offsets = [0, 32], sizes = [2, 32], strides = [1, 1]} : vector<2x128xf32> to vector<2x32xf32>
    %393 = arith.negf %392 : vector<2x32xf32>
    %394 = math.exp %393 : vector<2x32xf32>
    %cst_82 = arith.constant 1.000000e+00 : f32
    %395 = vector.broadcast %cst_82 : f32 to vector<2x32xf32>
    %396 = arith.addf %395, %394 : vector<2x32xf32>
    %397 = arith.divf %395, %396 : vector<2x32xf32>
    %398 = vector.extract_strided_slice %382 {offsets = [0, 64], sizes = [2, 32], strides = [1, 1]} : vector<2x128xf32> to vector<2x32xf32>
    %399 = math.tanh %398 : vector<2x32xf32>
    %400 = vector.extract_strided_slice %382 {offsets = [0, 96], sizes = [2, 32], strides = [1, 1]} : vector<2x128xf32> to vector<2x32xf32>
    %401 = arith.negf %400 : vector<2x32xf32>
    %402 = math.exp %401 : vector<2x32xf32>
    %cst_83 = arith.constant 1.000000e+00 : f32
    %403 = vector.broadcast %cst_83 : f32 to vector<2x32xf32>
    %404 = arith.addf %403, %402 : vector<2x32xf32>
    %405 = arith.divf %403, %404 : vector<2x32xf32>
    %406 = arith.mulf %397, %348 : vector<2x32xf32>
    %407 = arith.mulf %391, %399 : vector<2x32xf32>
    %408 = arith.addf %406, %407 : vector<2x32xf32>
    %409 = math.tanh %408 : vector<2x32xf32>
    %410 = arith.mulf %405, %409 : vector<2x32xf32>
    %411 = vector.extract_strided_slice %385 {offsets = [0, 0], sizes = [2, 32], strides = [1, 1]} : vector<2x128xf32> to vector<2x32xf32>
    %412 = arith.negf %411 : vector<2x32xf32>
    %413 = math.exp %412 : vector<2x32xf32>
    %cst_84 = arith.constant 1.000000e+00 : f32
    %414 = vector.broadcast %cst_84 : f32 to vector<2x32xf32>
    %415 = arith.addf %414, %413 : vector<2x32xf32>
    %416 = arith.divf %414, %415 : vector<2x32xf32>
    %417 = vector.extract_strided_slice %385 {offsets = [0, 32], sizes = [2, 32], strides = [1, 1]} : vector<2x128xf32> to vector<2x32xf32>
    %418 = arith.negf %417 : vector<2x32xf32>
    %419 = math.exp %418 : vector<2x32xf32>
    %cst_85 = arith.constant 1.000000e+00 : f32
    %420 = vector.broadcast %cst_85 : f32 to vector<2x32xf32>
    %421 = arith.addf %420, %419 : vector<2x32xf32>
    %422 = arith.divf %420, %421 : vector<2x32xf32>
    %423 = vector.extract_strided_slice %385 {offsets = [0, 64], sizes = [2, 32], strides = [1, 1]} : vector<2x128xf32> to vector<2x32xf32>
    %424 = math.tanh %423 : vector<2x32xf32>
    %425 = vector.extract_strided_slice %385 {offsets = [0, 96], sizes = [2, 32], strides = [1, 1]} : vector<2x128xf32> to vector<2x32xf32>
    %426 = arith.negf %425 : vector<2x32xf32>
    %427 = math.exp %426 : vector<2x32xf32>
    %cst_86 = arith.constant 1.000000e+00 : f32
    %428 = vector.broadcast %cst_86 : f32 to vector<2x32xf32>
    %429 = arith.addf %428, %427 : vector<2x32xf32>
    %430 = arith.divf %428, %429 : vector<2x32xf32>
    %431 = arith.mulf %422, %373 : vector<2x32xf32>
    %432 = arith.mulf %416, %424 : vector<2x32xf32>
    %433 = arith.addf %431, %432 : vector<2x32xf32>
    %434 = math.tanh %433 : vector<2x32xf32>
    %435 = arith.mulf %430, %434 : vector<2x32xf32>
    %c12_87 = arith.constant 12 : index
    %c0_88 = arith.constant 0 : index
    %436 = vector.load %arg8[%c12_87, %c0_88] : memref<16x32xf32, #tpu.memory_space<vmem>>, vector<2x32xf32>
    tpu.vector_store %arg8[%c12_87, %c0_88], %410 {strides = array<i32>} : memref<16x32xf32, #tpu.memory_space<vmem>>, vector<2x32xf32>,
    %c2_89 = arith.constant 2 : index
    %c0_90 = arith.constant 0 : index
    %437 = vector.load %arg9[%c2_89, %c0_90] : memref<16x32xf32, #tpu.memory_space<vmem>>, vector<2x32xf32>
    tpu.vector_store %arg9[%c2_89, %c0_90], %435 {strides = array<i32>} : memref<16x32xf32, #tpu.memory_space<vmem>>, vector<2x32xf32>,
    %438 = tpu.concatenate %410, %435 in 1 : vector<2x32xf32>, vector<2x32xf32> -> vector<2x64xf32>
    %cst_91 = arith.constant dense<0.000000e+00> : vector<2x256xf32>
    %439 = tpu.matmul %438, %15, %cst_91 {dimension_numbers = #tpu.dot_dimension_numbers<[1], [0], [0], [1], [0, 0, 1, 1], [], []>} : vector<2x64xf32>, vector<64x256xf32>, vector<2x256xf32> -> vector<2x256xf32>
    %440 = vector.extract_strided_slice %8 {offsets = [14, 0], sizes = [2, 128], strides = [1, 1]} : vector<16x128xf32> to vector<2x128xf32>
    %441 = vector.extract_strided_slice %439 {offsets = [0, 0], sizes = [2, 128], strides = [1, 1]} : vector<2x256xf32> to vector<2x128xf32>
    %442 = arith.addf %440, %441 : vector<2x128xf32>
    %443 = vector.extract_strided_slice %14 {offsets = [0, 0], sizes = [2, 128], strides = [1, 1]} : vector<16x128xf32> to vector<2x128xf32>
    %444 = vector.extract_strided_slice %439 {offsets = [0, 128], sizes = [2, 128], strides = [1, 1]} : vector<2x256xf32> to vector<2x128xf32>
    %445 = arith.addf %443, %444 : vector<2x128xf32>
    %446 = vector.extract_strided_slice %442 {offsets = [0, 0], sizes = [2, 32], strides = [1, 1]} : vector<2x128xf32> to vector<2x32xf32>
    %447 = arith.negf %446 : vector<2x32xf32>
    %448 = math.exp %447 : vector<2x32xf32>
    %cst_92 = arith.constant 1.000000e+00 : f32
    %449 = vector.broadcast %cst_92 : f32 to vector<2x32xf32>
    %450 = arith.addf %449, %448 : vector<2x32xf32>
    %451 = arith.divf %449, %450 : vector<2x32xf32>
    %452 = vector.extract_strided_slice %442 {offsets = [0, 32], sizes = [2, 32], strides = [1, 1]} : vector<2x128xf32> to vector<2x32xf32>
    %453 = arith.negf %452 : vector<2x32xf32>
    %454 = math.exp %453 : vector<2x32xf32>
    %cst_93 = arith.constant 1.000000e+00 : f32
    %455 = vector.broadcast %cst_93 : f32 to vector<2x32xf32>
    %456 = arith.addf %455, %454 : vector<2x32xf32>
    %457 = arith.divf %455, %456 : vector<2x32xf32>
    %458 = vector.extract_strided_slice %442 {offsets = [0, 64], sizes = [2, 32], strides = [1, 1]} : vector<2x128xf32> to vector<2x32xf32>
    %459 = math.tanh %458 : vector<2x32xf32>
    %460 = vector.extract_strided_slice %442 {offsets = [0, 96], sizes = [2, 32], strides = [1, 1]} : vector<2x128xf32> to vector<2x32xf32>
    %461 = arith.negf %460 : vector<2x32xf32>
    %462 = math.exp %461 : vector<2x32xf32>
    %cst_94 = arith.constant 1.000000e+00 : f32
    %463 = vector.broadcast %cst_94 : f32 to vector<2x32xf32>
    %464 = arith.addf %463, %462 : vector<2x32xf32>
    %465 = arith.divf %463, %464 : vector<2x32xf32>
    %466 = arith.mulf %457, %408 : vector<2x32xf32>
    %467 = arith.mulf %451, %459 : vector<2x32xf32>
    %468 = arith.addf %466, %467 : vector<2x32xf32>
    %469 = math.tanh %468 : vector<2x32xf32>
    %470 = arith.mulf %465, %469 : vector<2x32xf32>
    %471 = vector.extract_strided_slice %445 {offsets = [0, 0], sizes = [2, 32], strides = [1, 1]} : vector<2x128xf32> to vector<2x32xf32>
    %472 = arith.negf %471 : vector<2x32xf32>
    %473 = math.exp %472 : vector<2x32xf32>
    %cst_95 = arith.constant 1.000000e+00 : f32
    %474 = vector.broadcast %cst_95 : f32 to vector<2x32xf32>
    %475 = arith.addf %474, %473 : vector<2x32xf32>
    %476 = arith.divf %474, %475 : vector<2x32xf32>
    %477 = vector.extract_strided_slice %445 {offsets = [0, 32], sizes = [2, 32], strides = [1, 1]} : vector<2x128xf32> to vector<2x32xf32>
    %478 = arith.negf %477 : vector<2x32xf32>
    %479 = math.exp %478 : vector<2x32xf32>
    %cst_96 = arith.constant 1.000000e+00 : f32
    %480 = vector.broadcast %cst_96 : f32 to vector<2x32xf32>
    %481 = arith.addf %480, %479 : vector<2x32xf32>
    %482 = arith.divf %480, %481 : vector<2x32xf32>
    %483 = vector.extract_strided_slice %445 {offsets = [0, 64], sizes = [2, 32], strides = [1, 1]} : vector<2x128xf32> to vector<2x32xf32>
    %484 = math.tanh %483 : vector<2x32xf32>
    %485 = vector.extract_strided_slice %445 {offsets = [0, 96], sizes = [2, 32], strides = [1, 1]} : vector<2x128xf32> to vector<2x32xf32>
    %486 = arith.negf %485 : vector<2x32xf32>
    %487 = math.exp %486 : vector<2x32xf32>
    %cst_97 = arith.constant 1.000000e+00 : f32
    %488 = vector.broadcast %cst_97 : f32 to vector<2x32xf32>
    %489 = arith.addf %488, %487 : vector<2x32xf32>
    %490 = arith.divf %488, %489 : vector<2x32xf32>
    %491 = arith.mulf %482, %433 : vector<2x32xf32>
    %492 = arith.mulf %476, %484 : vector<2x32xf32>
    %493 = arith.addf %491, %492 : vector<2x32xf32>
    %494 = math.tanh %493 : vector<2x32xf32>
    %495 = arith.mulf %490, %494 : vector<2x32xf32>
    %c14_98 = arith.constant 14 : index
    %c0_99 = arith.constant 0 : index
    %496 = vector.load %arg8[%c14_98, %c0_99] : memref<16x32xf32, #tpu.memory_space<vmem>>, vector<2x32xf32>
    tpu.vector_store %arg8[%c14_98, %c0_99], %470 {strides = array<i32>} : memref<16x32xf32, #tpu.memory_space<vmem>>, vector<2x32xf32>,
    %c0_100 = arith.constant 0 : index
    %c0_101 = arith.constant 0 : index
    %497 = vector.load %arg9[%c0_100, %c0_101] : memref<16x32xf32, #tpu.memory_space<vmem>>, vector<2x32xf32>
    tpu.vector_store %arg9[%c0_100, %c0_101], %495 {strides = array<i32>} : memref<16x32xf32, #tpu.memory_space<vmem>>, vector<2x32xf32>,
    %498 = tpu.concatenate %470, %495 in 1 : vector<2x32xf32>, vector<2x32xf32> -> vector<2x64xf32>
    %c0_102 = arith.constant 0 : index
    %c0_103 = arith.constant 0 : index
    %499 = vector.load %arg10[%c0_102, %c0_103] : memref<2x64xf32, #tpu.memory_space<vmem>>, vector<2x64xf32>
    tpu.vector_store %arg10[%c0_102, %c0_103], %498 {strides = array<i32>} : memref<2x64xf32, #tpu.memory_space<vmem>>, vector<2x64xf32>,
    %c0_104 = arith.constant 0 : index
    %c0_105 = arith.constant 0 : index
    %500 = vector.load %arg11[%c0_104, %c0_105] : memref<2x32xf32, #tpu.memory_space<vmem>>, vector<2x32xf32>
    tpu.vector_store %arg11[%c0_104, %c0_105], %468 {strides = array<i32>} : memref<2x32xf32, #tpu.memory_space<vmem>>, vector<2x32xf32>,
    %c0_106 = arith.constant 0 : index
    %c0_107 = arith.constant 0 : index
    %501 = vector.load %arg12[%c0_106, %c0_107] : memref<2x32xf32, #tpu.memory_space<vmem>>, vector<2x32xf32>
    tpu.vector_store %arg12[%c0_106, %c0_107], %493 {strides = array<i32>} : memref<2x32xf32, #tpu.memory_space<vmem>>, vector<2x32xf32>,
    return
  }
  func.func @transform_0(%arg0: i32) -> (i32, i32) {
    %c0_i32 = arith.constant 0 : i32
    %c0_i32_0 = arith.constant 0 : i32
    return %arg0, %c0_i32 : i32, i32
  }
  func.func @transform_1(%arg0: i32) -> (i32, i32) {
    %c0_i32 = arith.constant 0 : i32
    %0 = arith.subi %c0_i32, %arg0 : i32
    %c0_i32_0 = arith.constant 0 : i32
    %c0_i32_1 = arith.constant 0 : i32
    return %0, %c0_i32_0 : i32, i32
  }
  func.func @transform_2(%arg0: i32) -> (i32, i32) {
    %c0_i32 = arith.constant 0 : i32
    %c0_i32_0 = arith.constant 0 : i32
    %c0_i32_1 = arith.constant 0 : i32
    return %c0_i32, %c0_i32_0 : i32, i32
  }
  func.func @transform_3(%arg0: i32) -> (i32, i32) {
    %c0_i32 = arith.constant 0 : i32
    %c0_i32_0 = arith.constant 0 : i32
    %c0_i32_1 = arith.constant 0 : i32
    return %c0_i32, %c0_i32_0 : i32, i32
  }
  func.func @transform_4(%arg0: i32) -> (i32, i32) {
    %c0_i32 = arith.constant 0 : i32
    %c0_i32_0 = arith.constant 0 : i32
    %c0_i32_1 = arith.constant 0 : i32
    return %c0_i32, %c0_i32_0 : i32, i32
  }
  func.func @transform_5(%arg0: i32) -> (i32, i32) {
    %c0_i32 = arith.constant 0 : i32
    %c0_i32_0 = arith.constant 0 : i32
    %c0_i32_1 = arith.constant 0 : i32
    return %c0_i32, %c0_i32_0 : i32, i32
  }
  func.func @transform_6(%arg0: i32) -> (i32, i32) {
    %c0_i32 = arith.constant 0 : i32
    %c0_i32_0 = arith.constant 0 : i32
    %c0_i32_1 = arith.constant 0 : i32
    return %c0_i32, %c0_i32_0 : i32, i32
  }
  func.func @transform_7(%arg0: i32) -> (i32, i32) {
    %c0_i32 = arith.constant 0 : i32
    %c0_i32_0 = arith.constant 0 : i32
    return %arg0, %c0_i32 : i32, i32
  }
  func.func @transform_8(%arg0: i32) -> (i32, i32) {
    %c0_i32 = arith.constant 0 : i32
    %0 = arith.subi %c0_i32, %arg0 : i32
    %c0_i32_0 = arith.constant 0 : i32
    %c0_i32_1 = arith.constant 0 : i32
    return %0, %c0_i32_0 : i32, i32
  }
}

</mosaic_0001>

<bundles_post_ra>
// kernel: birnn_forward.2
= control target key start
LH: loop header
LB: loop body
LE: loop exit
PB: predicated region body
PF: predicated region fallthrough
CT: control target
= control target key end

     0   :  { %vm84_vm0 = vcmask 130048   ;;  %vm68_vm1 = vcmask 517120   ;;  %v1855_v3 = vmov 0.0   ;;  %vm70_vm2 = vcmask 254976   ;;  %s1856_s23 = smov 32   ;;  %s1858_s22 = smov 96   ;;  %s2307_s2 = inlined_call_operand.vmem [shape: f32[16,128], index: 2, kind: input, shape index: {}]   ;;  %s2308_s0 = inlined_call_operand.vmem [shape: f32[16,16], index: 0, kind: input, shape index: {}, may-alias: {0,1}]   ;;  %s2309_s6 = inlined_call_operand.vmem [shape: f32[64,256], index: 6, kind: input, shape index: {}]   ;;  %s2310_s3 = inlined_call_operand.vmem [shape: f32[16,128], index: 3, kind: input, shape index: {}]   ;;  %s2311_s1 = inlined_call_operand.vmem [shape: f32[16,16], index: 1, kind: input, shape index: {}, may-alias: {0,1}]   ;;  %s2312_s4 = inlined_call_operand.vmem [shape: f32[1,128], index: 4, kind: input, shape index: {}]   ;;  %s2313_s5 = inlined_call_operand.vmem [shape: f32[1,128], index: 5, kind: input, shape index: {}]   ;;  %s2314_s7 = inlined_call_operand.vmem [shape: f32[16,32], index: 7, kind: output, shape index: {0}]   ;;  %s2315_s8 = inlined_call_operand.vmem [shape: f32[16,32], index: 8, kind: output, shape index: {1}]  }
   0x1   :  { %v75_v0 = vld [vmem:[%s2307_s2] sm:$0xff]  ;;  %v76_v1 = vld [vmem:[%s2307_s2 + $0x8] sm:$0xff]  ;;  %69 = vst.msk [vmem:[#allocation2] sm:$0x3] %vm68_vm1, %v1855_v3  ;;  %v261_v6 = vld [vmem:[%s2309_s6 + $0x18] sm:$0xff]  ;;  %vm277_vm3 = vcmask 523264  }
   0x2   :  { %v73_v2 = vld [vmem:[%s2308_s0] sm:$0xff]  ;;  %v1587_v4 = vpack.c.bf16 %v76_v1, %v75_v0  ;;  %v259_v5 = vld [vmem:[%s2309_s6 + $0x8] sm:$0xff]  ;;  %72 = vst.msk [vmem:[#allocation4] sm:$0x3] %vm70_vm2, %v1855_v3  ;;  %71 = vst.msk [vmem:[#allocation3] sm:$0x3] %vm70_vm2, %v1855_v3 }
   0x3   :  { %1577 = vmatprep.mubr.msk.f32.mxu0 %vm84_vm0, %v73_v2  ;;  %v1925_v7 = vpack.c.bf16 %v261_v6, %v259_v5  ;;  %v258_v8 = vld [vmem:[%s2309_s6] sm:$0xff]  ;;  %v260_v9 = vld [vmem:[%s2309_s6 + $0x10] sm:$0xff]  ;;  %v263_v10 = vld [vmem:[%s2309_s6 + $0x28] sm:$0xff]  ;;  %vm430_vm4 = vcmask 261120   ;;  %vm572_vm5 = vcmask 257026   ;;  %vm578_vm6 = vcmask 259076  }
   0x4   :  { %1588 = vmatprep.subr.bf16.mxu0 %v1587_v4  ;;  %v265_v11 = vld [vmem:[%s2309_s6 + $0x38] sm:$0xff]  ;;  %v74_v12 = vld [vmem:[%s2308_s0 + $0x8] sm:$0xff]  ;;  %v1942_v13 = vpack.c.bf16 %v260_v9, %v258_v8  ;;  %v262_v14 = vld [vmem:[%s2309_s6 + $0x20] sm:$0xff]  ;;  %vm424_vm7 = vcmask 261126   ;;  %vm1487_vm8 = vcmask 523270  }
   0x5   :  { %1590 = vmatpush3.bf16.msra.mxu0 %v1587_v4  ;;  %v1948_v15 = vpack.c.bf16 %v265_v11, %v263_v10  ;;  %v264_v16 = vld [vmem:[%s2309_s6 + $0x30] sm:$0xff]  ;;  %v168_v17 = vld [vmem:[%s2310_s3] sm:$0xff]  ;;  %v169_v18 = vld [vmem:[%s2310_s3 + $0x8] sm:$0xff] }
   0x6   :  { %1596 = vmatprep.subr.bf16.mxu0 %v1925_v7  ;;  %v267_v19 = vld [vmem:[%s2309_s6 + $0x48] sm:$0xff]  ;;  %v269_v20 = vld [vmem:[%s2309_s6 + $0x58] sm:$0xff]  ;;  %v1591_v21 = vpack.c.bf16 %v169_v18, %v168_v17  ;;  %v166_v22 = vld [vmem:[%s2311_s1] sm:$0xff]  ;;  %v1970_v23 = vpack.c.bf16 %v264_v16, %v262_v14 }
   0x7   :  { %v1973_v25 = vpack.c.bf16 %v269_v20, %v267_v19  ;;  %v266_v26 = vld [vmem:[%s2309_s6 + $0x40] sm:$0xff]  ;;  %v268_v27 = vld [vmem:[%s2309_s6 + $0x50] sm:$0xff]  ;;  %v167_v28 = vld [vmem:[%s2311_s1 + $0x8] sm:$0xff]  ;;  %1584 = vmatprep.mubr.msk.f32.mxu1 %vm84_vm0, %v166_v22 }
   0x8   :  { %1578 = vmatmul.mubr.msk.f32.vlgmr.msra.gmra.mrb[0].mxu0 %vm84_vm0, %v74_v12  ;;  %1592 = vmatprep.subr.bf16.mxu1 %v1591_v21  ;;  %v271_v30 = vld [vmem:[%s2309_s6 + $0x68] sm:$0xff]  ;;  %v273_v31 = vld [vmem:[%s2309_s6 + $0x78] sm:$0xff]  ;;  %v1995_v32 = vpack.c.bf16 %v268_v27, %v266_v26  ;;  %v270_v35 = vld [vmem:[%s2309_s6 + $0x60] sm:$0xff] }
   0x9   :  { %1598 = vmatpush1.bf16.msra.mxu0 %v1942_v13  ;;  %v276_v24 = vld [vmem:[#allocation4] sm:$0x3]  ;;  %1594 = vmatpush3.bf16.msra.mxu1 %v1591_v21  ;;  %v275_v33 = vld [vmem:[#allocation3] sm:$0x3]  ;;  %v1999_v34 = vpack.c.bf16 %v273_v31, %v271_v30  ;;  %v272_v36 = vld [vmem:[%s2309_s6 + $0x70] sm:$0xff] }
   0xa   :  { %1600 = vmatprep.subr.bf16.mxu0 %v1948_v15  ;;  %v393_v29 = vrot.slane %v276_v24, 2  ;;  %345 = vmatprep.mubr.f32.mxu0 %v1855_v3  ;;  %v2012_v37 = vpack.c.bf16 %v272_v36, %v270_v35  ;;  %v274_v38 = vld [vmem:[#allocation2] sm:$0x3] }
   0xb   :  { %1612 = vmatprep.subr.bf16.mxu1 %v1925_v7  ;;  %v1535_v39 = vld [vmem:[%s2312_s4] ss:$0 sm:$0xff]  ;;  %s1857_s4 = smov 64  }
   0xc   :  { %394 = vrot.lane.b32.xlu1 %v393_v29, %s1856_s23  ;;  %1585 = vmatmul.mubr.msk.f32.vlgmr.msra.gmra.mrb[0].mxu1 %vm84_vm0, %v167_v28  ;;  %v1538_v43 = vld [vmem:[%s2313_s5] ss:$0 sm:$0xff] }
   0xd   :  { %1602 = vmatpush1.bf16.msra.mxu0 %v1970_v23  ;;  %1614 = vmatpush1.bf16.msra.mxu1 %v1942_v13 }
   0xe   :  { %1604 = vmatprep.subr.bf16.mxu0 %v1973_v25  ;;  %1616 = vmatprep.subr.bf16.mxu1 %v1948_v15 }
   0xf   :  { %499 = vmatprep.mubr.f32.mxu1 %v1855_v3 }
  0x10   :  { %365 = vrot.lane.b32.xlu1 %v275_v33, %s1856_s23 }
  0x11   :  { %1606 = vmatpush1.bf16.msra.mxu0 %v1995_v32  ;;  %1618 = vmatpush1.bf16.msra.mxu1 %v1970_v23 }
  0x12   :  { %1608 = vmatprep.subr.bf16.mxu0 %v1999_v34  ;;  %1620 = vmatprep.subr.bf16.mxu1 %v1973_v25 }
  0x15   :  { %1610 = vmatpush1.bf16.msra.mxu0 %v2012_v37  ;;  %1622 = vmatpush1.bf16.msra.mxu1 %v1995_v32 }
  0x16   :  { %1628 = vmatprep.subr.bf16.mxu0 %v1925_v7  ;;  %1624 = vmatprep.subr.bf16.mxu1 %v1999_v34 }
  0x18   :  { %1541 = vmatmul.mubr.msk.f32.vlgmr.msra.gmra.mrb[2].mxu0 %vm277_vm3, %v274_v38 }
  0x19   :  { %1630 = vmatpush1.bf16.msra.mxu0 %v1942_v13  ;;  %653 = vmatprep.mubr.f32.mxu0 %v1855_v3 }
  0x1a   :  { %1626 = vmatpush1.bf16.msra.mxu1 %v2012_v37  ;;  %1632 = vmatprep.subr.bf16.mxu0 %v1948_v15 }
  0x1b   :  { %1644 = vmatprep.subr.bf16.mxu1 %v1925_v7 }
  0x1d   :  { %1634 = vmatpush1.bf16.msra.mxu0 %v1970_v23 }
  0x1e   :  { %1636 = vmatprep.subr.bf16.mxu0 %v1973_v25 }
  0x21   :  { %1638 = vmatpush1.bf16.msra.mxu0 %v1995_v32 }
  0x22   :  { %1640 = vmatprep.subr.bf16.mxu0 %v1999_v34 }
  0x25   :  { %1642 = vmatpush1.bf16.msra.mxu0 %v2012_v37 }
  0x26   :  { %1660 = vmatprep.subr.bf16.mxu0 %v1925_v7 }
  0x7e   :  { %v395_v5 = vpop.permute.xlu1 %394 }
  0x82   :  { %v366_v8 = vpop.permute.xlu1 %365 }
  0xdb   :  { %v1579_v40 = vpop.f32.mrb[0].mxu0 }
  0xdc   :  { %v2036_v41 = vadd.f32 %v1579_v40, %v1535_v39  ;;  %v157_v42 = vpop.f32.mrb[1].mxu0 }
  0xdd   :  { %v2045_v51 = vadd.f32 %v1535_v39, %v157_v42 }
  0xdf   :  { %v1586_v44 = vpop.f32.mrb[0].mxu1 }
  0xe0   :  { %v249_v45 = vpop.f32.mrb[1].mxu1  ;;  %v2043_v47 = vadd.f32 %v1586_v44, %v1538_v43 }
  0xe1   :  { %v2041_v46 = vadd.f32 %v1538_v43, %v249_v45 }
  0xeb   :  { %v347_v48 = vpop.f32.mrb[2].mxu0 }
  0xec   :  { %v349_v49 = vpop.f32.mrb[3].mxu0  ;;  %v352_v53 = vadd.f32 %v347_v48, %v2045_v51 }
  0xed   :  { %v354_v50 = vrot.slane %v349_v49, 2 }
  0xee   :  { %v1542_v57 = vmul.f32 -1.442695, %v352_v53 }
  0xef   :  { %v356_v52 = vadd.f32 %v354_v50, %v2043_v47 }
  0xf1   :  { %1727 = vtanh.f32 %v356_v52  ;;  %v1543_v56 = vmul.f32 -1.442695, %v356_v52 }
  0xf2   :  { %1729 = vtanh.f32 %v352_v53 }
  0xf3   :  { %1731 = vpow2.f32 %v1543_v56 }
  0xf4   :  { %1733 = vpow2.f32 %v1542_v57 }
  0xfb   :  { %v1728_v54 = vpop.eup %1727 }
  0xfc   :  { %399 = vrot.lane.b32.xlu0 %v1728_v54, %s1857_s4  ;;  %v1730_v55 = vpop.eup %1729 }
  0xfd   :  { %v1732_v58 = vpop.eup %1731 }
  0xfe   :  { %v388_v59 = vadd.f32 1.0, %v1732_v58  ;;  %v1734_v60 = vpop.eup %1733 }
  0xff   :  { %v360_v61 = vadd.f32 1.0, %v1734_v60 }
 0x100   :  { %370 = vrot.lane.b32.xlu0 %v1730_v55, %s1857_s4  ;;  %1735 = vrcp.f32 %v388_v59 }
 0x101   :  { %1737 = vrcp.f32 %v360_v61 }
 0x10a   :  { %v1736_v62 = vpop.eup %1735 }
 0x10b   :  { %v1738_v1 = vpop.eup %1737  ;;  %v397_v6 = vmul.f32 %v1736_v62, %v395_v5 }
 0x10c   :  { %v368_v11 = vmul.f32 %v1738_v1, %v366_v8 }
 0x16e   :  { %v400_v63 = vpop.permute.xlu0 %399 }
 0x16f   :  { %v402_v0 = vmul.f32 %v1736_v62, %v400_v63 }
 0x171   :  { %404 = vrot.lane.b32.xlu0 %v402_v0, %s1856_s23 }
 0x172   :  { %v371_v2 = vpop.permute.xlu0 %370 }
 0x173   :  { %v373_v4 = vmul.f32 %v1738_v1, %v371_v2 }
 0x175   :  { %375 = vrot.lane.b32.xlu1 %v373_v4, %s1856_s23 }
 0x1e3   :  { %v405_v9 = vpop.permute.xlu0 %404 }
 0x1e4   :  { %v2053_v10 = vadd.f32 %v405_v9, %v397_v6 }
 0x1e6   :  { %1739 = vtanh.f32 %v2053_v10  ;;  %v549_v56 = vrot.slane %v2053_v10, 2 }
 0x1e7   :  { %v376_v12 = vpop.permute.xlu1 %375 }
 0x1e8   :  { %v378_v14 = vadd.f32 %v376_v12, %v368_v11 }
 0x1ea   :  { %1741 = vtanh.f32 %v378_v14  ;;  %v522_v55 = vrot.slane %v378_v14, 6 }
 0x1f0   :  { %v1740_v16 = vpop.eup %1739 }
 0x1f1   :  { %410 = vrot.lane.b32.xlu0 %v1740_v16, %s1857_s4 }
 0x1f4   :  { %v1742_v17 = vpop.eup %1741 }
 0x1f5   :  { %381 = vrot.lane.b32.xlu1 %v1742_v17, %s1857_s4 }
 0x263   :  { %v411_v18 = vpop.permute.xlu0 %410 }
 0x264   :  { %v2058_v19 = vmul.f32 %v1736_v62, %v411_v18 }
 0x266   :  { %v426_v20 = vrot.slane %v2058_v19, 6 }
 0x267   :  { %v382_v21 = vpop.permute.xlu1 %381 }
 0x268   :  { %v384_v22 = vmul.f32 %v1738_v1, %v382_v21  ;;  %427 = vrot.lane.b32.xlu1 %v426_v20, %s1857_s4 }
 0x26a   :  { %415 = vrot.lane.b32.xlu0 %v384_v22, %s1856_s23 }
 0x2da   :  { %v428_v24 = vpop.permute.xlu1 %427 }
 0x2dc   :  { %v416_v26 = vpop.permute.xlu0 %415 }
 0x2dd   :  { %419 = vst.msk [vmem:[%s2314_s7] sm:$0x3] %vm70_vm2, %v416_v26  ;;  %v431_v27 = vsel %vm430_vm4, %v416_v26, %v428_v24 }
 0x2de   :  { %1544 = vmatmul.mubr.msk.f32.vlgmr.msra.gmra.mrb[2].mxu1 %vm277_vm3, %v431_v27 }
 0x2df   :  { %1646 = vmatpush1.bf16.msra.mxu1 %v1942_v13  ;;  %805 = vmatprep.mubr.f32.mxu1 %v1855_v3 }
 0x2e0   :  { %1648 = vmatprep.subr.bf16.mxu1 %v1948_v15 }
 0x2e3   :  { %1650 = vmatpush1.bf16.msra.mxu1 %v1970_v23 }
 0x2e4   :  { %1652 = vmatprep.subr.bf16.mxu1 %v1973_v25 }
 0x2e7   :  { %1654 = vmatpush1.bf16.msra.mxu1 %v1995_v32 }
 0x2e8   :  { %1656 = vmatprep.subr.bf16.mxu1 %v1999_v34 }
 0x2eb   :  { %1658 = vmatpush1.bf16.msra.mxu1 %v2012_v37 }
 0x2ec   :  { %1676 = vmatprep.subr.bf16.mxu1 %v1925_v7 }
 0x3b1   :  { %v501_v28 = vpop.f32.mrb[2].mxu1 }
 0x3b2   :  { %v507_v29 = vrot.slane %v501_v28, 6  ;;  %v503_v30 = vpop.f32.mrb[3].mxu1 }
 0x3b3   :  { %v511_v31 = vrot.slane %v503_v30, 4 }
 0x3b4   :  { %v509_v33 = vadd.f32 %v507_v29, %v2045_v51 }
 0x3b5   :  { %v513_v35 = vadd.f32 %v511_v31, %v2043_v47 }
 0x3b6   :  { %1743 = vtanh.f32 %v509_v33  ;;  %v1545_v39 = vmul.f32 -1.442695, %v509_v33 }
 0x3b7   :  { %1745 = vtanh.f32 %v513_v35  ;;  %v1546_v40 = vmul.f32 -1.442695, %v513_v35 }
 0x3b8   :  { %1747 = vpow2.f32 %v1545_v39 }
 0x3b9   :  { %1749 = vpow2.f32 %v1546_v40 }
 0x3c0   :  { %v1744_v36 = vpop.eup %1743 }
 0x3c1   :  { %v1746_v38 = vpop.eup %1745  ;;  %526 = vrot.lane.b32.xlu1 %v1744_v36, %s1857_s4 }
 0x3c2   :  { %553 = vrot.lane.b32.xlu0 %v1746_v38, %s1857_s4  ;;  %v1748_v42 = vpop.eup %1747 }
 0x3c3   :  { %v1750_v43 = vpop.eup %1749  ;;  %v517_v44 = vadd.f32 1.0, %v1748_v42 }
 0x3c4   :  { %v544_v45 = vadd.f32 1.0, %v1750_v43 }
 0x3c5   :  { %1751 = vrcp.f32 %v517_v44 }
 0x3c6   :  { %1753 = vrcp.f32 %v544_v45 }
 0x3cf   :  { %v1752_v48 = vpop.eup %1751 }
 0x3d0   :  { %v1754_v50 = vpop.eup %1753  ;;  %v524_v57 = vmul.f32 %v1752_v48, %v522_v55 }
 0x3d1   :  { %v551_v59 = vmul.f32 %v1754_v50, %v549_v56 }
 0x433   :  { %v527_v49 = vpop.permute.xlu1 %526 }
 0x434   :  { %v529_v52 = vmul.f32 %v1752_v48, %v527_v49  ;;  %v554_v53 = vpop.permute.xlu0 %553 }
 0x435   :  { %v556_v54 = vmul.f32 %v1754_v50, %v554_v53 }
 0x436   :  { %531 = vrot.lane.b32.xlu1 %v529_v52, %s1856_s23 }
 0x437   :  { %558 = vrot.lane.b32.xlu0 %v556_v54, %s1856_s23 }
 0x4a8   :  { %v532_v58 = vpop.permute.xlu1 %531 }
 0x4a9   :  { %v2085_v60 = vadd.f32 %v532_v58, %v524_v57  ;;  %v559_v61 = vpop.permute.xlu0 %558 }
 0x4aa   :  { %v2087_v62 = vadd.f32 %v559_v61, %v551_v59 }
 0x4ab   :  { %1755 = vtanh.f32 %v2085_v60  ;;  %v676_v40 = vrot.slane %v2085_v60, 6 }
 0x4ac   :  { %1757 = vtanh.f32 %v2087_v62  ;;  %v703_v42 = vrot.slane %v2087_v62, 2 }
 0x4b5   :  { %v1756_v63 = vpop.eup %1755 }
 0x4b6   :  { %v1758_v0 = vpop.eup %1757  ;;  %537 = vrot.lane.b32.xlu1 %v1756_v63, %s1857_s4 }
 0x4b7   :  { %564 = vrot.lane.b32.xlu0 %v1758_v0, %s1857_s4 }
 0x528   :  { %v538_v1 = vpop.permute.xlu1 %537 }
 0x529   :  { %v540_v2 = vmul.f32 %v1752_v48, %v538_v1  ;;  %v565_v4 = vpop.permute.xlu0 %564 }
 0x52a   :  { %v2093_v5 = vmul.f32 %v1754_v50, %v565_v4 }
 0x52b   :  { %569 = vrot.lane.b32.xlu0 %v540_v2, %s1856_s23 }
 0x52c   :  { %v580_v6 = vrot.slane %v2093_v5, 2 }
 0x52e   :  { %581 = vrot.lane.b32.xlu1 %v580_v6, %s1857_s4 }
 0x59d   :  { %v570_v8 = vpop.permute.xlu0 %569 }
 0x59e   :  { %573 = vst.msk [vmem:[%s2314_s7] sm:$0xc] %vm572_vm5, %v570_v8 }
 0x5a0   :  { %v582_v9 = vpop.permute.xlu1 %581 }
 0x5a1   :  { %v584_v10 = vsel %vm430_vm4, %v570_v8, %v582_v9 }
 0x5a2   :  { %v586_v11 = vrot.slane %v584_v10, 2 }
 0x5a4   :  { %1547 = vmatmul.mubr.msk.f32.vlgmr.msra.gmra.mrb[4].mxu0 %vm277_vm3, %v586_v11 }
 0x5a5   :  { %1662 = vmatpush1.bf16.msra.mxu0 %v1942_v13  ;;  %954 = vmatprep.mubr.f32.mxu0 %v1855_v3 }
 0x5a6   :  { %1664 = vmatprep.subr.bf16.mxu0 %v1948_v15 }
 0x5a9   :  { %1666 = vmatpush1.bf16.msra.mxu0 %v1970_v23 }
 0x5aa   :  { %1668 = vmatprep.subr.bf16.mxu0 %v1973_v25 }
 0x5ad   :  { %1670 = vmatpush1.bf16.msra.mxu0 %v1995_v32 }
 0x5ae   :  { %1672 = vmatprep.subr.bf16.mxu0 %v1999_v34 }
 0x5b1   :  { %1674 = vmatpush1.bf16.msra.mxu0 %v2012_v37 }
 0x5b2   :  { %1692 = vmatprep.subr.bf16.mxu0 %v1925_v7 }
 0x677   :  { %v655_v12 = vpop.f32.mrb[4].mxu0 }
 0x678   :  { %v661_v14 = vrot.slane %v655_v12, 4  ;;  %v657_v16 = vpop.f32.mrb[5].mxu0 }
 0x679   :  { %v665_v17 = vrot.slane %v657_v16, 6 }
 0x67a   :  { %v663_v18 = vadd.f32 %v661_v14, %v2045_v51 }
 0x67b   :  { %v667_v20 = vadd.f32 %v665_v17, %v2043_v47 }
 0x67c   :  { %1759 = vtanh.f32 %v663_v18  ;;  %v1548_v24 = vmul.f32 -1.442695, %v663_v18 }
 0x67d   :  { %1761 = vtanh.f32 %v667_v20  ;;  %v1549_v26 = vmul.f32 -1.442695, %v667_v20 }
 0x67e   :  { %1763 = vpow2.f32 %v1548_v24 }
 0x67f   :  { %1765 = vpow2.f32 %v1549_v26 }
 0x686   :  { %v1760_v21 = vpop.eup %1759 }
 0x687   :  { %v1762_v22 = vpop.eup %1761  ;;  %680 = vrot.lane.b32.xlu1 %v1760_v21, %s1857_s4 }
 0x688   :  { %707 = vrot.lane.b32.xlu0 %v1762_v22, %s1857_s4  ;;  %v1764_v27 = vpop.eup %1763 }
 0x689   :  { %v1766_v28 = vpop.eup %1765  ;;  %v671_v29 = vadd.f32 1.0, %v1764_v27 }
 0x68a   :  { %v698_v30 = vadd.f32 1.0, %v1766_v28 }
 0x68b   :  { %1767 = vrcp.f32 %v671_v29 }
 0x68c   :  { %1769 = vrcp.f32 %v698_v30 }
 0x695   :  { %v1768_v31 = vpop.eup %1767 }
 0x696   :  { %v1770_v35 = vpop.eup %1769  ;;  %v678_v43 = vmul.f32 %v1768_v31, %v676_v40 }
 0x697   :  { %v705_v45 = vmul.f32 %v1770_v35, %v703_v42 }
 0x6f9   :  { %v681_v33 = vpop.permute.xlu1 %680 }
 0x6fa   :  { %v683_v36 = vmul.f32 %v1768_v31, %v681_v33  ;;  %v708_v38 = vpop.permute.xlu0 %707 }
 0x6fb   :  { %v710_v39 = vmul.f32 %v1770_v35, %v708_v38 }
 0x6fc   :  { %685 = vrot.lane.b32.xlu1 %v683_v36, %s1856_s23 }
 0x6fd   :  { %712 = vrot.lane.b32.xlu0 %v710_v39, %s1856_s23 }
 0x76e   :  { %v686_v44 = vpop.permute.xlu1 %685 }
 0x76f   :  { %v2121_v48 = vadd.f32 %v686_v44, %v678_v43  ;;  %v713_v49 = vpop.permute.xlu0 %712 }
 0x770   :  { %v715_v50 = vadd.f32 %v713_v49, %v705_v45 }
 0x771   :  { %1771 = vtanh.f32 %v2121_v48  ;;  %v825_v22 = vrot.slane %v2121_v48, 6 }
 0x772   :  { %1773 = vtanh.f32 %v715_v50  ;;  %v852_v21 = vrot.slane %v715_v50, 2 }
 0x77b   :  { %v1772_v52 = vpop.eup %1771 }
 0x77c   :  { %v1774_v53 = vpop.eup %1773  ;;  %691 = vrot.lane.b32.xlu1 %v1772_v52, %s1857_s4 }
 0x77d   :  { %718 = vrot.lane.b32.xlu0 %v1774_v53, %s1857_s4 }
 0x7ee   :  { %v692_v54 = vpop.permute.xlu1 %691 }
 0x7ef   :  { %v694_v55 = vmul.f32 %v1768_v31, %v692_v54  ;;  %v719_v56 = vpop.permute.xlu0 %718 }
 0x7f0   :  { %v2126_v57 = vmul.f32 %v1770_v35, %v719_v56 }
 0x7f1   :  { %723 = vrot.lane.b32.xlu0 %v694_v55, %s1856_s23 }
 0x7f2   :  { %v732_v58 = vrot.slane %v2126_v57, 6 }
 0x7f4   :  { %733 = vrot.lane.b32.xlu1 %v732_v58, %s1857_s4 }
 0x863   :  { %v724_v59 = vpop.permute.xlu0 %723 }
 0x864   :  { %726 = vst.msk [vmem:[%s2314_s7] sm:$0x30] %vm578_vm6, %v724_v59 }
 0x866   :  { %v734_v60 = vpop.permute.xlu1 %733 }
 0x867   :  { %v736_v61 = vsel %vm430_vm4, %v724_v59, %v734_v60 }
 0x868   :  { %v738_v62 = vrot.slane %v736_v61, 4 }
 0x86a   :  { %1550 = vmatmul.mubr.msk.f32.vlgmr.msra.gmra.mrb[4].mxu1 %vm277_vm3, %v738_v62 }
 0x86b   :  { %1678 = vmatpush1.bf16.msra.mxu1 %v1942_v13  ;;  %1102 = vmatprep.mubr.f32.mxu1 %v1855_v3 }
 0x86c   :  { %1680 = vmatprep.subr.bf16.mxu1 %v1948_v15 }
 0x86f   :  { %1682 = vmatpush1.bf16.msra.mxu1 %v1970_v23 }
 0x870   :  { %1684 = vmatprep.subr.bf16.mxu1 %v1973_v25 }
 0x873   :  { %1686 = vmatpush1.bf16.msra.mxu1 %v1995_v32 }
 0x874   :  { %1688 = vmatprep.subr.bf16.mxu1 %v1999_v34 }
 0x877   :  { %1690 = vmatpush1.bf16.msra.mxu1 %v2012_v37 }
 0x878   :  { %1708 = vmatprep.subr.bf16.mxu1 %v1925_v7 }
 0x93d   :  { %v807_v63 = vpop.f32.mrb[4].mxu1 }
 0x93e   :  { %v813_v0 = vrot.slane %v807_v63, 2  ;;  %v809_v1 = vpop.f32.mrb[5].mxu1 }
 0x93f   :  { %v816_v2 = vadd.f32 %v809_v1, %v2043_v47 }
 0x940   :  { %v815_v4 = vadd.f32 %v813_v0, %v2045_v51 }
 0x941   :  { %1775 = vtanh.f32 %v816_v2  ;;  %v1552_v9 = vmul.f32 -1.442695, %v816_v2 }
 0x942   :  { %1777 = vtanh.f32 %v815_v4  ;;  %v1551_v10 = vmul.f32 -1.442695, %v815_v4 }
 0x943   :  { %1779 = vpow2.f32 %v1552_v9 }
 0x944   :  { %1781 = vpow2.f32 %v1551_v10 }
 0x94b   :  { %v1776_v6 = vpop.eup %1775 }
 0x94c   :  { %v1778_v8 = vpop.eup %1777  ;;  %856 = vrot.lane.b32.xlu0 %v1776_v6, %s1857_s4 }
 0x94d   :  { %829 = vrot.lane.b32.xlu1 %v1778_v8, %s1857_s4  ;;  %v1780_v7 = vpop.eup %1779 }
 0x94e   :  { %v1782_v11 = vpop.eup %1781  ;;  %v847_v12 = vadd.f32 1.0, %v1780_v7 }
 0x94f   :  { %v820_v14 = vadd.f32 1.0, %v1782_v11 }
 0x950   :  { %1783 = vrcp.f32 %v847_v12 }
 0x951   :  { %1785 = vrcp.f32 %v820_v14 }
 0x95a   :  { %v1784_v47 = vpop.eup %1783 }
 0x95b   :  { %v1786_v16 = vpop.eup %1785  ;;  %v854_v24 = vmul.f32 %v1784_v47, %v852_v21 }
 0x95c   :  { %v827_v27 = vmul.f32 %v1786_v16, %v825_v22 }
 0x9be   :  { %v857_v51 = vpop.permute.xlu0 %856 }
 0x9bf   :  { %v859_v17 = vmul.f32 %v1784_v47, %v857_v51  ;;  %v830_v18 = vpop.permute.xlu1 %829 }
 0x9c0   :  { %v832_v20 = vmul.f32 %v1786_v16, %v830_v18 }
 0x9c1   :  { %861 = vrot.lane.b32.xlu0 %v859_v17, %s1856_s23 }
 0x9c2   :  { %834 = vrot.lane.b32.xlu1 %v832_v20, %s1856_s23 }
 0xa33   :  { %v862_v26 = vpop.permute.xlu0 %861 }
 0xa34   :  { %v2153_v28 = vadd.f32 %v862_v26, %v854_v24  ;;  %v835_v29 = vpop.permute.xlu1 %834 }
 0xa35   :  { %v837_v30 = vadd.f32 %v835_v29, %v827_v27 }
 0xa36   :  { %1787 = vtanh.f32 %v2153_v28  ;;  %v1001_v10 = vrot.slane %v2153_v28, 2 }
 0xa37   :  { %1789 = vtanh.f32 %v837_v30  ;;  %v974_v8 = vrot.slane %v837_v30, 6 }
 0xa40   :  { %v1788_v31 = vpop.eup %1787 }
 0xa41   :  { %v1790_v33 = vpop.eup %1789  ;;  %867 = vrot.lane.b32.xlu0 %v1788_v31, %s1857_s4 }
 0xa42   :  { %840 = vrot.lane.b32.xlu1 %v1790_v33, %s1857_s4 }
 0xab3   :  { %v868_v35 = vpop.permute.xlu0 %867 }
 0xab4   :  { %v2158_v36 = vmul.f32 %v1784_v47, %v868_v35  ;;  %v841_v38 = vpop.permute.xlu1 %840 }
 0xab5   :  { %v843_v39 = vmul.f32 %v1786_v16, %v841_v38 }
 0xab6   :  { %v881_v40 = vrot.slane %v2158_v36, 2 }
 0xab7   :  { %872 = vrot.lane.b32.xlu0 %v843_v39, %s1856_s23 }
 0xab8   :  { %882 = vrot.lane.b32.xlu1 %v881_v40, %s1857_s4 }
 0xb29   :  { %v873_v42 = vpop.permute.xlu0 %872 }
 0xb2a   :  { %875 = vst.msk [vmem:[%s2314_s7] sm:$0xc0] %vm424_vm7, %v873_v42  ;;  %v883_v43 = vpop.permute.xlu1 %882 }
 0xb2b   :  { %v885_v44 = vsel %vm430_vm4, %v873_v42, %v883_v43 }
 0xb2c   :  { %v887_v45 = vrot.slane %v885_v44, 6 }
 0xb2e   :  { %1553 = vmatmul.mubr.msk.f32.vlgmr.msra.gmra.mrb[6].mxu0 %vm277_vm3, %v887_v45 }
 0xb2f   :  { %1694 = vmatpush1.bf16.msra.mxu0 %v1942_v13  ;;  %1254 = vmatprep.mubr.f32.mxu0 %v1855_v3 }
 0xb30   :  { %1696 = vmatprep.subr.bf16.mxu0 %v1948_v15 }
 0xb33   :  { %1698 = vmatpush1.bf16.msra.mxu0 %v1970_v23 }
 0xb34   :  { %1700 = vmatprep.subr.bf16.mxu0 %v1973_v25 }
 0xb37   :  { %1702 = vmatpush1.bf16.msra.mxu0 %v1995_v32 }
 0xb38   :  { %1704 = vmatprep.subr.bf16.mxu0 %v1999_v34 }
 0xb3b   :  { %1706 = vmatpush1.bf16.msra.mxu0 %v2012_v37 }
 0xc01   :  { %v956_v48 = vpop.f32.mrb[6].mxu0 }
 0xc02   :  { %v961_v49 = vadd.f32 %v956_v48, %v2036_v41  ;;  %v958_v50 = vpop.f32.mrb[7].mxu0 }
 0xc03   :  { %v963_v52 = vrot.slane %v958_v50, 2 }
 0xc04   :  { %1791 = vtanh.f32 %v961_v49  ;;  %v1554_v56 = vmul.f32 -1.442695, %v961_v49 }
 0xc05   :  { %v965_v53 = vadd.f32 %v963_v52, %v2041_v46 }
 0xc07   :  { %1793 = vtanh.f32 %v965_v53  ;;  %v1555_v58 = vmul.f32 -1.442695, %v965_v53 }
 0xc08   :  { %1795 = vpow2.f32 %v1554_v56 }
 0xc09   :  { %1797 = vpow2.f32 %v1555_v58 }
 0xc0e   :  { %v1792_v54 = vpop.eup %1791 }
 0xc0f   :  { %978 = vrot.lane.b32.xlu1 %v1792_v54, %s1857_s4 }
 0xc11   :  { %v1794_v55 = vpop.eup %1793 }
 0xc12   :  { %1005 = vrot.lane.b32.xlu0 %v1794_v55, %s1857_s4  ;;  %v1796_v59 = vpop.eup %1795 }
 0xc13   :  { %v1798_v60 = vpop.eup %1797  ;;  %v969_v61 = vadd.f32 1.0, %v1796_v59 }
 0xc14   :  { %v996_v62 = vadd.f32 1.0, %v1798_v60 }
 0xc15   :  { %1799 = vrcp.f32 %v969_v61 }
 0xc16   :  { %1801 = vrcp.f32 %v996_v62 }
 0xc1f   :  { %v1800_v63 = vpop.eup %1799 }
 0xc20   :  { %v1802_v2 = vpop.eup %1801  ;;  %v976_v9 = vmul.f32 %v1800_v63, %v974_v8 }
 0xc21   :  { %v1003_v12 = vmul.f32 %v1802_v2, %v1001_v10 }
 0xc81   :  { %v979_v0 = vpop.permute.xlu1 %978 }
 0xc82   :  { %v981_v1 = vmul.f32 %v1800_v63, %v979_v0 }
 0xc84   :  { %983 = vrot.lane.b32.xlu1 %v981_v1, %s1856_s23  ;;  %v1006_v4 = vpop.permute.xlu0 %1005 }
 0xc85   :  { %v1008_v6 = vmul.f32 %v1802_v2, %v1006_v4 }
 0xc87   :  { %1010 = vrot.lane.b32.xlu0 %v1008_v6, %s1856_s23 }
 0xcf6   :  { %v984_v7 = vpop.permute.xlu1 %983 }
 0xcf7   :  { %v2184_v11 = vadd.f32 %v984_v7, %v976_v9 }
 0xcf9   :  { %1803 = vtanh.f32 %v2184_v11  ;;  %v1011_v14 = vpop.permute.xlu0 %1010  ;;  %v1125_v45 = vrot.slane %v2184_v11, 6 }
 0xcfa   :  { %v1013_v47 = vadd.f32 %v1011_v14, %v1003_v12 }
 0xcfc   :  { %1805 = vtanh.f32 %v1013_v47  ;;  %v1152_v48 = vrot.slane %v1013_v47, 2 }
 0xd03   :  { %v1804_v51 = vpop.eup %1803 }
 0xd04   :  { %989 = vrot.lane.b32.xlu1 %v1804_v51, %s1857_s4 }
 0xd06   :  { %v1806_v16 = vpop.eup %1805 }
 0xd07   :  { %1016 = vrot.lane.b32.xlu0 %v1806_v16, %s1857_s4 }
 0xd76   :  { %v990_v17 = vpop.permute.xlu1 %989 }
 0xd77   :  { %v992_v18 = vmul.f32 %v1800_v63, %v990_v17 }
 0xd79   :  { %1021 = vrot.lane.b32.xlu0 %v992_v18, %s1856_s23  ;;  %v1017_v20 = vpop.permute.xlu0 %1016 }
 0xd7a   :  { %v2190_v21 = vmul.f32 %v1802_v2, %v1017_v20 }
 0xd7c   :  { %v1030_v22 = vrot.slane %v2190_v21, 6 }
 0xd7e   :  { %1031 = vrot.lane.b32.xlu1 %v1030_v22, %s1857_s4 }
 0xdeb   :  { %v1022_v24 = vpop.permute.xlu0 %1021 }
 0xdec   :  { %1024 = vst.msk [vmem:[%s2314_s7 + $0x8] sm:$0x3] %vm70_vm2, %v1022_v24 }
 0xdf0   :  { %v1032_v26 = vpop.permute.xlu1 %1031 }
 0xdf1   :  { %v1034_v27 = vsel %vm430_vm4, %v1022_v24, %v1032_v26 }
 0xdf2   :  { %1556 = vmatmul.mubr.msk.f32.vlgmr.msra.gmra.mrb[6].mxu1 %vm277_vm3, %v1034_v27 }
 0xdf3   :  { %1710 = vmatpush1.bf16.msra.mxu1 %v1942_v13  ;;  %1406 = vmatprep.mubr.f32.mxu1 %v1855_v3 }
 0xdf4   :  { %1712 = vmatprep.subr.bf16.mxu1 %v1948_v15 }
 0xdf7   :  { %1714 = vmatpush1.bf16.msra.mxu1 %v1970_v23 }
 0xdf8   :  { %1716 = vmatprep.subr.bf16.mxu1 %v1973_v25 }
 0xdfb   :  { %1718 = vmatpush1.bf16.msra.mxu1 %v1995_v32 }
 0xdfc   :  { %1720 = vmatprep.subr.bf16.mxu1 %v1999_v34 }
 0xdff   :  { %1722 = vmatpush1.bf16.msra.mxu1 %v2012_v37 }
 0xec5   :  { %v1104_v28 = vpop.f32.mrb[6].mxu1 }
 0xec6   :  { %v1110_v29 = vrot.slane %v1104_v28, 6  ;;  %v1106_v30 = vpop.f32.mrb[7].mxu1 }
 0xec7   :  { %v1114_v31 = vrot.slane %v1106_v30, 4 }
 0xec8   :  { %v1112_v13 = vadd.f32 %v1110_v29, %v2036_v41 }
 0xec9   :  { %v1116_v3 = vadd.f32 %v1114_v31, %v2041_v46 }
 0xeca   :  { %1807 = vtanh.f32 %v1112_v13  ;;  %v1557_v25 = vmul.f32 -1.442695, %v1112_v13 }
 0xecb   :  { %1809 = vtanh.f32 %v1116_v3  ;;  %v1558_v32 = vmul.f32 -1.442695, %v1116_v3 }
 0xecc   :  { %1811 = vpow2.f32 %v1557_v25 }
 0xecd   :  { %1813 = vpow2.f32 %v1558_v32 }
 0xed4   :  { %v1808_v15 = vpop.eup %1807 }
 0xed5   :  { %v1810_v23 = vpop.eup %1809  ;;  %1129 = vrot.lane.b32.xlu1 %v1808_v15, %s1857_s4 }
 0xed6   :  { %1156 = vrot.lane.b32.xlu0 %v1810_v23, %s1857_s4  ;;  %v1812_v34 = vpop.eup %1811 }
 0xed7   :  { %v1814_v37 = vpop.eup %1813  ;;  %v1120_v33 = vadd.f32 1.0, %v1812_v34 }
 0xed8   :  { %v1147_v35 = vadd.f32 1.0, %v1814_v37 }
 0xed9   :  { %1815 = vrcp.f32 %v1120_v33 }
 0xeda   :  { %1817 = vrcp.f32 %v1147_v35 }
 0xee3   :  { %v1816_v38 = vpop.eup %1815 }
 0xee4   :  { %v1818_v40 = vpop.eup %1817  ;;  %v1127_v49 = vmul.f32 %v1816_v38, %v1125_v45 }
 0xee5   :  { %v1154_v52 = vmul.f32 %v1818_v40, %v1152_v48 }
 0xf47   :  { %v1130_v39 = vpop.permute.xlu1 %1129 }
 0xf48   :  { %v1132_v42 = vmul.f32 %v1816_v38, %v1130_v39  ;;  %v1157_v43 = vpop.permute.xlu0 %1156 }
 0xf49   :  { %v1159_v44 = vmul.f32 %v1818_v40, %v1157_v43 }
 0xf4a   :  { %1134 = vrot.lane.b32.xlu1 %v1132_v42, %s1856_s23 }
 0xf4b   :  { %1161 = vrot.lane.b32.xlu0 %v1159_v44, %s1856_s23 }
 0xfbc   :  { %v1135_v50 = vpop.permute.xlu1 %1134 }
 0xfbd   :  { %v1137_v53 = vadd.f32 %v1135_v50, %v1127_v49  ;;  %v1162_v54 = vpop.permute.xlu0 %1161 }
 0xfbe   :  { %v1164_v55 = vadd.f32 %v1162_v54, %v1154_v52 }
 0xfbf   :  { %1819 = vtanh.f32 %v1137_v53  ;;  %v1277_v30 = vrot.slane %v1137_v53, 6 }
 0xfc0   :  { %1821 = vtanh.f32 %v1164_v55  ;;  %v1304_v31 = vrot.slane %v1164_v55, 2 }
 0xfc9   :  { %v1820_v56 = vpop.eup %1819 }
 0xfca   :  { %v1822_v58 = vpop.eup %1821  ;;  %1140 = vrot.lane.b32.xlu1 %v1820_v56, %s1857_s4 }
 0xfcb   :  { %1167 = vrot.lane.b32.xlu0 %v1822_v58, %s1857_s4 }
0x103c   :  { %v1141_v59 = vpop.permute.xlu1 %1140 }
0x103d   :  { %v1143_v60 = vmul.f32 %v1816_v38, %v1141_v59  ;;  %v1168_v61 = vpop.permute.xlu0 %1167 }
0x103e   :  { %v2217_v62 = vmul.f32 %v1818_v40, %v1168_v61 }
0x103f   :  { %1172 = vrot.lane.b32.xlu0 %v1143_v60, %s1856_s23 }
0x1040   :  { %v1181_v63 = vrot.slane %v2217_v62, 2 }
0x1042   :  { %1182 = vrot.lane.b32.xlu1 %v1181_v63, %s1857_s4 }
0x10b1   :  { %v1173_v0 = vpop.permute.xlu0 %1172 }
0x10b2   :  { %1175 = vst.msk [vmem:[%s2314_s7 + $0x8] sm:$0xc] %vm572_vm5, %v1173_v0 }
0x10b4   :  { %v1183_v1 = vpop.permute.xlu1 %1182 }
0x10b5   :  { %v1185_v2 = vsel %vm430_vm4, %v1173_v0, %v1183_v1 }
0x10b6   :  { %v1187_v4 = vrot.slane %v1185_v2, 2 }
0x10b8   :  { %1559 = vmatmul.mubr.msk.f32.vlgmr.msra.gmra.mrb[8].mxu0 %vm277_vm3, %v1187_v4 }
0x118b   :  { %v1256_v6 = vpop.f32.mrb[8].mxu0 }
0x118c   :  { %v1262_v8 = vrot.slane %v1256_v6, 4  ;;  %v1258_v9 = vpop.f32.mrb[9].mxu0 }
0x118d   :  { %v1266_v10 = vrot.slane %v1258_v9, 6 }
0x118e   :  { %v1264_v7 = vadd.f32 %v1262_v8, %v2036_v41 }
0x118f   :  { %v1268_v11 = vadd.f32 %v1266_v10, %v2041_v46 }
0x1190   :  { %1823 = vtanh.f32 %v1264_v7  ;;  %v1560_v47 = vmul.f32 -1.442695, %v1264_v7 }
0x1191   :  { %1825 = vtanh.f32 %v1268_v11  ;;  %v1561_v51 = vmul.f32 -1.442695, %v1268_v11 }
0x1192   :  { %1827 = vpow2.f32 %v1560_v47 }
0x1193   :  { %1829 = vpow2.f32 %v1561_v51 }
0x119a   :  { %v1824_v12 = vpop.eup %1823 }
0x119b   :  { %v1826_v14 = vpop.eup %1825  ;;  %1281 = vrot.lane.b32.xlu1 %v1824_v12, %s1857_s4 }
0x119c   :  { %1308 = vrot.lane.b32.xlu0 %v1826_v14, %s1857_s4  ;;  %v1828_v16 = vpop.eup %1827 }
0x119d   :  { %v1830_v17 = vpop.eup %1829  ;;  %v1272_v18 = vadd.f32 1.0, %v1828_v16 }
0x119e   :  { %v1299_v20 = vadd.f32 1.0, %v1830_v17 }
0x119f   :  { %1831 = vrcp.f32 %v1272_v18 }
0x11a0   :  { %1833 = vrcp.f32 %v1299_v20 }
0x11a9   :  { %v1832_v22 = vpop.eup %1831 }
0x11aa   :  { %v1834_v26 = vpop.eup %1833  ;;  %v1279_v13 = vmul.f32 %v1832_v22, %v1277_v30 }
0x11ab   :  { %v1306_v15 = vmul.f32 %v1834_v26, %v1304_v31 }
0x120d   :  { %v1282_v24 = vpop.permute.xlu1 %1281 }
0x120e   :  { %v1284_v27 = vmul.f32 %v1832_v22, %v1282_v24  ;;  %v1309_v28 = vpop.permute.xlu0 %1308 }
0x120f   :  { %v1311_v29 = vmul.f32 %v1834_v26, %v1309_v28 }
0x1210   :  { %1286 = vrot.lane.b32.xlu1 %v1284_v27, %s1856_s23 }
0x1211   :  { %1313 = vrot.lane.b32.xlu0 %v1311_v29, %s1856_s23 }
0x1282   :  { %v1287_v3 = vpop.permute.xlu1 %1286 }
0x1283   :  { %v1289_v23 = vadd.f32 %v1287_v3, %v1279_v13  ;;  %v1314_v25 = vpop.permute.xlu0 %1313 }
0x1284   :  { %v1316_v32 = vadd.f32 %v1314_v25, %v1306_v15 }
0x1285   :  { %1835 = vtanh.f32 %v1289_v23  ;;  %v1426_v8 = vrot.slane %v1289_v23, 6 }
0x1286   :  { %1837 = vtanh.f32 %v1316_v32  ;;  %v1453_v6 = vrot.slane %v1316_v32, 2 }
0x128f   :  { %v1836_v34 = vpop.eup %1835 }
0x1290   :  { %v1838_v37 = vpop.eup %1837  ;;  %1292 = vrot.lane.b32.xlu1 %v1836_v34, %s1857_s4 }
0x1291   :  { %1319 = vrot.lane.b32.xlu0 %v1838_v37, %s1857_s4 }
0x1302   :  { %v1293_v33 = vpop.permute.xlu1 %1292 }
0x1303   :  { %v1295_v35 = vmul.f32 %v1832_v22, %v1293_v33  ;;  %v1320_v38 = vpop.permute.xlu0 %1319 }
0x1304   :  { %v1322_v39 = vmul.f32 %v1834_v26, %v1320_v38 }
0x1305   :  { %1324 = vrot.lane.b32.xlu0 %v1295_v35, %s1856_s23 }
0x1306   :  { %v1333_v40 = vrot.slane %v1322_v39, 6 }
0x1308   :  { %1334 = vrot.lane.b32.xlu1 %v1333_v40, %s1857_s4 }
0x1377   :  { %v1325_v42 = vpop.permute.xlu0 %1324 }
0x1378   :  { %1327 = vst.msk [vmem:[%s2314_s7 + $0x8] sm:$0x30] %vm578_vm6, %v1325_v42 }
0x137a   :  { %v1335_v43 = vpop.permute.xlu1 %1334 }
0x137b   :  { %v1337_v44 = vsel %vm430_vm4, %v1325_v42, %v1335_v43 }
0x137c   :  { %v1339_v45 = vrot.slane %v1337_v44, 4 }
0x137e   :  { %1562 = vmatmul.mubr.msk.f32.vlgmr.msra.gmra.mrb[8].mxu1 %vm277_vm3, %v1339_v45 }
0x1451   :  { %v1408_v48 = vpop.f32.mrb[8].mxu1 }
0x1452   :  { %v1414_v49 = vrot.slane %v1408_v48, 2  ;;  %v1410_v50 = vpop.f32.mrb[9].mxu1 }
0x1453   :  { %v1417_v52 = vadd.f32 %v1410_v50, %v2041_v46 }
0x1454   :  { %v1416_v53 = vadd.f32 %v1414_v49, %v2036_v41 }
0x1455   :  { %1839 = vtanh.f32 %v1417_v52  ;;  %v1564_v56 = vmul.f32 -1.442695, %v1417_v52 }
0x1456   :  { %1841 = vtanh.f32 %v1416_v53  ;;  %v1563_v58 = vmul.f32 -1.442695, %v1416_v53 }
0x1457   :  { %1843 = vpow2.f32 %v1564_v56 }
0x1458   :  { %1845 = vpow2.f32 %v1563_v58 }
0x145f   :  { %v1840_v54 = vpop.eup %1839 }
0x1460   :  { %v1842_v55 = vpop.eup %1841  ;;  %1457 = vrot.lane.b32.xlu0 %v1840_v54, %s1857_s4 }
0x1461   :  { %1430 = vrot.lane.b32.xlu1 %v1842_v55, %s1857_s4  ;;  %v1844_v59 = vpop.eup %1843 }
0x1462   :  { %v1846_v60 = vpop.eup %1845  ;;  %v1448_v61 = vadd.f32 1.0, %v1844_v59 }
0x1463   :  { %v1421_v63 = vadd.f32 1.0, %v1846_v60 }
0x1464   :  { %1847 = vrcp.f32 %v1448_v61 }
0x1465   :  { %1849 = vrcp.f32 %v1421_v63 }
0x146e   :  { %v1848_v46 = vpop.eup %1847 }
0x146f   :  { %v1850_v0 = vpop.eup %1849  ;;  %v1455_v9 = vmul.f32 %v1848_v46, %v1453_v6 }
0x1470   :  { %v1428_v7 = vmul.f32 %v1850_v0, %v1426_v8 }
0x14d2   :  { %v1458_v41 = vpop.permute.xlu0 %1457 }
0x14d3   :  { %v1460_v1 = vmul.f32 %v1848_v46, %v1458_v41  ;;  %v1431_v2 = vpop.permute.xlu1 %1430 }
0x14d4   :  { %v1433_v4 = vmul.f32 %v1850_v0, %v1431_v2 }
0x14d5   :  { %1462 = vrot.lane.b32.xlu0 %v1460_v1, %s1856_s23 }
0x14d6   :  { %1435 = vrot.lane.b32.xlu1 %v1433_v4, %s1856_s23 }
0x1547   :  { %v1463_v10 = vpop.permute.xlu0 %1462 }
0x1548   :  { %v1465_v11 = vadd.f32 %v1463_v10, %v1455_v9  ;;  %v1436_v12 = vpop.permute.xlu1 %1435 }
0x1549   :  { %v1438_v14 = vadd.f32 %v1436_v12, %v1428_v7 }
0x154a   :  { %1851 = vtanh.f32 %v1465_v11 }
0x154b   :  { %1853 = vtanh.f32 %v1438_v14 }
0x1554   :  { %v1852_v47 = vpop.eup %1851 }
0x1555   :  { %v1854_v51 = vpop.eup %1853  ;;  %1468 = vrot.lane.b32.xlu0 %v1852_v47, %s1857_s4 }
0x1556   :  { %1441 = vrot.lane.b32.xlu1 %v1854_v51, %s1857_s4 }
0x1559   :  { %421 = vrot.lane.b32.xlu0 %v2058_v19, %s1856_s23 }
0x155a   :  { %575 = vrot.lane.b32.xlu1 %v2093_v5, %s1856_s23 }
0x155d   :  { %728 = vrot.lane.b32.xlu0 %v2126_v57, %s1856_s23 }
0x155e   :  { %877 = vrot.lane.b32.xlu1 %v2158_v36, %s1856_s23 }
0x1561   :  { %1026 = vrot.lane.b32.xlu0 %v2190_v21, %s1856_s23 }
0x1562   :  { %1177 = vrot.lane.b32.xlu1 %v2217_v62, %s1856_s23 }
0x1565   :  { %1329 = vrot.lane.b32.xlu0 %v1322_v39, %s1856_s23 }
0x15c7   :  { %v1469_v16 = vpop.permute.xlu0 %1468 }
0x15c8   :  { %v1471_v17 = vmul.f32 %v1848_v46, %v1469_v16  ;;  %v1442_v19 = vpop.permute.xlu1 %1441 }
0x15c9   :  { %v1444_v18 = vmul.f32 %v1850_v0, %v1442_v19 }
0x15ca   :  { %1478 = vrot.lane.b32.xlu1 %v1471_v17, %s1856_s23  ;;  %v1482_v57 = vrot.slane %v1471_v17, 2 }
0x15cb   :  { %1473 = vrot.lane.b32.xlu0 %v1444_v18, %s1856_s23  ;;  %v422_v5 = vpop.permute.xlu0 %421 }
0x15cc   :  { %425 = vst.msk [vmem:[%s2315_s8 + $0x8] sm:$0xc0] %vm424_vm7, %v422_v5  ;;  %v576_v36 = vpop.permute.xlu1 %575 }
0x15cd   :  { %579 = vst.msk [vmem:[%s2315_s8 + $0x8] sm:$0x30] %vm578_vm6, %v576_v36 }
0x15ce   :  { %1483 = vrot.lane.b32.xlu1 %v1482_v57, %s1857_s4 }
0x15cf   :  { %1490 = vrot.lane.b32.xlu0 %v1438_v14, %s1858_s22  ;;  %v729_v21 = vpop.permute.xlu0 %728 }
0x15d0   :  { %731 = vst.msk [vmem:[%s2315_s8 + $0x8] sm:$0xc] %vm572_vm5, %v729_v21  ;;  %v878_v62 = vpop.permute.xlu1 %877 }
0x15d1   :  { %880 = vst.msk [vmem:[%s2315_s8 + $0x8] sm:$0x3] %vm70_vm2, %v878_v62 }
0x15d2   :  { %1495 = vrot.lane.b32.xlu1 %v1465_v11, %s1858_s22 }
0x15d3   :  { %v1027_v20 = vpop.permute.xlu0 %1026 }
0x15d4   :  { %1029 = vst.msk [vmem:[%s2315_s8] sm:$0xc0] %vm424_vm7, %v1027_v20  ;;  %v1178_v22 = vpop.permute.xlu1 %1177 }
0x15d5   :  { %1180 = vst.msk [vmem:[%s2315_s8] sm:$0x30] %vm578_vm6, %v1178_v22 }
0x15d7   :  { %v1330_v24 = vpop.permute.xlu0 %1329 }
0x15d8   :  { %1332 = vst.msk [vmem:[%s2315_s8] sm:$0xc] %vm572_vm5, %v1330_v24 }
0x163c   :  { %v1479_v26 = vpop.permute.xlu1 %1478 }
0x163d   :  { %1481 = vst.msk [vmem:[%s2315_s8] sm:$0x3] %vm70_vm2, %v1479_v26  ;;  %v1474_v27 = vpop.permute.xlu0 %1473 }
0x163e   :  { %1476 = vst.msk [vmem:[%s2314_s7 + $0x8] sm:$0xc0] %vm424_vm7, %v1474_v27 }
0x1640   :  { %v1484_v28 = vpop.permute.xlu1 %1483 }
0x1641   :  { %v1486_v29 = vsel %vm430_vm4, %v1474_v27, %v1484_v28  ;;  %v1491_v30 = vpop.permute.xlu0 %1490 }
0x1642   :  { %1488 = vst.msk [vmem:[#allocation2 - $0x6] sm:$0xc0] %vm1487_vm8, %v1486_v29 }
0x1643   :  { %1493 = vst.msk [vmem:[#allocation3 - $0x6] sm:$0xc0] %vm424_vm7, %v1491_v30 }
0x1644   :  { %v1496_v31 = vpop.permute.xlu1 %1495 }
0x1645   :  { %1498 = vst.msk [vmem:[#allocation4] sm:$0x3] %vm70_vm2, %v1496_v31 }

// kernel: birnn_forward.3
= control target key start
LH: loop header
LB: loop body
LE: loop exit
PB: predicated region body
PF: predicated region fallthrough
CT: control target
= control target key end

     0   :  { %vm113_vm0 = vcmask 261120   ;;  %vm96_vm1 = vcmask 517120   ;;  %v2344_v6 = vmov 0.0   ;;  %vm98_vm2 = vcmask 254976   ;;  %s2841_s0 = inlined_call_operand.vmem [shape: f32[16,32], index: 0, kind: input, shape index: {}, may-alias: {0,2}]   ;;  %s2842_s1 = inlined_call_operand.vmem [shape: f32[16,32], index: 1, kind: input, shape index: {}, may-alias: {1,3}]   ;;  %s2843_s2 = inlined_call_operand.vmem [shape: f32[16,32], index: 2, kind: input, shape index: {}, may-alias: {0,2}]   ;;  %s2844_s3 = inlined_call_operand.vmem [shape: f32[16,32], index: 3, kind: input, shape index: {}, may-alias: {1,3}]   ;;  %s2845_s4 = inlined_call_operand.vmem [shape: f32[32,128], index: 4, kind: input, shape index: {}]   ;;  %s2846_s5 = inlined_call_operand.vmem [shape: f32[32,128], index: 5, kind: input, shape index: {}]   ;;  %s2847_s6 = inlined_call_operand.vmem [shape: f32[32,128], index: 6, kind: input, shape index: {}]   ;;  %s2848_s7 = inlined_call_operand.vmem [shape: f32[32,128], index: 7, kind: input, shape index: {}]   ;;  %s2849_s8 = inlined_call_operand.vmem [shape: f32[1,128], index: 8, kind: input, shape index: {}]   ;;  %s2850_s9 = inlined_call_operand.vmem [shape: f32[1,128], index: 9, kind: input, shape index: {}]   ;;  %s2851_s10 = inlined_call_operand.vmem [shape: f32[64,256], index: 10, kind: input, shape index: {}]   ;;  %s2852_s11 = inlined_call_operand.vmem [shape: f32[32,10], index: 11, kind: input, shape index: {}]   ;;  %s2853_s12 = inlined_call_operand.vmem [shape: f32[32,10], index: 12, kind: input, shape index: {}]   ;;  %s2854_s13 = inlined_call_operand.vmem [shape: f32[1,10], index: 13, kind: input, shape index: {}]   ;;  %s2855_s14 = inlined_call_operand.hbm [shape: f32[2,10], index: 14, kind: output, shape index: {}]  }
   0x1   :  { %v109_v0 = vld [vmem:[%s2846_s5] sm:$0xff]  ;;  %v110_v1 = vld [vmem:[%s2846_s5 + $0x8] sm:$0xff]  ;;  %v111_v2 = vld [vmem:[%s2846_s5 + $0x10] sm:$0xff]  ;;  %97 = vst.msk [vmem:[#allocation2] sm:$0x3] %vm96_vm1, %v2344_v6 }
   0x2   :  { %v2009_v3 = vpack.c.bf16 %v110_v1, %v109_v0  ;;  %v112_v4 = vld [vmem:[%s2846_s5 + $0x18] sm:$0xff]  ;;  %v107_v5 = vld [vmem:[%s2842_s1] sm:$0xff]  ;;  %v104_v9 = vld [vmem:[%s2845_s4 + $0x8] sm:$0xff]  ;;  %100 = vst.msk [vmem:[#allocation4] sm:$0x3] %vm98_vm2, %v2344_v6 }
   0x3   :  { %v2013_v7 = vpack.c.bf16 %v112_v4, %v111_v2  ;;  %1951 = vmatprep.mubr.msk.f32.mxu0 %vm113_vm0, %v107_v5  ;;  %v103_v8 = vld [vmem:[%s2845_s4] sm:$0xff]  ;;  %99 = vst.msk [vmem:[#allocation3] sm:$0x3] %vm98_vm2, %v2344_v6  ;;  %v294_v11 = vld [vmem:[%s2848_s7 + $0x8] sm:$0xff]  ;;  %v295_v13 = vld [vmem:[%s2848_s7 + $0x10] sm:$0xff] }
   0x4   :  { %v293_v10 = vld [vmem:[%s2848_s7] sm:$0xff]  ;;  %2010 = vmatprep.subr.bf16.mxu0 %v2009_v3  ;;  %v296_v14 = vld [vmem:[%s2848_s7 + $0x18] sm:$0xff]  ;;  %v2017_v15 = vpack.c.bf16 %v104_v9, %v103_v8  ;;  %v105_v16 = vld [vmem:[%s2845_s4 + $0x10] sm:$0xff] }
   0x5   :  { %2012 = vmatpush3.bf16.msra.mxu0 %v2009_v3  ;;  %v2025_v12 = vpack.c.bf16 %v294_v11, %v293_v10  ;;  %v2029_v17 = vpack.c.bf16 %v296_v14, %v295_v13  ;;  %v291_v18 = vld [vmem:[%s2844_s3] sm:$0xff]  ;;  %v106_v19 = vld [vmem:[%s2845_s4 + $0x18] sm:$0xff]  ;;  %v288_v21 = vld [vmem:[%s2847_s6 + $0x8] sm:$0xff] }
   0x6   :  { %2014 = vmatprep.subr.bf16.mxu0 %v2013_v7  ;;  %1973 = vmatprep.mubr.msk.f32.mxu1 %vm113_vm0, %v291_v18  ;;  %v287_v20 = vld [vmem:[%s2847_s6] sm:$0xff]  ;;  %v108_v22 = vld [vmem:[%s2842_s1 + $0x8] sm:$0xff]  ;;  %v2021_v23 = vpack.c.bf16 %v106_v19, %v105_v16  ;;  %v289_v26 = vld [vmem:[%s2847_s6 + $0x10] sm:$0xff] }
   0x7   :  { %2026 = vmatprep.subr.bf16.mxu1 %v2025_v12  ;;  %v101_v24 = vld [vmem:[%s2841_s0] sm:$0xff]  ;;  %v2033_v25 = vpack.c.bf16 %v288_v21, %v287_v20  ;;  %v290_v27 = vld [vmem:[%s2847_s6 + $0x18] sm:$0xff]  ;;  %v469_v28 = vld [vmem:[%s2851_s10 + $0x8] sm:$0xff] }
   0x8   :  { %2028 = vmatpush3.bf16.msra.mxu1 %v2025_v12  ;;  %v471_v29 = vld [vmem:[%s2851_s10 + $0x18] sm:$0xff]  ;;  %v292_v30 = vld [vmem:[%s2844_s3 + $0x8] sm:$0xff]  ;;  %v2037_v31 = vpack.c.bf16 %v290_v27, %v289_v26  ;;  %v285_v32 = vld [vmem:[%s2843_s2] sm:$0xff] }
   0x9   :  { %2016 = vmatpush3.bf16.msra.mxu0 %v2013_v7  ;;  %2030 = vmatprep.subr.bf16.mxu1 %v2029_v17  ;;  %v2507_v33 = vpack.c.bf16 %v471_v29, %v469_v28  ;;  %v468_v34 = vld [vmem:[%s2851_s10] sm:$0xff]  ;;  %v470_v35 = vld [vmem:[%s2851_s10 + $0x10] sm:$0xff]  ;;  %v473_v37 = vld [vmem:[%s2851_s10 + $0x28] sm:$0xff] }
   0xa   :  { %2018 = vmatprep.subr.bf16.mxu0 %v2017_v15  ;;  %v486_v36 = vld [vmem:[#allocation4] sm:$0x3]  ;;  %v475_v38 = vld [vmem:[%s2851_s10 + $0x38] sm:$0xff] }
   0xb   :  { %v603_v39 = vrot.slane %v486_v36, 2 }
   0xc   :  { %1952 = vmatmul.mubr.msk.f32.vlgmr.msra.gmra.mrb[0].mxu0 %vm113_vm0, %v108_v22  ;;  %2032 = vmatpush3.bf16.msra.mxu1 %v2029_v17 }
   0xd   :  { %2020 = vmatpush3.bf16.msra.mxu0 %v2017_v15  ;;  %1962 = vmatprep.mubr.msk.f32.mxu0 %vm113_vm0, %v101_v24 }
   0xe   :  { %2022 = vmatprep.subr.bf16.mxu0 %v2021_v23  ;;  %2034 = vmatprep.subr.bf16.mxu1 %v2033_v25 }
   0xf   :  { %1974 = vmatmul.mubr.msk.f32.vlgmr.msra.gmra.mrb[0].mxu1 %vm113_vm0, %v292_v30 }
  0x10   :  { %19 = vsyncpa [#allocation7], 0  ;;  %2036 = vmatpush3.bf16.msra.mxu1 %v2033_v25  ;;  %1984 = vmatprep.mubr.msk.f32.mxu1 %vm113_vm0, %v285_v32  ;;  %v102_v40 = vld [vmem:[%s2841_s0 + $0x8] sm:$0xff]  ;;  %v2526_v41 = vpack.c.bf16 %v470_v35, %v468_v34  ;;  %v2529_v42 = vpack.c.bf16 %v475_v38, %v473_v37  ;;  %v472_v43 = vld [vmem:[%s2851_s10 + $0x20] sm:$0xff]  ;;  %s2345_s17 = smov 32   ;;  %vm487_vm3 = vcmask 523264  }
  0x11   :  { %2024 = vmatpush3.bf16.msra.mxu0 %v2021_v23  ;;  %2038 = vmatprep.subr.bf16.mxu1 %v2037_v31  ;;  %v474_v44 = vld [vmem:[%s2851_s10 + $0x30] sm:$0xff]  ;;  %v477_v45 = vld [vmem:[%s2851_s10 + $0x48] sm:$0xff]  ;;  %v479_v46 = vld [vmem:[%s2851_s10 + $0x58] sm:$0xff]  ;;  %vm2348_vm4 = vmmov 0   ;;  %vm707_vm5 = vcmask 74752   ;;  %vm1838_vm6 = vcmask 261126  }
  0x12   :  { %2042 = vmatprep.subr.bf16.mxu0 %v2507_v33  ;;  %604 = vrot.lane.b32.xlu1 %v603_v39, %s2345_s17  ;;  %v286_v47 = vld [vmem:[%s2843_s2 + $0x8] sm:$0xff]  ;;  %v2549_v48 = vpack.c.bf16 %v474_v44, %v472_v43  ;;  %v2553_v49 = vpack.c.bf16 %v479_v46, %v477_v45  ;;  %v476_v50 = vld [vmem:[%s2851_s10 + $0x40] sm:$0xff]  ;;  %v478_v51 = vld [vmem:[%s2851_s10 + $0x50] sm:$0xff]  ;;  %v2347_v39 = vmov 0.0|0.0   ;;  %s2350_s3 = smov [#allocation6]  }
  0x13   :  { %v481_v52 = vld [vmem:[%s2851_s10 + $0x68] sm:$0xff]  ;;  %v483_v53 = vld [vmem:[%s2851_s10 + $0x78] sm:$0xff]  ;;  %v2569_v54 = vpack.c.bf16 %v478_v51, %v476_v50  ;;  %v480_v56 = vld [vmem:[%s2851_s10 + $0x60] sm:$0xff]  ;;  %s1852_s26 = sshll.u32 %s2350_s3, 4  ;;  %s1853_s26 = int_to_ptr.vmem [resolvable:$true] %s1852_s26 }
  0x14   :  { %1963 = vmatmul.mubr.msk.f32.vlgmr.msra.gmra.mrb[0].mxu0 %vm113_vm0, %v102_v40  ;;  %2040 = vmatpush3.bf16.msra.mxu1 %v2037_v31  ;;  %v2572_v55 = vpack.c.bf16 %v483_v53, %v481_v52  ;;  %v482_v57 = vld [vmem:[%s2851_s10 + $0x70] sm:$0xff]  ;;  %v484_v59 = vld [vmem:[#allocation2] sm:$0x3]  ;;  %v485_v14 = vld [vmem:[#allocation3] sm:$0x3]  ;;  %s2320_s5 = scalar_lea.vmem %s1853_s26, 32  ;;  %p2325_p1 = scmp.lt.s32.totalorder %s1853_s26, %s1853_s26 }
  0x15   :  { %2044 = vmatpush1.bf16.msra.mxu0 %v2526_v41  ;;  %555 = vmatprep.mubr.f32.mxu0 %v2344_v6  ;;  %v2581_v58 = vpack.c.bf16 %v482_v57, %v480_v56  ;;  %v1876_v60 = vld [vmem:[%s2849_s8] ss:$0 sm:$0xff]  ;;  %s2346_s8 = smov 64   ;;  %v628_v37 = vld [vmem:[%s2853_s12 + $0x8] sm:$0xff]  ;;  %v629_v38 = vld [vmem:[%s2853_s12 + $0x10] sm:$0xff]  ;;  %p2321_p0 = scmp.ne.s32.totalorder %s1853_s26, %s2320_s5 }
  0x16   :  { %2046 = vmatprep.subr.bf16.mxu0 %v2529_v42  ;;  %v1881_v0 = vld [vmem:[%s2850_s9] ss:$0 sm:$0xff]  ;;  %2057 = vmatprep.subr.bf16.mxu1 %v2347_v39  ;;  %v630_v43 = vld [vmem:[%s2853_s12 + $0x18] sm:$0xff]  ;;  %p2326_p2 = scmp.lt.s32.totalorder %s2320_s5, %s2320_s5 }
  0x17   :  { %1985 = vmatmul.mubr.msk.f32.vlgmr.msra.gmra.mrb[0].mxu1 %vm113_vm0, %v286_v47  ;;  %v627_v36 = vld [vmem:[%s2853_s12] sm:$0xff]  ;;  %v2061_v44 = vpack.c.bf16 %v630_v43, %v629_v38 }
  0x18   :  { %v2058_v40 = vpack.c.bf16 %v628_v37, %v627_v36  ;;  %1995 = vmatprep.mubr.msk.f32.mxu1 %vm2348_vm4, %v2344_v6  ;;  %p2327_p3 = por %p2326_p2, %p2325_p1 }
  0x19   :  { %2048 = vmatpush1.bf16.msra.mxu0 %v2549_v48 }
  0x1a   :  { %2050 = vmatprep.subr.bf16.mxu0 %v2553_v49  ;;  %2059 = vmatpush3.bf16.msra.mxu1 %v2058_v40  ;;  %p2328_p4 = pnand %p2327_p3, %p2321_p0 }
  0x1b   :  { %2060 = vmatprep.subr.bf16.mxu1 %v2347_v39 }
  0x1d   :  { %2052 = vmatpush1.bf16.msra.mxu0 %v2569_v54 }
  0x1e   :  { %2054 = vmatprep.subr.bf16.mxu0 %v2572_v55  ;;  %2062 = vmatpush3.bf16.msra.mxu1 %v2061_v44 }
  0x1f   :  { %2064 = vmatprep.subr.bf16.mxu1 %v2507_v33 }
  0x21   :  { %2056 = vmatpush1.bf16.msra.mxu0 %v2581_v58 }
  0x22   :  { %2080 = vmatprep.subr.bf16.mxu0 %v2507_v33 }
  0x24   :  { %1882 = vmatmul.mubr.msk.f32.vlgmr.msra.gmra.mrb[2].mxu0 %vm487_vm3, %v484_v59 }
  0x25   :  { %2082 = vmatpush1.bf16.msra.mxu0 %v2526_v41  ;;  %933 = vmatprep.mubr.f32.mxu0 %v2344_v6 }
  0x26   :  { %2084 = vmatprep.subr.bf16.mxu0 %v2529_v42 }
  0x29   :  { %2086 = vmatpush1.bf16.msra.mxu0 %v2549_v48 }
  0x2a   :  { %2088 = vmatprep.subr.bf16.mxu0 %v2553_v49 }
  0x2d   :  { %2090 = vmatpush1.bf16.msra.mxu0 %v2569_v54 }
  0x2e   :  { %2092 = vmatprep.subr.bf16.mxu0 %v2572_v55 }
  0x31   :  { %2094 = vmatpush1.bf16.msra.mxu0 %v2581_v58 }
  0x32   :  { %2112 = vmatprep.subr.bf16.mxu0 %v2507_v33 }
  0x84   :  { %v605_v27 = vpop.permute.xlu1 %604 }
  0xe7   :  { %v1964_v61 = vpop.f32.mrb[0].mxu0 }
  0xe8   :  { %v2599_v62 = vadd.f32 %v1964_v61, %v1876_v60  ;;  %v267_v63 = vpop.f32.mrb[1].mxu0 }
  0xe9   :  { %v2608_v9 = vadd.f32 %v1876_v60, %v267_v63 }
  0xea   :  { %v1986_v1 = vpop.f32.mrb[0].mxu1 }
  0xeb   :  { %v450_v2 = vpop.f32.mrb[1].mxu1  ;;  %v2606_v7 = vadd.f32 %v1986_v1, %v1881_v0 }
  0xec   :  { %v2604_v3 = vadd.f32 %v1881_v0, %v450_v2 }
  0xf7   :  { %v557_v4 = vpop.f32.mrb[2].mxu0 }
  0xf8   :  { %v559_v5 = vpop.f32.mrb[3].mxu0  ;;  %v562_v11 = vadd.f32 %v557_v4, %v2608_v9 }
  0xf9   :  { %v564_v8 = vrot.slane %v559_v5, 2 }
  0xfa   :  { %v1883_v16 = vmul.f32 -1.442695, %v562_v11 }
  0xfb   :  { %v566_v10 = vadd.f32 %v564_v8, %v2606_v7 }
  0xfd   :  { %2192 = vtanh.f32 %v566_v10  ;;  %v1884_v15 = vmul.f32 -1.442695, %v566_v10 }
  0xfe   :  { %2194 = vtanh.f32 %v562_v11 }
  0xff   :  { %2196 = vpow2.f32 %v1884_v15 }
 0x100   :  { %2198 = vpow2.f32 %v1883_v16 }
 0x107   :  { %v2193_v12 = vpop.eup %2192 }
 0x108   :  { %609 = vrot.lane.b32.xlu0 %v2193_v12, %s2346_s8  ;;  %v2195_v13 = vpop.eup %2194 }
 0x109   :  { %v2197_v17 = vpop.eup %2196 }
 0x10a   :  { %v598_v18 = vadd.f32 1.0, %v2197_v17  ;;  %v2199_v19 = vpop.eup %2198 }
 0x10b   :  { %v570_v20 = vadd.f32 1.0, %v2199_v19 }
 0x10c   :  { %580 = vrot.lane.b32.xlu0 %v2195_v13, %s2346_s8  ;;  %2200 = vrcp.f32 %v598_v18 }
 0x10d   :  { %2202 = vrcp.f32 %v570_v20 }
 0x110   :  { %575 = vrot.lane.b32.xlu0 %v485_v14, %s2345_s17 }
 0x116   :  { %v2201_v21 = vpop.eup %2200 }
 0x117   :  { %v2203_v24 = vpop.eup %2202  ;;  %v607_v28 = vmul.f32 %v2201_v21, %v605_v27 }
 0x17a   :  { %v610_v22 = vpop.permute.xlu0 %609 }
 0x17b   :  { %v612_v23 = vmul.f32 %v2201_v21, %v610_v22 }
 0x17d   :  { %614 = vrot.lane.b32.xlu1 %v612_v23, %s2345_s17 }
 0x17e   :  { %v581_v25 = vpop.permute.xlu0 %580 }
 0x17f   :  { %v583_v26 = vmul.f32 %v2203_v24, %v581_v25 }
 0x181   :  { %585 = vrot.lane.b32.xlu1 %v583_v26, %s2345_s17 }
 0x182   :  { %v576_v29 = vpop.permute.xlu0 %575 }
 0x183   :  { %v578_v32 = vmul.f32 %v2203_v24, %v576_v29 }
 0x1ef   :  { %v615_v30 = vpop.permute.xlu1 %614 }
 0x1f0   :  { %v2617_v31 = vadd.f32 %v615_v30, %v607_v28 }
 0x1f2   :  { %2204 = vtanh.f32 %v2617_v31  ;;  %v836_v25 = vrot.slane %v2617_v31, 2 }
 0x1f3   :  { %v586_v34 = vpop.permute.xlu1 %585 }
 0x1f4   :  { %v2620_v35 = vadd.f32 %v586_v34, %v578_v32 }
 0x1f6   :  { %2206 = vtanh.f32 %v2620_v35 }
 0x1fc   :  { %v2205_v45 = vpop.eup %2204 }
 0x1fd   :  { %620 = vrot.lane.b32.xlu0 %v2205_v45, %s2346_s8 }
 0x200   :  { %v2207_v46 = vpop.eup %2206 }
 0x201   :  { %591 = vrot.lane.b32.xlu1 %v2207_v46, %s2346_s8 }
 0x26f   :  { %v621_v47 = vpop.permute.xlu0 %620 }
 0x270   :  { %v623_v50 = vmul.f32 %v2201_v21, %v621_v47 }
 0x272   :  { %v632_v51 = vrot.slane %v623_v50, 6 }
 0x273   :  { %v592_v52 = vpop.permute.xlu1 %591 }
 0x274   :  { %v594_v53 = vmul.f32 %v2203_v24, %v592_v52  ;;  %633 = vrot.lane.b32.xlu0 %v632_v51, %s2345_s17  ;;  %v809_v24 = vrot.slane %v2620_v35, 6 }
 0x276   :  { %710 = vrot.lane.b32.xlu1 %v594_v53, %s2345_s17 }
 0x278   :  { %715 = vrot.lane.b32.xlu0 %v632_v51, %s2346_s8 }
 0x2e6   :  { %v634_v56 = vpop.permute.xlu0 %633 }
 0x2e7   :  { %1996 = vmatmul.mubr.msk.f32.vlgmr.msra.gmra.mrb[2].mxu1 %vm113_vm0, %v634_v56 }
 0x2e8   :  { %2066 = vmatpush1.bf16.msra.mxu1 %v2526_v41  ;;  %786 = vmatprep.mubr.f32.mxu1 %v2344_v6  ;;  %v711_v59 = vpop.permute.xlu1 %710 }
 0x2e9   :  { %2068 = vmatprep.subr.bf16.mxu1 %v2529_v42 }
 0x2ea   :  { %v716_v57 = vpop.permute.xlu0 %715 }
 0x2eb   :  { %v718_v60 = vsel %vm113_vm0, %v711_v59, %v716_v57 }
 0x2ec   :  { %2070 = vmatpush1.bf16.msra.mxu1 %v2549_v48 }
 0x2ed   :  { %2072 = vmatprep.subr.bf16.mxu1 %v2553_v49 }
 0x2f0   :  { %2074 = vmatpush1.bf16.msra.mxu1 %v2569_v54 }
 0x2f1   :  { %2076 = vmatprep.subr.bf16.mxu1 %v2572_v55 }
 0x2f4   :  { %2078 = vmatpush1.bf16.msra.mxu1 %v2581_v58 }
 0x2f5   :  { %2096 = vmatprep.subr.bf16.mxu1 %v2507_v33 }
 0x2f7   :  { %1886 = vmatmul.mubr.msk.f32.vlgmr.msra.gmra.mrb[4].mxu1 %vm487_vm3, %v718_v60 }
 0x2f8   :  { %2098 = vmatpush1.bf16.msra.mxu1 %v2526_v41  ;;  %1080 = vmatprep.mubr.f32.mxu1 %v2344_v6 }
 0x2f9   :  { %2100 = vmatprep.subr.bf16.mxu1 %v2529_v42 }
 0x2fc   :  { %2102 = vmatpush1.bf16.msra.mxu1 %v2549_v48 }
 0x2fd   :  { %2104 = vmatprep.subr.bf16.mxu1 %v2553_v49 }
 0x300   :  { %2106 = vmatpush1.bf16.msra.mxu1 %v2569_v54 }
 0x301   :  { %2108 = vmatprep.subr.bf16.mxu1 %v2572_v55 }
 0x304   :  { %2110 = vmatpush1.bf16.msra.mxu1 %v2581_v58 }
 0x305   :  { %2128 = vmatprep.subr.bf16.mxu1 %v2507_v33 }
 0x3ba   :  { %v703_v61 = vpop.f32.mrb[2].mxu1 }
 0x3bb   :  { %708 = vst.msk [vmem:[#allocation5] sm:$0x3] %vm707_vm5, %v703_v61  ;;  %v1997_v63 = vpop.f32.mrb[3].mxu1 }
 0x3ca   :  { %v788_v0 = vpop.f32.mrb[4].mxu1 }
 0x3cb   :  { %v794_v1 = vrot.slane %v788_v0, 6  ;;  %v790_v2 = vpop.f32.mrb[5].mxu1 }
 0x3cc   :  { %v798_v4 = vrot.slane %v790_v2, 4 }
 0x3cd   :  { %v796_v5 = vadd.f32 %v794_v1, %v2608_v9 }
 0x3ce   :  { %v800_v8 = vadd.f32 %v798_v4, %v2606_v7 }
 0x3cf   :  { %2208 = vtanh.f32 %v796_v5  ;;  %v1887_v12 = vmul.f32 -1.442695, %v796_v5 }
 0x3d0   :  { %2210 = vtanh.f32 %v800_v8  ;;  %v1888_v13 = vmul.f32 -1.442695, %v800_v8 }
 0x3d1   :  { %2212 = vpow2.f32 %v1887_v12 }
 0x3d2   :  { %2214 = vpow2.f32 %v1888_v13 }
 0x3d9   :  { %v2209_v10 = vpop.eup %2208 }
 0x3da   :  { %v2211_v11 = vpop.eup %2210  ;;  %813 = vrot.lane.b32.xlu0 %v2209_v10, %s2346_s8 }
 0x3db   :  { %840 = vrot.lane.b32.xlu1 %v2211_v11, %s2346_s8  ;;  %v2213_v14 = vpop.eup %2212 }
 0x3dc   :  { %v2215_v15 = vpop.eup %2214  ;;  %v804_v16 = vadd.f32 1.0, %v2213_v14 }
 0x3dd   :  { %v831_v17 = vadd.f32 1.0, %v2215_v15 }
 0x3de   :  { %2216 = vrcp.f32 %v804_v16 }
 0x3df   :  { %2218 = vrcp.f32 %v831_v17 }
 0x3e8   :  { %v2217_v18 = vpop.eup %2216 }
 0x3e9   :  { %v2219_v20 = vpop.eup %2218  ;;  %v811_v26 = vmul.f32 %v2217_v18, %v809_v24 }
 0x3ea   :  { %v838_v28 = vmul.f32 %v2219_v20, %v836_v25 }
 0x44c   :  { %v814_v19 = vpop.permute.xlu0 %813 }
 0x44d   :  { %v816_v21 = vmul.f32 %v2217_v18, %v814_v19  ;;  %v841_v22 = vpop.permute.xlu1 %840 }
 0x44e   :  { %v843_v23 = vmul.f32 %v2219_v20, %v841_v22 }
 0x44f   :  { %818 = vrot.lane.b32.xlu0 %v816_v21, %s2345_s17 }
 0x450   :  { %845 = vrot.lane.b32.xlu1 %v843_v23, %s2345_s17 }
 0x4c1   :  { %v819_v27 = vpop.permute.xlu0 %818 }
 0x4c2   :  { %v2675_v29 = vadd.f32 %v819_v27, %v811_v26  ;;  %v846_v30 = vpop.permute.xlu1 %845 }
 0x4c3   :  { %v2677_v32 = vadd.f32 %v846_v30, %v838_v28 }
 0x4c4   :  { %2220 = vtanh.f32 %v2675_v29  ;;  %v956_v13 = vrot.slane %v2675_v29, 6 }
 0x4c5   :  { %2222 = vtanh.f32 %v2677_v32  ;;  %v983_v14 = vrot.slane %v2677_v32, 2 }
 0x4ce   :  { %v2221_v34 = vpop.eup %2220 }
 0x4cf   :  { %v2223_v36 = vpop.eup %2222  ;;  %824 = vrot.lane.b32.xlu0 %v2221_v34, %s2346_s8 }
 0x4d0   :  { %851 = vrot.lane.b32.xlu1 %v2223_v36, %s2346_s8 }
 0x541   :  { %v825_v35 = vpop.permute.xlu0 %824 }
 0x542   :  { %v827_v31 = vmul.f32 %v2217_v18, %v825_v35  ;;  %v852_v37 = vpop.permute.xlu1 %851 }
 0x543   :  { %v854_v38 = vmul.f32 %v2219_v20, %v852_v37 }
 0x544   :  { %856 = vrot.lane.b32.xlu1 %v827_v31, %s2345_s17 }
 0x545   :  { %v860_v40 = vrot.slane %v854_v38, 2 }
 0x547   :  { %861 = vrot.lane.b32.xlu0 %v860_v40, %s2346_s8 }
 0x5b6   :  { %v857_v43 = vpop.permute.xlu1 %856 }
 0x5b9   :  { %v862_v44 = vpop.permute.xlu0 %861 }
 0x5ba   :  { %v864_v45 = vsel %vm113_vm0, %v857_v43, %v862_v44 }
 0x5bb   :  { %v866_v46 = vrot.slane %v864_v45, 2 }
 0x5bd   :  { %1889 = vmatmul.mubr.msk.f32.vlgmr.msra.gmra.mrb[4].mxu0 %vm487_vm3, %v866_v46 }
 0x5be   :  { %2114 = vmatpush1.bf16.msra.mxu0 %v2526_v41  ;;  %1224 = vmatprep.mubr.f32.mxu0 %v2344_v6 }
 0x5bf   :  { %2116 = vmatprep.subr.bf16.mxu0 %v2529_v42 }
 0x5c2   :  { %2118 = vmatpush1.bf16.msra.mxu0 %v2549_v48 }
 0x5c3   :  { %2120 = vmatprep.subr.bf16.mxu0 %v2553_v49 }
 0x5c6   :  { %2122 = vmatpush1.bf16.msra.mxu0 %v2569_v54 }
 0x5c7   :  { %2124 = vmatprep.subr.bf16.mxu0 %v2572_v55 }
 0x5ca   :  { %2126 = vmatpush1.bf16.msra.mxu0 %v2581_v58 }
 0x5cb   :  { %2144 = vmatprep.subr.bf16.mxu0 %v2507_v33 }
 0x690   :  { %v935_v47 = vpop.f32.mrb[4].mxu0 }
 0x691   :  { %v941_v50 = vrot.slane %v935_v47, 4  ;;  %v937_v51 = vpop.f32.mrb[5].mxu0 }
 0x692   :  { %v945_v52 = vrot.slane %v937_v51, 6 }
 0x693   :  { %v943_v53 = vadd.f32 %v941_v50, %v2608_v9 }
 0x694   :  { %v947_v56 = vadd.f32 %v945_v52, %v2606_v7 }
 0x695   :  { %2224 = vtanh.f32 %v943_v53  ;;  %v1890_v60 = vmul.f32 -1.442695, %v943_v53 }
 0x696   :  { %2226 = vtanh.f32 %v947_v56  ;;  %v1891_v61 = vmul.f32 -1.442695, %v947_v56 }
 0x697   :  { %2228 = vpow2.f32 %v1890_v60 }
 0x698   :  { %2230 = vpow2.f32 %v1891_v61 }
 0x69f   :  { %v2225_v57 = vpop.eup %2224 }
 0x6a0   :  { %v2227_v59 = vpop.eup %2226  ;;  %960 = vrot.lane.b32.xlu0 %v2225_v57, %s2346_s8 }
 0x6a1   :  { %987 = vrot.lane.b32.xlu1 %v2227_v59, %s2346_s8  ;;  %v2229_v63 = vpop.eup %2228 }
 0x6a2   :  { %v2231_v0 = vpop.eup %2230  ;;  %v951_v1 = vadd.f32 1.0, %v2229_v63 }
 0x6a3   :  { %v978_v2 = vadd.f32 1.0, %v2231_v0 }
 0x6a4   :  { %2232 = vrcp.f32 %v951_v1 }
 0x6a5   :  { %2234 = vrcp.f32 %v978_v2 }
 0x6ae   :  { %v2233_v4 = vpop.eup %2232 }
 0x6af   :  { %v2235_v8 = vpop.eup %2234  ;;  %v958_v15 = vmul.f32 %v2233_v4, %v956_v13 }
 0x6b0   :  { %v985_v17 = vmul.f32 %v2235_v8, %v983_v14 }
 0x712   :  { %v961_v5 = vpop.permute.xlu0 %960 }
 0x713   :  { %v963_v10 = vmul.f32 %v2233_v4, %v961_v5  ;;  %v988_v11 = vpop.permute.xlu1 %987 }
 0x714   :  { %v990_v12 = vmul.f32 %v2235_v8, %v988_v11 }
 0x715   :  { %965 = vrot.lane.b32.xlu0 %v963_v10, %s2345_s17 }
 0x716   :  { %992 = vrot.lane.b32.xlu1 %v990_v12, %s2345_s17 }
 0x787   :  { %v966_v16 = vpop.permute.xlu0 %965 }
 0x788   :  { %v2704_v18 = vadd.f32 %v966_v16, %v958_v15  ;;  %v993_v19 = vpop.permute.xlu1 %992 }
 0x789   :  { %v995_v20 = vadd.f32 %v993_v19, %v985_v17 }
 0x78a   :  { %2236 = vtanh.f32 %v2704_v18  ;;  %v1100_v57 = vrot.slane %v2704_v18, 6 }
 0x78b   :  { %2238 = vtanh.f32 %v995_v20  ;;  %v1127_v56 = vrot.slane %v995_v20, 2 }
 0x794   :  { %v2237_v21 = vpop.eup %2236 }
 0x795   :  { %v2239_v22 = vpop.eup %2238  ;;  %971 = vrot.lane.b32.xlu0 %v2237_v21, %s2346_s8 }
 0x796   :  { %998 = vrot.lane.b32.xlu1 %v2239_v22, %s2346_s8 }
 0x807   :  { %v972_v23 = vpop.permute.xlu0 %971 }
 0x808   :  { %v974_v24 = vmul.f32 %v2233_v4, %v972_v23  ;;  %v999_v25 = vpop.permute.xlu1 %998 }
 0x809   :  { %v1001_v26 = vmul.f32 %v2235_v8, %v999_v25 }
 0x80a   :  { %1003 = vrot.lane.b32.xlu1 %v974_v24, %s2345_s17 }
 0x80b   :  { %v1007_v27 = vrot.slane %v1001_v26, 6 }
 0x80d   :  { %1008 = vrot.lane.b32.xlu0 %v1007_v27, %s2346_s8 }
 0x87c   :  { %v1004_v28 = vpop.permute.xlu1 %1003 }
 0x87f   :  { %v1009_v29 = vpop.permute.xlu0 %1008 }
 0x880   :  { %v1011_v30 = vsel %vm113_vm0, %v1004_v28, %v1009_v29 }
 0x881   :  { %v1013_v32 = vrot.slane %v1011_v30, 4 }
 0x883   :  { %1892 = vmatmul.mubr.msk.f32.vlgmr.msra.gmra.mrb[6].mxu1 %vm487_vm3, %v1013_v32 }
 0x884   :  { %2130 = vmatpush1.bf16.msra.mxu1 %v2526_v41  ;;  %1367 = vmatprep.mubr.f32.mxu1 %v2344_v6 }
 0x885   :  { %2132 = vmatprep.subr.bf16.mxu1 %v2529_v42 }
 0x888   :  { %2134 = vmatpush1.bf16.msra.mxu1 %v2549_v48 }
 0x889   :  { %2136 = vmatprep.subr.bf16.mxu1 %v2553_v49 }
 0x88c   :  { %2138 = vmatpush1.bf16.msra.mxu1 %v2569_v54 }
 0x88d   :  { %2140 = vmatprep.subr.bf16.mxu1 %v2572_v55 }
 0x890   :  { %2142 = vmatpush1.bf16.msra.mxu1 %v2581_v58 }
 0x891   :  { %2160 = vmatprep.subr.bf16.mxu1 %v2507_v33 }
 0x956   :  { %v1082_v34 = vpop.f32.mrb[6].mxu1 }
 0x957   :  { %v1088_v36 = vrot.slane %v1082_v34, 2  ;;  %v1084_v35 = vpop.f32.mrb[7].mxu1 }
 0x958   :  { %v1091_v31 = vadd.f32 %v1084_v35, %v2606_v7 }
 0x959   :  { %v1090_v37 = vadd.f32 %v1088_v36, %v2608_v9 }
 0x95a   :  { %2240 = vtanh.f32 %v1091_v31  ;;  %v1894_v43 = vmul.f32 -1.442695, %v1091_v31 }
 0x95b   :  { %2242 = vtanh.f32 %v1090_v37  ;;  %v1893_v44 = vmul.f32 -1.442695, %v1090_v37 }
 0x95c   :  { %2244 = vpow2.f32 %v1894_v43 }
 0x95d   :  { %2246 = vpow2.f32 %v1893_v44 }
 0x964   :  { %v2241_v38 = vpop.eup %2240 }
 0x965   :  { %v2243_v40 = vpop.eup %2242  ;;  %1131 = vrot.lane.b32.xlu1 %v2241_v38, %s2346_s8 }
 0x966   :  { %1104 = vrot.lane.b32.xlu0 %v2243_v40, %s2346_s8  ;;  %v2245_v33 = vpop.eup %2244 }
 0x967   :  { %v2247_v45 = vpop.eup %2246  ;;  %v1122_v46 = vadd.f32 1.0, %v2245_v33 }
 0x968   :  { %v1095_v47 = vadd.f32 1.0, %v2247_v45 }
 0x969   :  { %2248 = vrcp.f32 %v1122_v46 }
 0x96a   :  { %2250 = vrcp.f32 %v1095_v47 }
 0x973   :  { %v2249_v7 = vpop.eup %2248 }
 0x974   :  { %v2251_v50 = vpop.eup %2250  ;;  %v1129_v59 = vmul.f32 %v2249_v7, %v1127_v56 }
 0x975   :  { %v1102_v61 = vmul.f32 %v2251_v50, %v1100_v57 }
 0x9d7   :  { %v1132_v9 = vpop.permute.xlu1 %1131 }
 0x9d8   :  { %v1134_v51 = vmul.f32 %v2249_v7, %v1132_v9  ;;  %v1105_v52 = vpop.permute.xlu0 %1104 }
 0x9d9   :  { %v1107_v53 = vmul.f32 %v2251_v50, %v1105_v52 }
 0x9da   :  { %1136 = vrot.lane.b32.xlu1 %v1134_v51, %s2345_s17 }
 0x9db   :  { %1109 = vrot.lane.b32.xlu0 %v1107_v53, %s2345_s17 }
 0xa4c   :  { %v1137_v60 = vpop.permute.xlu1 %1136 }
 0xa4d   :  { %v2729_v63 = vadd.f32 %v1137_v60, %v1129_v59  ;;  %v1110_v0 = vpop.permute.xlu0 %1109 }
 0xa4e   :  { %v1112_v1 = vadd.f32 %v1110_v0, %v1102_v61 }
 0xa4f   :  { %2252 = vtanh.f32 %v2729_v63  ;;  %v1271_v40 = vrot.slane %v2729_v63, 2 }
 0xa50   :  { %2254 = vtanh.f32 %v1112_v1  ;;  %v1244_v37 = vrot.slane %v1112_v1, 6 }
 0xa59   :  { %v2253_v2 = vpop.eup %2252 }
 0xa5a   :  { %v2255_v4 = vpop.eup %2254  ;;  %1142 = vrot.lane.b32.xlu1 %v2253_v2, %s2346_s8 }
 0xa5b   :  { %1115 = vrot.lane.b32.xlu0 %v2255_v4, %s2346_s8 }
 0xacc   :  { %v1143_v5 = vpop.permute.xlu1 %1142 }
 0xacd   :  { %v1145_v8 = vmul.f32 %v2249_v7, %v1143_v5  ;;  %v1116_v10 = vpop.permute.xlu0 %1115 }
 0xace   :  { %v1118_v11 = vmul.f32 %v2251_v50, %v1116_v10 }
 0xacf   :  { %v1151_v12 = vrot.slane %v1145_v8, 2 }
 0xad0   :  { %1147 = vrot.lane.b32.xlu1 %v1118_v11, %s2345_s17 }
 0xad1   :  { %1152 = vrot.lane.b32.xlu0 %v1151_v12, %s2346_s8 }
 0xb42   :  { %v1148_v13 = vpop.permute.xlu1 %1147 }
 0xb43   :  { %v1153_v14 = vpop.permute.xlu0 %1152 }
 0xb44   :  { %v1155_v15 = vsel %vm113_vm0, %v1148_v13, %v1153_v14 }
 0xb45   :  { %v1157_v16 = vrot.slane %v1155_v15, 6 }
 0xb47   :  { %1895 = vmatmul.mubr.msk.f32.vlgmr.msra.gmra.mrb[6].mxu0 %vm487_vm3, %v1157_v16 }
 0xb48   :  { %2146 = vmatpush1.bf16.msra.mxu0 %v2526_v41  ;;  %1514 = vmatprep.mubr.f32.mxu0 %v2344_v6 }
 0xb49   :  { %2148 = vmatprep.subr.bf16.mxu0 %v2529_v42 }
 0xb4c   :  { %2150 = vmatpush1.bf16.msra.mxu0 %v2549_v48 }
 0xb4d   :  { %2152 = vmatprep.subr.bf16.mxu0 %v2553_v49 }
 0xb50   :  { %2154 = vmatpush1.bf16.msra.mxu0 %v2569_v54 }
 0xb51   :  { %2156 = vmatprep.subr.bf16.mxu0 %v2572_v55 }
 0xb54   :  { %2158 = vmatpush1.bf16.msra.mxu0 %v2581_v58 }
 0xb55   :  { %2175 = vmatprep.subr.bf16.mxu0 %v2347_v39 }
 0xc1a   :  { %v1226_v17 = vpop.f32.mrb[6].mxu0 }
 0xc1b   :  { %v1231_v18 = vadd.f32 %v1226_v17, %v2599_v62  ;;  %v1228_v19 = vpop.f32.mrb[7].mxu0 }
 0xc1c   :  { %v1233_v20 = vrot.slane %v1228_v19, 2 }
 0xc1d   :  { %2256 = vtanh.f32 %v1231_v18  ;;  %v1896_v24 = vmul.f32 -1.442695, %v1231_v18 }
 0xc1e   :  { %v1235_v21 = vadd.f32 %v1233_v20, %v2604_v3 }
 0xc20   :  { %2258 = vtanh.f32 %v1235_v21  ;;  %v1897_v25 = vmul.f32 -1.442695, %v1235_v21 }
 0xc21   :  { %2260 = vpow2.f32 %v1896_v24 }
 0xc22   :  { %2262 = vpow2.f32 %v1897_v25 }
 0xc27   :  { %v2257_v22 = vpop.eup %2256 }
 0xc28   :  { %1248 = vrot.lane.b32.xlu0 %v2257_v22, %s2346_s8 }
 0xc2a   :  { %v2259_v23 = vpop.eup %2258 }
 0xc2b   :  { %1275 = vrot.lane.b32.xlu1 %v2259_v23, %s2346_s8  ;;  %v2261_v26 = vpop.eup %2260 }
 0xc2c   :  { %v2263_v27 = vpop.eup %2262  ;;  %v1239_v28 = vadd.f32 1.0, %v2261_v26 }
 0xc2d   :  { %v1266_v29 = vadd.f32 1.0, %v2263_v27 }
 0xc2e   :  { %2264 = vrcp.f32 %v1239_v28 }
 0xc2f   :  { %2266 = vrcp.f32 %v1266_v29 }
 0xc38   :  { %v2265_v30 = vpop.eup %2264 }
 0xc39   :  { %v2267_v36 = vpop.eup %2266  ;;  %v1246_v38 = vmul.f32 %v2265_v30, %v1244_v37 }
 0xc3a   :  { %v1273_v33 = vmul.f32 %v2267_v36, %v1271_v40 }
 0xc9a   :  { %v1249_v32 = vpop.permute.xlu0 %1248 }
 0xc9b   :  { %v1251_v34 = vmul.f32 %v2265_v30, %v1249_v32 }
 0xc9d   :  { %1253 = vrot.lane.b32.xlu0 %v1251_v34, %s2345_s17  ;;  %v1276_v35 = vpop.permute.xlu1 %1275 }
 0xc9e   :  { %v1278_v31 = vmul.f32 %v2267_v36, %v1276_v35 }
 0xca0   :  { %1280 = vrot.lane.b32.xlu1 %v1278_v31, %s2345_s17 }
 0xd0f   :  { %v1254_v43 = vpop.permute.xlu0 %1253 }
 0xd10   :  { %v1256_v44 = vadd.f32 %v1254_v43, %v1246_v38 }
 0xd12   :  { %2268 = vtanh.f32 %v1256_v44  ;;  %v1281_v45 = vpop.permute.xlu1 %1280  ;;  %v1390_v14 = vrot.slane %v1256_v44, 6 }
 0xd13   :  { %v1283_v46 = vadd.f32 %v1281_v45, %v1273_v33 }
 0xd15   :  { %2270 = vtanh.f32 %v1283_v46  ;;  %v1417_v15 = vrot.slane %v1283_v46, 2 }
 0xd1c   :  { %v2269_v47 = vpop.eup %2268 }
 0xd1d   :  { %1259 = vrot.lane.b32.xlu0 %v2269_v47, %s2346_s8 }
 0xd1f   :  { %v2271_v7 = vpop.eup %2270 }
 0xd20   :  { %1286 = vrot.lane.b32.xlu1 %v2271_v7, %s2346_s8 }
 0xd8f   :  { %v1260_v9 = vpop.permute.xlu0 %1259 }
 0xd90   :  { %v1262_v50 = vmul.f32 %v2265_v30, %v1260_v9 }
 0xd92   :  { %1291 = vrot.lane.b32.xlu1 %v1262_v50, %s2345_s17  ;;  %v1287_v51 = vpop.permute.xlu1 %1286 }
 0xd93   :  { %v1289_v52 = vmul.f32 %v2267_v36, %v1287_v51 }
 0xd95   :  { %v1295_v53 = vrot.slane %v1289_v52, 6 }
 0xd97   :  { %1296 = vrot.lane.b32.xlu0 %v1295_v53, %s2346_s8 }
 0xe04   :  { %v1292_v56 = vpop.permute.xlu1 %1291 }
 0xe09   :  { %v1297_v57 = vpop.permute.xlu0 %1296 }
 0xe0a   :  { %v1299_v59 = vsel %vm113_vm0, %v1292_v56, %v1297_v57 }
 0xe0b   :  { %1898 = vmatmul.mubr.msk.f32.vlgmr.msra.gmra.mrb[8].mxu1 %vm487_vm3, %v1299_v59 }
 0xe0c   :  { %2162 = vmatpush1.bf16.msra.mxu1 %v2526_v41  ;;  %1661 = vmatprep.mubr.f32.mxu1 %v2344_v6 }
 0xe0d   :  { %2164 = vmatprep.subr.bf16.mxu1 %v2529_v42 }
 0xe10   :  { %2166 = vmatpush1.bf16.msra.mxu1 %v2549_v48 }
 0xe11   :  { %2168 = vmatprep.subr.bf16.mxu1 %v2553_v49 }
 0xe14   :  { %2170 = vmatpush1.bf16.msra.mxu1 %v2569_v54 }
 0xe15   :  { %2172 = vmatprep.subr.bf16.mxu1 %v2572_v55 }
 0xe18   :  { %2174 = vmatpush1.bf16.msra.mxu1 %v2581_v58 }
 0xede   :  { %v1369_v60 = vpop.f32.mrb[8].mxu1 }
 0xedf   :  { %v1375_v61 = vrot.slane %v1369_v60, 6  ;;  %v1371_v63 = vpop.f32.mrb[9].mxu1 }
 0xee0   :  { %v1379_v0 = vrot.slane %v1371_v63, 4 }
 0xee1   :  { %v1377_v41 = vadd.f32 %v1375_v61, %v2599_v62 }
 0xee2   :  { %v1381_v1 = vadd.f32 %v1379_v0, %v2604_v3 }
 0xee3   :  { %2272 = vtanh.f32 %v1377_v41  ;;  %v1899_v49 = vmul.f32 -1.442695, %v1377_v41 }
 0xee4   :  { %2274 = vtanh.f32 %v1381_v1  ;;  %v1900_v54 = vmul.f32 -1.442695, %v1381_v1 }
 0xee5   :  { %2276 = vpow2.f32 %v1899_v49 }
 0xee6   :  { %2278 = vpow2.f32 %v1900_v54 }
 0xeed   :  { %v2273_v42 = vpop.eup %2272 }
 0xeee   :  { %v2275_v48 = vpop.eup %2274  ;;  %1394 = vrot.lane.b32.xlu0 %v2273_v42, %s2346_s8 }
 0xeef   :  { %1421 = vrot.lane.b32.xlu1 %v2275_v48, %s2346_s8  ;;  %v2277_v55 = vpop.eup %2276 }
 0xef0   :  { %v2279_v58 = vpop.eup %2278  ;;  %v1385_v2 = vadd.f32 1.0, %v2277_v55 }
 0xef1   :  { %v1412_v4 = vadd.f32 1.0, %v2279_v58 }
 0xef2   :  { %2280 = vrcp.f32 %v1385_v2 }
 0xef3   :  { %2282 = vrcp.f32 %v1412_v4 }
 0xefc   :  { %v2281_v5 = vpop.eup %2280 }
 0xefd   :  { %v2283_v10 = vpop.eup %2282  ;;  %v1392_v16 = vmul.f32 %v2281_v5, %v1390_v14 }
 0xefe   :  { %v1419_v18 = vmul.f32 %v2283_v10, %v1417_v15 }
 0xf60   :  { %v1395_v8 = vpop.permute.xlu0 %1394 }
 0xf61   :  { %v1397_v11 = vmul.f32 %v2281_v5, %v1395_v8  ;;  %v1422_v12 = vpop.permute.xlu1 %1421 }
 0xf62   :  { %v1424_v13 = vmul.f32 %v2283_v10, %v1422_v12 }
 0xf63   :  { %1399 = vrot.lane.b32.xlu0 %v1397_v11, %s2345_s17 }
 0xf64   :  { %1426 = vrot.lane.b32.xlu1 %v1424_v13, %s2345_s17 }
 0xfd5   :  { %v1400_v17 = vpop.permute.xlu0 %1399 }
 0xfd6   :  { %v1402_v19 = vadd.f32 %v1400_v17, %v1392_v16  ;;  %v1427_v20 = vpop.permute.xlu1 %1426 }
 0xfd7   :  { %v1429_v21 = vadd.f32 %v1427_v20, %v1419_v18 }
 0xfd8   :  { %2284 = vtanh.f32 %v1402_v19  ;;  %v1537_v57 = vrot.slane %v1402_v19, 6 }
 0xfd9   :  { %2286 = vtanh.f32 %v1429_v21  ;;  %v1564_v59 = vrot.slane %v1429_v21, 2 }
 0xfe2   :  { %v2285_v22 = vpop.eup %2284 }
 0xfe3   :  { %v2287_v23 = vpop.eup %2286  ;;  %1405 = vrot.lane.b32.xlu0 %v2285_v22, %s2346_s8 }
 0xfe4   :  { %1432 = vrot.lane.b32.xlu1 %v2287_v23, %s2346_s8 }
0x1055   :  { %v1406_v24 = vpop.permute.xlu0 %1405 }
0x1056   :  { %v1408_v25 = vmul.f32 %v2281_v5, %v1406_v24  ;;  %v1433_v26 = vpop.permute.xlu1 %1432 }
0x1057   :  { %v1435_v27 = vmul.f32 %v2283_v10, %v1433_v26 }
0x1058   :  { %1437 = vrot.lane.b32.xlu1 %v1408_v25, %s2345_s17 }
0x1059   :  { %v1441_v28 = vrot.slane %v1435_v27, 2 }
0x105b   :  { %1442 = vrot.lane.b32.xlu0 %v1441_v28, %s2346_s8  ;;  %v1731_v28 = vld [vmem:[%s2852_s11] sm:$0xff] }
0x10ca   :  { %v1438_v29 = vpop.permute.xlu1 %1437 }
0x10cd   :  { %v1443_v30 = vpop.permute.xlu0 %1442 }
0x10ce   :  { %v1445_v32 = vsel %vm113_vm0, %v1438_v29, %v1443_v30  ;;  %v1732_v29 = vld [vmem:[%s2852_s11 + $0x8] sm:$0xff]  ;;  %v1733_v30 = vld [vmem:[%s2852_s11 + $0x10] sm:$0xff] }
0x10cf   :  { %v1447_v34 = vrot.slane %v1445_v32, 2  ;;  %v1734_v32 = vld [vmem:[%s2852_s11 + $0x18] sm:$0xff]  ;;  %s2349_s11 = smov 96  }
0x10d1   :  { %1901 = vmatmul.mubr.msk.f32.vlgmr.msra.gmra.mrb[8].mxu0 %vm487_vm3, %v1447_v34  ;;  %v2179_v34 = vpack.c.bf16 %v1734_v32, %v1733_v30 }
0x10d2   :  { %2006 = vmatprep.mubr.msk.f32.mxu0 %vm2348_vm4, %v2344_v6 }
0x11a4   :  { %v1516_v36 = vpop.f32.mrb[8].mxu0 }
0x11a5   :  { %v1522_v35 = vrot.slane %v1516_v36, 4  ;;  %v1518_v31 = vpop.f32.mrb[9].mxu0 }
0x11a6   :  { %v1526_v37 = vrot.slane %v1518_v31, 6 }
0x11a7   :  { %v1524_v38 = vadd.f32 %v1522_v35, %v2599_v62 }
0x11a8   :  { %v1528_v40 = vadd.f32 %v1526_v37, %v2604_v3 }
0x11a9   :  { %2288 = vtanh.f32 %v1524_v38  ;;  %v1902_v33 = vmul.f32 -1.442695, %v1524_v38 }
0x11aa   :  { %2290 = vtanh.f32 %v1528_v40  ;;  %v1903_v45 = vmul.f32 -1.442695, %v1528_v40 }
0x11ab   :  { %2292 = vpow2.f32 %v1902_v33 }
0x11ac   :  { %2294 = vpow2.f32 %v1903_v45 }
0x11b3   :  { %v2289_v43 = vpop.eup %2288 }
0x11b4   :  { %v2291_v44 = vpop.eup %2290  ;;  %1541 = vrot.lane.b32.xlu0 %v2289_v43, %s2346_s8 }
0x11b5   :  { %1568 = vrot.lane.b32.xlu1 %v2291_v44, %s2346_s8  ;;  %v2293_v6 = vpop.eup %2292 }
0x11b6   :  { %v2295_v46 = vpop.eup %2294  ;;  %v1532_v47 = vadd.f32 1.0, %v2293_v6 }
0x11b7   :  { %v1559_v7 = vadd.f32 1.0, %v2295_v46 }
0x11b8   :  { %2296 = vrcp.f32 %v1532_v47 }
0x11b9   :  { %2298 = vrcp.f32 %v1559_v7 }
0x11c2   :  { %v2297_v9 = vpop.eup %2296 }
0x11c3   :  { %v2299_v51 = vpop.eup %2298  ;;  %v1539_v60 = vmul.f32 %v2297_v9, %v1537_v57 }
0x11c4   :  { %v1566_v63 = vmul.f32 %v2299_v51, %v1564_v59  ;;  %v1908_v59 = vld [vmem:[%s2854_s13] ss:$0 sm:$0xff] }
0x1226   :  { %v1542_v50 = vpop.permute.xlu0 %1541 }
0x1227   :  { %v1544_v52 = vmul.f32 %v2297_v9, %v1542_v50  ;;  %v1569_v53 = vpop.permute.xlu1 %1568 }
0x1228   :  { %v1571_v56 = vmul.f32 %v2299_v51, %v1569_v53 }
0x1229   :  { %1546 = vrot.lane.b32.xlu0 %v1544_v52, %s2345_s17 }
0x122a   :  { %1573 = vrot.lane.b32.xlu1 %v1571_v56, %s2345_s17  ;;  %v1730_v56 = vld [vmem:[#allocation5] sm:$0x3] }
0x129b   :  { %v1547_v61 = vpop.permute.xlu0 %1546 }
0x129c   :  { %v1549_v0 = vadd.f32 %v1547_v61, %v1539_v60  ;;  %v1574_v41 = vpop.permute.xlu1 %1573 }
0x129d   :  { %v2788_v1 = vadd.f32 %v1574_v41, %v1566_v63 }
0x129e   :  { %2300 = vtanh.f32 %v1549_v0  ;;  %v1681_v22 = vrot.slane %v1549_v0, 6 }
0x129f   :  { %2302 = vtanh.f32 %v2788_v1  ;;  %v1708_v45 = vrot.slane %v2788_v1, 2 }
0x12a8   :  { %v2301_v42 = vpop.eup %2300 }
0x12a9   :  { %v2303_v48 = vpop.eup %2302  ;;  %1552 = vrot.lane.b32.xlu0 %v2301_v42, %s2346_s8 }
0x12aa   :  { %1579 = vrot.lane.b32.xlu1 %v2303_v48, %s2346_s8 }
0x131b   :  { %v1553_v49 = vpop.permute.xlu0 %1552 }
0x131c   :  { %v1555_v54 = vmul.f32 %v2297_v9, %v1553_v49  ;;  %v1580_v55 = vpop.permute.xlu1 %1579 }
0x131d   :  { %v1582_v58 = vmul.f32 %v2299_v51, %v1580_v55 }
0x131e   :  { %1584 = vrot.lane.b32.xlu1 %v1555_v54, %s2345_s17 }
0x131f   :  { %v1588_v2 = vrot.slane %v1582_v58, 6 }
0x1321   :  { %1589 = vrot.lane.b32.xlu0 %v1588_v2, %s2346_s8 }
0x1390   :  { %v1585_v4 = vpop.permute.xlu1 %1584 }
0x1393   :  { %v1590_v5 = vpop.permute.xlu0 %1589 }
0x1394   :  { %v1592_v8 = vsel %vm113_vm0, %v1585_v4, %v1590_v5 }
0x1395   :  { %v1594_v10 = vrot.slane %v1592_v8, 4 }
0x1397   :  { %1904 = vmatmul.mubr.msk.f32.vlgmr.msra.gmra.mrb[10].mxu1 %vm487_vm3, %v1594_v10 }
0x146a   :  { %v1663_v11 = vpop.f32.mrb[10].mxu1 }
0x146b   :  { %v1669_v12 = vrot.slane %v1663_v11, 2  ;;  %v1665_v13 = vpop.f32.mrb[11].mxu1 }
0x146d   :  { %v1671_v14 = vadd.f32 %v1669_v12, %v2599_v62  ;;  %v1672_v62 = vadd.f32 %v1665_v13, %v2604_v3  ;;  %v2176_v3 = vpack.c.bf16 %v1732_v29, %v1731_v28 }
0x146f   :  { %2304 = vtanh.f32 %v1671_v14  ;;  %v1905_v16 = vmul.f32 -1.442695, %v1671_v14  ;;  %2177 = vmatpush3.bf16.msra.mxu0 %v2176_v3  ;;  %v1906_v36 = vmul.f32 -1.442695, %v1672_v62 }
0x1470   :  { %2178 = vmatprep.subr.bf16.mxu0 %v2347_v39 }
0x1471   :  { %2306 = vpow2.f32 %v1905_v16 }
0x1473   :  { %2180 = vmatpush3.bf16.msra.mxu0 %v2179_v34 }
0x1479   :  { %v2305_v15 = vpop.eup %2304 }
0x147a   :  { %1685 = vrot.lane.b32.xlu1 %v2305_v15, %s2346_s8 }
0x147b   :  { %v2307_v17 = vpop.eup %2306 }
0x147c   :  { %v1676_v18 = vadd.f32 1.0, %v2307_v17 }
0x147e   :  { %2308 = vrcp.f32 %v1676_v18 }
0x1488   :  { %v2309_v19 = vpop.eup %2308 }
0x1489   :  { %v1683_v23 = vmul.f32 %v2309_v19, %v1681_v22 }
0x14ec   :  { %v1686_v20 = vpop.permute.xlu1 %1685 }
0x14ed   :  { %v1688_v21 = vmul.f32 %v2309_v19, %v1686_v20 }
0x14ef   :  { %1690 = vrot.lane.b32.xlu0 %v1688_v21, %s2345_s17 }
0x1561   :  { %v1691_v24 = vpop.permute.xlu0 %1690 }
0x1562   :  { %v1693_v25 = vadd.f32 %v1691_v24, %v1683_v23 }
0x1564   :  { %2310 = vtanh.f32 %v1693_v25 }
0x1565   :  { %2312 = vtanh.f32 %v1672_v62 }
0x1566   :  { %2314 = vpow2.f32 %v1906_v36 }
0x156e   :  { %v2311_v26 = vpop.eup %2310 }
0x156f   :  { %1696 = vrot.lane.b32.xlu1 %v2311_v26, %s2346_s8  ;;  %v2313_v27 = vpop.eup %2312 }
0x1570   :  { %v2315_v35 = vpop.eup %2314 }
0x1571   :  { %v1703_v31 = vadd.f32 1.0, %v2315_v35 }
0x1573   :  { %1712 = vrot.lane.b32.xlu1 %v2313_v27, %s2346_s8  ;;  %2316 = vrcp.f32 %v1703_v31 }
0x157d   :  { %v2317_v44 = vpop.eup %2316 }
0x157e   :  { %v1710_v6 = vmul.f32 %v2317_v44, %v1708_v45 }
0x15e1   :  { %v1697_v37 = vpop.permute.xlu1 %1696 }
0x15e2   :  { %v1699_v38 = vmul.f32 %v2309_v19, %v1697_v37 }
0x15e4   :  { %v1736_v40 = vrot.slane %v1699_v38, 6 }
0x15e5   :  { %v1713_v43 = vpop.permute.xlu1 %1712 }
0x15e6   :  { %1737 = vrot.lane.b32.xlu0 %v1736_v40, %s2345_s17  ;;  %v1715_v33 = vmul.f32 %v2317_v44, %v1713_v43 }
0x15ea   :  { %1717 = vrot.lane.b32.xlu0 %v1715_v33, %s2345_s17 }
0x15ee   :  { %1823 = vrot.lane.b32.xlu0 %v1699_v38, %s2345_s17 }
0x15f2   :  { %1835 = vrot.lane.b32.xlu0 %v1693_v25, %s2349_s11 }
0x1658   :  { %v1738_v39 = vpop.permute.xlu0 %1737 }
0x1659   :  { %2007 = vmatmul.mubr.msk.f32.vlgmr.msra.gmra.mrb[10].mxu0 %vm113_vm0, %v1738_v39 }
0x165c   :  { %v1718_v46 = vpop.permute.xlu0 %1717 }
0x165d   :  { %v1720_v47 = vadd.f32 %v1718_v46, %v1710_v6 }
0x165f   :  { %2318 = vtanh.f32 %v1720_v47 }
0x1660   :  { %v1824_v7 = vpop.permute.xlu0 %1823 }
0x1664   :  { %v1836_v9 = vpop.permute.xlu0 %1835 }
0x1665   :  { %1839 = vst.msk [vmem:[#allocation3 - $0x6] sm:$0xc0] %vm1838_vm6, %v1836_v9 }
0x1669   :  { %v2319_v50 = vpop.eup %2318 }
0x166a   :  { %1723 = vrot.lane.b32.xlu1 %v2319_v50, %s2346_s8 }
0x16dc   :  { %v1724_v51 = vpop.permute.xlu1 %1723 }
0x16dd   :  { %v1726_v52 = vmul.f32 %v2317_v44, %v1724_v51 }
0x16df   :  { %v1827_v53 = vrot.slane %v1726_v52, 2 }
0x16e1   :  { %1828 = vrot.lane.b32.xlu1 %v1827_v53, %s2346_s8 }
0x16e5   :  { %1841 = vrot.lane.b32.xlu1 %v1720_v47, %s2349_s11 }
0x172c   :  { %v1807_v57 = vpop.f32.mrb[10].mxu0 }
0x172d   :  { %v1811_v60 = vadd.f32 %v1807_v57, %v1730_v56  ;;  %v2008_v61 = vpop.f32.mrb[11].mxu0 }
0x172f   :  { %v1819_v63 = vadd.f32 %v1908_v59, %v1811_v60 }
0x1731   :  { %1821 = vst.msk [vmem:[#allocation6] sm:$0x3] %vm707_vm5, %v1819_v63 }
0x1732   :  { %2331 = shalt.err (!%p2328_p4)
}
0x1733   :  { %s2332_s10 = scalar_lea.hbm %s2855_s14, 32 }
0x1734   :  { %p2333_p5 = scmp.ne.s32.totalorder %s2855_s14, %s2332_s10  ;;  %p2336_p6 = scmp.lt.u32.totalorder %s2332_s10, %s2855_s14 }
0x1736   :  { %p2338_p7 = pnand %p2336_p6, %p2333_p5 }
0x1738   :  { %2341 = shalt.err (!%p2338_p7)
}
0x1739   :  { %1855 = dma.vmem_to_hbm [thread:$0]  %s1853_s26, 32, %s2855_s14, [#allocation7]   ;;  %vm1832_vm7 = vcmask 523270  }
0x1753   :  { %v1829_v0 = vpop.permute.xlu1 %1828 }
0x1754   :  { %v1831_v41 = vsel %vm113_vm0, %v1824_v7, %v1829_v0 }
0x1755   :  { %1833 = vst.msk [vmem:[#allocation2 - $0x6] sm:$0xc0] %vm1832_vm7, %v1831_v41 }
0x1757   :  { %v1842_v1 = vpop.permute.xlu1 %1841 }
0x1758   :  { %1845 = vst.msk [vmem:[#allocation4] sm:$0x3] %vm98_vm2, %v1842_v1 }
0x1759   :  { %2342 = dma.done.wait [#allocation7], 32  }
0x175a   :  { %2343 = vsyncadd [#allocation7], 4294967264 }
0x175b   :  { %1859 = vsyncpa [#allocation7], 1 }

</bundles_post_ra>
